<compile_context>
chip_gen: v7x
topology: tpu7x:2x2x1
jax: 0.10.0
libtpu: 0.0.40
codegen_flags: <defaults>
</compile_context>

<pallas_src>
import functools

import numpy as np
import jax
import jax.numpy as jnp
from jax.experimental import pallas as pl
from jax.experimental.pallas import tpu as pltpu


# ---------------------------------------------------------------------------
# Fused kernel: ECA layer 1 -> ECA layer 2 -> CBAM SpatialGate, one batch element.
# ---------------------------------------------------------------------------
def _fused_kernel(x_ref, eca_ref, sgw_ref, bias_ref, out_ref, *, C, CP, H, W, HWP, R):
    f32 = jnp.float32
    NB = 2 * R + 1
    x = x_ref[...].astype(f32)                              # (CP, HWP), lane-dense

    # ---------------- parallel dilated ECA (two layers) ----------------
    # AdaptiveAvgPool2d(1): spatial mean. Padded lanes are zero -> divide by true H*W.
    y1 = jnp.sum(x, axis=1, keepdims=True) * f32(1.0 / (H * W))     # (CP, 1)
    ch = jax.lax.broadcasted_iota(jnp.int32, (CP, 1), 0)            # channel index

    def banded(y, base):
        # Sum of the 4 Conv1d branches (k=3; dilations 1,2,3,4; zero 'same' padding) along
        # channels, applied as (2R+1) scalar-weighted zero-padded sublane shifts.  Padded
        # channel rows hold y == 0, so they behave exactly like the conv's zero padding.
        z = eca_ref[base + R] * y                                    # offset-0 term
        for o in range(-R, R + 1):
            if o == 0:
                continue
            rolled = pltpu.roll(y, (-o) % CP, axis=0)                # rolled[i] = y[(i+o)%CP]
            valid = jnp.logical_and(ch + o >= 0, ch + o < CP)
            z = z + eca_ref[base + R + o] * jnp.where(valid, rolled, 0.0)
        return z

    att1 = jax.nn.sigmoid(banded(y1, 0))                    # (CP, 1)
    y2 = att1 * y1                                           # == spatial mean of (x * att1)
    att2 = jax.nn.sigmoid(banded(y2, NB))                    # (CP, 1)

    # sc = eca2(eca1(x)) goes straight into out_ref (no extra C*HW VMEM temporary).
    out_ref[...] = (x * (att1 * att2)).astype(out_ref.dtype)

    # ---------------- CBAM SpatialGate ----------------
    # ChannelPool on out_ref: max / mean across channels, packed into (2, HWP) sublanes.
    v = out_ref[...]                                         # (CP, HWP)
    if CP != C:
        # Padded channel rows hold 0; exclude them from the max (mean handled by /C below).
        pmax = jnp.max(jnp.where(ch < C, v, -jnp.inf), axis=0, keepdims=True).astype(f32)
    else:
        pmax = jnp.max(v, axis=0, keepdims=True).astype(f32)
    pmean = jnp.sum(v, axis=0, keepdims=True, dtype=f32) * f32(1.0 / C)

    rowid = jax.lax.broadcasted_iota(jnp.int32, (2, 1), 0)   # (2,1) row selectors
    sel_max = (rowid == 0).astype(f32)
    sel_mean = f32(1.0) - sel_max
    pooled = pmax * sel_max + pmean * sel_mean               # (2, HWP) sublane-packed

    # (h, w) of every flattened lane via float floor-div (exact for H*W < ~2^22; the wrapper
    # guards this).  Padded lanes produce garbage that is sliced off on the host.
    lane = jax.lax.broadcasted_iota(jnp.int32, (1, HWP), 1).astype(f32)
    hi = jnp.floor((lane + 0.5) * f32(1.0 / W))
    wi = lane - hi * W
    w_ok = [jnp.logical_and(wi + d >= 0.0, wi + d <= W - 1.0) for d in range(-3, 4)]

    # 7x7 conv (2 -> 1 channels, zero 'same' padding, BN folded into the weights) applied to
    # the flattened pooled maps: ONE lane roll per tap on the packed (2, HWP) array, per-tap
    # (2,1) weight column from SMEM scalars, 4 partial accumulators.
    accs = [jnp.zeros((2, HWP), f32) for _ in range(4)]
    t = 0
    for di in range(-3, 4):
        h_ok = jnp.logical_and(hi + di >= 0.0, hi + di <= H - 1.0)
        for dj in range(-3, 4):
            off = di * W + dj
            rolled = pooled if off == 0 else pltpu.roll(pooled, (-off) % HWP, axis=1)
            idx = (di + 3) * 7 + (dj + 3)
            wcol = sgw_ref[idx] * sel_max + sgw_ref[49 + idx] * sel_mean   # (2, 1)
            valid = jnp.logical_and(h_ok, w_ok[dj + 3])                    # (1, HWP)
            accs[t % 4] = accs[t % 4] + jnp.where(valid, wcol * rolled, 0.0)
            t += 1
    conv2 = (accs[0] + accs[1]) + (accs[2] + accs[3])        # (2, HWP)
    conv = jnp.sum(conv2, axis=0, keepdims=True)             # (1, HWP): max-row + mean-row
    scale = jax.nn.sigmoid(conv + bias_ref[0])               # (1, HWP)

    out_ref[...] = (out_ref[...].astype(f32) * scale).astype(out_ref.dtype)


# ---------------------------------------------------------------------------
# Host-side parameter preparation + pallas_call glue
# ---------------------------------------------------------------------------
def _band_weights(eca_w, k_size, rates):
    """Combine the 4 dilated Conv1d branches into per-channel-offset weights (-R..R)."""
    dil = [1] + [1 * r for r in rates]          # `strid` is forced to 1 in the module
    R = max(dil) * ((k_size - 1) // 2)
    w = np.asarray(eca_w, np.float32)
    band = np.zeros(2 * R + 1, np.float32)
    for k, d in enumerate(dil):
        for tap in range(k_size):
            band[R + (tap - (k_size - 1) // 2) * d] += w[k, tap]
    return band, R


def dailted_eca_r2_with_cbam(x, eca_w1, eca_w2, sg_w, bn_gamma, bn_beta, bn_mean, bn_var,
                             eps=1e-5, rates=(2, 3, 4), k_size=3):
    B, C, H, W = x.shape
    HW = H * W
    if HW >= (1 << 22):
        raise NotImplementedError("float (h, w) lane decomposition is exact only for H*W < 2^22")
    io_dtype = x.dtype                  # bf16 in / bf16 out supported; kernel math stays f32.

    band1, R = _band_weights(eca_w1, k_size, rates)
    band2, _ = _band_weights(eca_w2, k_size, rates)
    band = jnp.asarray(np.concatenate([band1, band2]), jnp.float32)      # (2*(2R+1),)

    # Fold eval-mode BatchNorm2d(1) into the bias-free 7x7 conv weight + a bias term.
    inv = bn_gamma / jnp.sqrt(bn_var + eps)
    sg_flat = (jnp.asarray(sg_w, jnp.float32) * inv).reshape(-1)         # (2*7*7,)
    bias = jnp.reshape(bn_beta - bn_mean * inv, (1,)).astype(jnp.float32)

    # Pad C to a multiple of 8 (sublanes) and HW to a multiple of 128 (lanes) so the dominant
    # loads/stores are unmasked and rolls stay on aligned rows; padding is sliced off after.
    CP = max(8, -(-C // 8) * 8)
    HWP = max(128, -(-HW // 128) * 128)
    x3 = x.reshape(B, C, HW)
    if CP != C or HWP != HW:
        x3 = jnp.pad(x3, ((0, 0), (0, CP - C), (0, HWP - HW)))

    # VMEM budget: double-buffered in + out blocks (io dtype) plus the f32 in-kernel working
    # set (x upcast, product, pooled/roll temporaries) plus headroom.  Clamp to 85% of the
    # generation's physical VMEM (v5e/v6e: 128 MiB, v7x: 64 MiB per TensorCore).
    io_bytes = jnp.dtype(io_dtype).itemsize
    need = 4 * CP * HWP * io_bytes + 3 * CP * HWP * 4 + (4 << 20)
    try:
        cap = int(pltpu.get_tpu_info().vmem_capacity_bytes)
    except Exception:
        cap = 128 << 20
    vmem_limit = int(min(max(need, 16 << 20), int(cap * 0.85)))

    out3 = pl.pallas_call(
        functools.partial(_fused_kernel, C=C, CP=CP, H=H, W=W, HWP=HWP, R=R),
        out_shape=jax.ShapeDtypeStruct((B, CP, HWP), io_dtype),
        grid=(B,),
        in_specs=[pl.BlockSpec((None, CP, HWP), lambda b: (b, 0, 0)),
                  pl.BlockSpec(memory_space=pltpu.MemorySpace.SMEM),
                  pl.BlockSpec(memory_space=pltpu.MemorySpace.SMEM),
                  pl.BlockSpec(memory_space=pltpu.MemorySpace.SMEM)],
        out_specs=pl.BlockSpec((None, CP, HWP), lambda b: (b, 0, 0)),
        compiler_params=pltpu.CompilerParams(
            dimension_semantics=("parallel",),      # v7x: batch split across the 2 TCs
            vmem_limit_bytes=vmem_limit),
    )(x3, band, sg_flat, bias)
    return out3[:, :C, :HW].reshape(B, C, H, W)


# ---------------------------------------------------------------------------
# Pure-JAX reference mirroring the PyTorch forward (eval mode).
# ---------------------------------------------------------------------------
def _conv1d_branch(y, w3, d):
    # y: (B, C); w3: (3,); Conv1d(1,1,3, dilation=d, padding=d, bias=False)
    B, C = y.shape
    ypad = jnp.pad(y, ((0, 0), (d, d)))
    return (w3[0] * ypad[:, 0:C] + w3[1] * ypad[:, d:d + C]
            + w3[2] * ypad[:, 2 * d:2 * d + C])


def _reference(x, eca_w1, eca_w2, sg_w, bn_gamma, bn_beta, bn_mean, bn_var,
               eps=1e-5, rates=(2, 3, 4), k_size=3):
    dil = [1] + [1 * r for r in rates]

    def eca(inp, w):
        y = inp.mean(axis=(2, 3))                           # (B, C)
        z = jnp.zeros_like(y)
        for k, d in enumerate(dil):
            z = z + _conv1d_branch(y, w[k], d)
        att = jax.nn.sigmoid(z)[:, :, None, None]
        return inp * att                                    # cat=False, res=False

    sc = eca(eca(x, eca_w1), eca_w2)
    pooled = jnp.stack([sc.max(axis=1), sc.mean(axis=1)], axis=1)   # ChannelPool
    conv = jax.lax.conv_general_dilated(
        pooled, sg_w[None], (1, 1), [(3, 3), (3, 3)],
        dimension_numbers=('NCHW', 'OIHW', 'NCHW'))[:, 0]    # (B, H, W)
    bn = (conv - bn_mean) / jnp.sqrt(bn_var + eps) * bn_gamma + bn_beta
    scale = jax.nn.sigmoid(bn)[:, None]                      # (B, 1, H, W)
    return sc * scale                                        # res=False


if __name__ == "__main__":
    key = jax.random.PRNGKey(0)
    kx, k1, k2, k3, kx2 = jax.random.split(key, 5)

    # Parameters (deterministic synthetic init; shapes from the module's __init__):
    #   eca_layer1 / eca_layer2: 4x Conv1d(1, 1, 3, bias=False) each -> (4, 3)
    #   SpatialGate Conv2d(2, 1, 7, bias=False)                       -> (2, 7, 7)
    #   BatchNorm2d(1): gamma=1, beta=0, running_mean=0, running_var=1
    eca_w1 = jax.random.normal(k1, (4, 3), jnp.float32) * 0.3
    eca_w2 = jax.random.normal(k2, (4, 3), jnp.float32) * 0.3
    sg_w = jax.random.normal(k3, (2, 7, 7), jnp.float32) * 0.1
    bn_gamma = jnp.float32(1.0)
    bn_beta = jnp.float32(0.0)
    bn_mean = jnp.float32(0.0)
    bn_var = jnp.float32(1.0)

    # Case 1: aligned shape (C % 8 == 0, H*W % 128 == 0) -> no padding path.
    x = jax.random.normal(kx, (2, 8, 16, 16), jnp.float32)
    out = jax.block_until_ready(dailted_eca_r2_with_cbam(
        x, eca_w1, eca_w2, sg_w, bn_gamma, bn_beta, bn_mean, bn_var))
    ref = _reference(x, eca_w1, eca_w2, sg_w, bn_gamma, bn_beta, bn_mean, bn_var)
    assert out.shape == x.shape
    assert np.allclose(np.asarray(out), np.asarray(ref), rtol=1e-4, atol=2e-5)

    # Case 2: unaligned shape -> exercises the host-side C / HW zero-padding path.
    x2 = jax.random.normal(kx2, (2, 6, 10, 12), jnp.float32)
    out2 = jax.block_until_ready(dailted_eca_r2_with_cbam(
        x2, eca_w1, eca_w2, sg_w, bn_gamma, bn_beta, bn_mean, bn_var))
    ref2 = _reference(x2, eca_w1, eca_w2, sg_w, bn_gamma, bn_beta, bn_mean, bn_var)
    assert out2.shape == x2.shape
    assert np.allclose(np.asarray(out2), np.asarray(ref2), rtol=1e-4, atol=2e-5)

    print("KERNEL_OK")
</pallas_src>

<mosaic_0001>
module attributes {stable_mosaic.version = 11 : i64} {
  func.func @_fused_kernel(%arg0: i32, %arg1: memref<1x8x256xf32, #tpu.memory_space<vmem>>, %arg2: memref<18xf32, #tpu.memory_space<smem>>, %arg3: memref<98xf32, #tpu.memory_space<smem>>, %arg4: memref<1xf32, #tpu.memory_space<smem>>, %arg5: memref<1x8x256xf32, #tpu.memory_space<vmem>>) attributes {dimension_semantics = [#tpu.dimension_semantics<parallel>], iteration_bounds = array<i64: 2>, scalar_prefetch = 0 : i64, scratch_operands = 0 : i64, tpu.core_type = #tpu.core_type<tc>, window_params = [{transform_indices = @transform_0, window_bounds = array<i64: 1, 8, 256>}, {transform_indices = @transform_1, window_bounds = array<i64: 18>}, {transform_indices = @transform_2, window_bounds = array<i64: 98>}, {transform_indices = @transform_3, window_bounds = array<i64: 1>}, {transform_indices = @transform_4, window_bounds = array<i64: 1, 8, 256>}]} {
    %c0 = arith.constant 0 : index
    %c0_0 = arith.constant 0 : index
    %c0_1 = arith.constant 0 : index
    %0 = vector.load %arg1[%c0, %c0_0, %c0_1] : memref<1x8x256xf32, #tpu.memory_space<vmem>>, vector<1x8x256xf32>
    %1 = vector.shape_cast %0 : vector<1x8x256xf32> to vector<8x256xf32>
    %cst = arith.constant dense<0.000000e+00> : vector<8xf32>
    %2 = vector.multi_reduction <add>, %1, %cst [1] : vector<8x256xf32> to vector<8xf32>
    %3 = vector.shape_cast %2 : vector<8xf32> to vector<8x1xf32>
    %cst_2 = arith.constant 3.906250e-03 : f32
    %4 = vector.broadcast %cst_2 : f32 to vector<8x1xf32>
    %5 = arith.mulf %3, %4 : vector<8x1xf32>
    %6 = tpu.iota {dimensions = array<i32: 0>} : vector<8x1xi32>
    %c4 = arith.constant 4 : index
    %7 = memref.load %arg2[%c4] : memref<18xf32, #tpu.memory_space<smem>>
    %8 = vector.broadcast %7 : f32 to vector<8x1xf32>
    %9 = arith.mulf %8, %5 : vector<8x1xf32>
    %c4_i32 = arith.constant 4 : i32
    %10 = tpu.dynamic_rotate %5 by %c4_i32 dim 0 : vector<8x1xf32>, i32 -> vector<8x1xf32>
    %c-4_i32 = arith.constant -4 : i32
    %11 = vector.broadcast %c-4_i32 : i32 to vector<8x1xi32>
    %12 = arith.addi %6, %11 : vector<8x1xi32>
    %c0_i32 = arith.constant 0 : i32
    %13 = vector.broadcast %c0_i32 : i32 to vector<8x1xi32>
    %14 = arith.cmpi sge, %12, %13 : vector<8x1xi32>
    %c-4_i32_3 = arith.constant -4 : i32
    %15 = vector.broadcast %c-4_i32_3 : i32 to vector<8x1xi32>
    %16 = arith.addi %6, %15 : vector<8x1xi32>
    %c8_i32 = arith.constant 8 : i32
    %17 = vector.broadcast %c8_i32 : i32 to vector<8x1xi32>
    %18 = arith.cmpi slt, %16, %17 : vector<8x1xi32>
    %19 = arith.andi %14, %18 : vector<8x1xi1>
    %c0_4 = arith.constant 0 : index
    %20 = memref.load %arg2[%c0_4] : memref<18xf32, #tpu.memory_space<smem>>
    %cst_5 = arith.constant 0.000000e+00 : f32
    %21 = vector.broadcast %cst_5 : f32 to vector<8x1xf32>
    %22 = arith.select %19, %10, %21 : vector<8x1xi1>, vector<8x1xf32>
    %23 = vector.broadcast %20 : f32 to vector<8x1xf32>
    %24 = arith.mulf %23, %22 : vector<8x1xf32>
    %25 = arith.addf %9, %24 : vector<8x1xf32>
    %c3_i32 = arith.constant 3 : i32
    %26 = tpu.dynamic_rotate %5 by %c3_i32 dim 0 : vector<8x1xf32>, i32 -> vector<8x1xf32>
    %c-3_i32 = arith.constant -3 : i32
    %27 = vector.broadcast %c-3_i32 : i32 to vector<8x1xi32>
    %28 = arith.addi %6, %27 : vector<8x1xi32>
    %c0_i32_6 = arith.constant 0 : i32
    %29 = vector.broadcast %c0_i32_6 : i32 to vector<8x1xi32>
    %30 = arith.cmpi sge, %28, %29 : vector<8x1xi32>
    %c-3_i32_7 = arith.constant -3 : i32
    %31 = vector.broadcast %c-3_i32_7 : i32 to vector<8x1xi32>
    %32 = arith.addi %6, %31 : vector<8x1xi32>
    %c8_i32_8 = arith.constant 8 : i32
    %33 = vector.broadcast %c8_i32_8 : i32 to vector<8x1xi32>
    %34 = arith.cmpi slt, %32, %33 : vector<8x1xi32>
    %35 = arith.andi %30, %34 : vector<8x1xi1>
    %c1 = arith.constant 1 : index
    %36 = memref.load %arg2[%c1] : memref<18xf32, #tpu.memory_space<smem>>
    %cst_9 = arith.constant 0.000000e+00 : f32
    %37 = vector.broadcast %cst_9 : f32 to vector<8x1xf32>
    %38 = arith.select %35, %26, %37 : vector<8x1xi1>, vector<8x1xf32>
    %39 = vector.broadcast %36 : f32 to vector<8x1xf32>
    %40 = arith.mulf %39, %38 : vector<8x1xf32>
    %41 = arith.addf %25, %40 : vector<8x1xf32>
    %c2_i32 = arith.constant 2 : i32
    %42 = tpu.dynamic_rotate %5 by %c2_i32 dim 0 : vector<8x1xf32>, i32 -> vector<8x1xf32>
    %c-2_i32 = arith.constant -2 : i32
    %43 = vector.broadcast %c-2_i32 : i32 to vector<8x1xi32>
    %44 = arith.addi %6, %43 : vector<8x1xi32>
    %c0_i32_10 = arith.constant 0 : i32
    %45 = vector.broadcast %c0_i32_10 : i32 to vector<8x1xi32>
    %46 = arith.cmpi sge, %44, %45 : vector<8x1xi32>
    %c-2_i32_11 = arith.constant -2 : i32
    %47 = vector.broadcast %c-2_i32_11 : i32 to vector<8x1xi32>
    %48 = arith.addi %6, %47 : vector<8x1xi32>
    %c8_i32_12 = arith.constant 8 : i32
    %49 = vector.broadcast %c8_i32_12 : i32 to vector<8x1xi32>
    %50 = arith.cmpi slt, %48, %49 : vector<8x1xi32>
    %51 = arith.andi %46, %50 : vector<8x1xi1>
    %c2 = arith.constant 2 : index
    %52 = memref.load %arg2[%c2] : memref<18xf32, #tpu.memory_space<smem>>
    %cst_13 = arith.constant 0.000000e+00 : f32
    %53 = vector.broadcast %cst_13 : f32 to vector<8x1xf32>
    %54 = arith.select %51, %42, %53 : vector<8x1xi1>, vector<8x1xf32>
    %55 = vector.broadcast %52 : f32 to vector<8x1xf32>
    %56 = arith.mulf %55, %54 : vector<8x1xf32>
    %57 = arith.addf %41, %56 : vector<8x1xf32>
    %c1_i32 = arith.constant 1 : i32
    %58 = tpu.dynamic_rotate %5 by %c1_i32 dim 0 : vector<8x1xf32>, i32 -> vector<8x1xf32>
    %c-1_i32 = arith.constant -1 : i32
    %59 = vector.broadcast %c-1_i32 : i32 to vector<8x1xi32>
    %60 = arith.addi %6, %59 : vector<8x1xi32>
    %c0_i32_14 = arith.constant 0 : i32
    %61 = vector.broadcast %c0_i32_14 : i32 to vector<8x1xi32>
    %62 = arith.cmpi sge, %60, %61 : vector<8x1xi32>
    %c-1_i32_15 = arith.constant -1 : i32
    %63 = vector.broadcast %c-1_i32_15 : i32 to vector<8x1xi32>
    %64 = arith.addi %6, %63 : vector<8x1xi32>
    %c8_i32_16 = arith.constant 8 : i32
    %65 = vector.broadcast %c8_i32_16 : i32 to vector<8x1xi32>
    %66 = arith.cmpi slt, %64, %65 : vector<8x1xi32>
    %67 = arith.andi %62, %66 : vector<8x1xi1>
    %c3 = arith.constant 3 : index
    %68 = memref.load %arg2[%c3] : memref<18xf32, #tpu.memory_space<smem>>
    %cst_17 = arith.constant 0.000000e+00 : f32
    %69 = vector.broadcast %cst_17 : f32 to vector<8x1xf32>
    %70 = arith.select %67, %58, %69 : vector<8x1xi1>, vector<8x1xf32>
    %71 = vector.broadcast %68 : f32 to vector<8x1xf32>
    %72 = arith.mulf %71, %70 : vector<8x1xf32>
    %73 = arith.addf %57, %72 : vector<8x1xf32>
    %c7_i32 = arith.constant 7 : i32
    %74 = tpu.dynamic_rotate %5 by %c7_i32 dim 0 : vector<8x1xf32>, i32 -> vector<8x1xf32>
    %c1_i32_18 = arith.constant 1 : i32
    %75 = vector.broadcast %c1_i32_18 : i32 to vector<8x1xi32>
    %76 = arith.addi %6, %75 : vector<8x1xi32>
    %c0_i32_19 = arith.constant 0 : i32
    %77 = vector.broadcast %c0_i32_19 : i32 to vector<8x1xi32>
    %78 = arith.cmpi sge, %76, %77 : vector<8x1xi32>
    %c1_i32_20 = arith.constant 1 : i32
    %79 = vector.broadcast %c1_i32_20 : i32 to vector<8x1xi32>
    %80 = arith.addi %6, %79 : vector<8x1xi32>
    %c8_i32_21 = arith.constant 8 : i32
    %81 = vector.broadcast %c8_i32_21 : i32 to vector<8x1xi32>
    %82 = arith.cmpi slt, %80, %81 : vector<8x1xi32>
    %83 = arith.andi %78, %82 : vector<8x1xi1>
    %c5 = arith.constant 5 : index
    %84 = memref.load %arg2[%c5] : memref<18xf32, #tpu.memory_space<smem>>
    %cst_22 = arith.constant 0.000000e+00 : f32
    %85 = vector.broadcast %cst_22 : f32 to vector<8x1xf32>
    %86 = arith.select %83, %74, %85 : vector<8x1xi1>, vector<8x1xf32>
    %87 = vector.broadcast %84 : f32 to vector<8x1xf32>
    %88 = arith.mulf %87, %86 : vector<8x1xf32>
    %89 = arith.addf %73, %88 : vector<8x1xf32>
    %c6_i32 = arith.constant 6 : i32
    %90 = tpu.dynamic_rotate %5 by %c6_i32 dim 0 : vector<8x1xf32>, i32 -> vector<8x1xf32>
    %c2_i32_23 = arith.constant 2 : i32
    %91 = vector.broadcast %c2_i32_23 : i32 to vector<8x1xi32>
    %92 = arith.addi %6, %91 : vector<8x1xi32>
    %c0_i32_24 = arith.constant 0 : i32
    %93 = vector.broadcast %c0_i32_24 : i32 to vector<8x1xi32>
    %94 = arith.cmpi sge, %92, %93 : vector<8x1xi32>
    %c2_i32_25 = arith.constant 2 : i32
    %95 = vector.broadcast %c2_i32_25 : i32 to vector<8x1xi32>
    %96 = arith.addi %6, %95 : vector<8x1xi32>
    %c8_i32_26 = arith.constant 8 : i32
    %97 = vector.broadcast %c8_i32_26 : i32 to vector<8x1xi32>
    %98 = arith.cmpi slt, %96, %97 : vector<8x1xi32>
    %99 = arith.andi %94, %98 : vector<8x1xi1>
    %c6 = arith.constant 6 : index
    %100 = memref.load %arg2[%c6] : memref<18xf32, #tpu.memory_space<smem>>
    %cst_27 = arith.constant 0.000000e+00 : f32
    %101 = vector.broadcast %cst_27 : f32 to vector<8x1xf32>
    %102 = arith.select %99, %90, %101 : vector<8x1xi1>, vector<8x1xf32>
    %103 = vector.broadcast %100 : f32 to vector<8x1xf32>
    %104 = arith.mulf %103, %102 : vector<8x1xf32>
    %105 = arith.addf %89, %104 : vector<8x1xf32>
    %c5_i32 = arith.constant 5 : i32
    %106 = tpu.dynamic_rotate %5 by %c5_i32 dim 0 : vector<8x1xf32>, i32 -> vector<8x1xf32>
    %c3_i32_28 = arith.constant 3 : i32
    %107 = vector.broadcast %c3_i32_28 : i32 to vector<8x1xi32>
    %108 = arith.addi %6, %107 : vector<8x1xi32>
    %c0_i32_29 = arith.constant 0 : i32
    %109 = vector.broadcast %c0_i32_29 : i32 to vector<8x1xi32>
    %110 = arith.cmpi sge, %108, %109 : vector<8x1xi32>
    %c3_i32_30 = arith.constant 3 : i32
    %111 = vector.broadcast %c3_i32_30 : i32 to vector<8x1xi32>
    %112 = arith.addi %6, %111 : vector<8x1xi32>
    %c8_i32_31 = arith.constant 8 : i32
    %113 = vector.broadcast %c8_i32_31 : i32 to vector<8x1xi32>
    %114 = arith.cmpi slt, %112, %113 : vector<8x1xi32>
    %115 = arith.andi %110, %114 : vector<8x1xi1>
    %c7 = arith.constant 7 : index
    %116 = memref.load %arg2[%c7] : memref<18xf32, #tpu.memory_space<smem>>
    %cst_32 = arith.constant 0.000000e+00 : f32
    %117 = vector.broadcast %cst_32 : f32 to vector<8x1xf32>
    %118 = arith.select %115, %106, %117 : vector<8x1xi1>, vector<8x1xf32>
    %119 = vector.broadcast %116 : f32 to vector<8x1xf32>
    %120 = arith.mulf %119, %118 : vector<8x1xf32>
    %121 = arith.addf %105, %120 : vector<8x1xf32>
    %c4_i32_33 = arith.constant 4 : i32
    %122 = tpu.dynamic_rotate %5 by %c4_i32_33 dim 0 : vector<8x1xf32>, i32 -> vector<8x1xf32>
    %c4_i32_34 = arith.constant 4 : i32
    %123 = vector.broadcast %c4_i32_34 : i32 to vector<8x1xi32>
    %124 = arith.addi %6, %123 : vector<8x1xi32>
    %c0_i32_35 = arith.constant 0 : i32
    %125 = vector.broadcast %c0_i32_35 : i32 to vector<8x1xi32>
    %126 = arith.cmpi sge, %124, %125 : vector<8x1xi32>
    %c4_i32_36 = arith.constant 4 : i32
    %127 = vector.broadcast %c4_i32_36 : i32 to vector<8x1xi32>
    %128 = arith.addi %6, %127 : vector<8x1xi32>
    %c8_i32_37 = arith.constant 8 : i32
    %129 = vector.broadcast %c8_i32_37 : i32 to vector<8x1xi32>
    %130 = arith.cmpi slt, %128, %129 : vector<8x1xi32>
    %131 = arith.andi %126, %130 : vector<8x1xi1>
    %c8 = arith.constant 8 : index
    %132 = memref.load %arg2[%c8] : memref<18xf32, #tpu.memory_space<smem>>
    %cst_38 = arith.constant 0.000000e+00 : f32
    %133 = vector.broadcast %cst_38 : f32 to vector<8x1xf32>
    %134 = arith.select %131, %122, %133 : vector<8x1xi1>, vector<8x1xf32>
    %135 = vector.broadcast %132 : f32 to vector<8x1xf32>
    %136 = arith.mulf %135, %134 : vector<8x1xf32>
    %137 = arith.addf %121, %136 : vector<8x1xf32>
    %138 = arith.negf %137 : vector<8x1xf32>
    %139 = math.exp %138 : vector<8x1xf32>
    %cst_39 = arith.constant 1.000000e+00 : f32
    %140 = vector.broadcast %cst_39 : f32 to vector<8x1xf32>
    %141 = arith.addf %140, %139 : vector<8x1xf32>
    %142 = arith.divf %140, %141 : vector<8x1xf32>
    %143 = arith.mulf %142, %5 : vector<8x1xf32>
    %c13 = arith.constant 13 : index
    %144 = memref.load %arg2[%c13] : memref<18xf32, #tpu.memory_space<smem>>
    %145 = vector.broadcast %144 : f32 to vector<8x1xf32>
    %146 = arith.mulf %145, %143 : vector<8x1xf32>
    %c4_i32_40 = arith.constant 4 : i32
    %147 = tpu.dynamic_rotate %143 by %c4_i32_40 dim 0 : vector<8x1xf32>, i32 -> vector<8x1xf32>
    %c-4_i32_41 = arith.constant -4 : i32
    %148 = vector.broadcast %c-4_i32_41 : i32 to vector<8x1xi32>
    %149 = arith.addi %6, %148 : vector<8x1xi32>
    %c0_i32_42 = arith.constant 0 : i32
    %150 = vector.broadcast %c0_i32_42 : i32 to vector<8x1xi32>
    %151 = arith.cmpi sge, %149, %150 : vector<8x1xi32>
    %c-4_i32_43 = arith.constant -4 : i32
    %152 = vector.broadcast %c-4_i32_43 : i32 to vector<8x1xi32>
    %153 = arith.addi %6, %152 : vector<8x1xi32>
    %c8_i32_44 = arith.constant 8 : i32
    %154 = vector.broadcast %c8_i32_44 : i32 to vector<8x1xi32>
    %155 = arith.cmpi slt, %153, %154 : vector<8x1xi32>
    %156 = arith.andi %151, %155 : vector<8x1xi1>
    %c9 = arith.constant 9 : index
    %157 = memref.load %arg2[%c9] : memref<18xf32, #tpu.memory_space<smem>>
    %cst_45 = arith.constant 0.000000e+00 : f32
    %158 = vector.broadcast %cst_45 : f32 to vector<8x1xf32>
    %159 = arith.select %156, %147, %158 : vector<8x1xi1>, vector<8x1xf32>
    %160 = vector.broadcast %157 : f32 to vector<8x1xf32>
    %161 = arith.mulf %160, %159 : vector<8x1xf32>
    %162 = arith.addf %146, %161 : vector<8x1xf32>
    %c3_i32_46 = arith.constant 3 : i32
    %163 = tpu.dynamic_rotate %143 by %c3_i32_46 dim 0 : vector<8x1xf32>, i32 -> vector<8x1xf32>
    %c-3_i32_47 = arith.constant -3 : i32
    %164 = vector.broadcast %c-3_i32_47 : i32 to vector<8x1xi32>
    %165 = arith.addi %6, %164 : vector<8x1xi32>
    %c0_i32_48 = arith.constant 0 : i32
    %166 = vector.broadcast %c0_i32_48 : i32 to vector<8x1xi32>
    %167 = arith.cmpi sge, %165, %166 : vector<8x1xi32>
    %c-3_i32_49 = arith.constant -3 : i32
    %168 = vector.broadcast %c-3_i32_49 : i32 to vector<8x1xi32>
    %169 = arith.addi %6, %168 : vector<8x1xi32>
    %c8_i32_50 = arith.constant 8 : i32
    %170 = vector.broadcast %c8_i32_50 : i32 to vector<8x1xi32>
    %171 = arith.cmpi slt, %169, %170 : vector<8x1xi32>
    %172 = arith.andi %167, %171 : vector<8x1xi1>
    %c10 = arith.constant 10 : index
    %173 = memref.load %arg2[%c10] : memref<18xf32, #tpu.memory_space<smem>>
    %cst_51 = arith.constant 0.000000e+00 : f32
    %174 = vector.broadcast %cst_51 : f32 to vector<8x1xf32>
    %175 = arith.select %172, %163, %174 : vector<8x1xi1>, vector<8x1xf32>
    %176 = vector.broadcast %173 : f32 to vector<8x1xf32>
    %177 = arith.mulf %176, %175 : vector<8x1xf32>
    %178 = arith.addf %162, %177 : vector<8x1xf32>
    %c2_i32_52 = arith.constant 2 : i32
    %179 = tpu.dynamic_rotate %143 by %c2_i32_52 dim 0 : vector<8x1xf32>, i32 -> vector<8x1xf32>
    %c-2_i32_53 = arith.constant -2 : i32
    %180 = vector.broadcast %c-2_i32_53 : i32 to vector<8x1xi32>
    %181 = arith.addi %6, %180 : vector<8x1xi32>
    %c0_i32_54 = arith.constant 0 : i32
    %182 = vector.broadcast %c0_i32_54 : i32 to vector<8x1xi32>
    %183 = arith.cmpi sge, %181, %182 : vector<8x1xi32>
    %c-2_i32_55 = arith.constant -2 : i32
    %184 = vector.broadcast %c-2_i32_55 : i32 to vector<8x1xi32>
    %185 = arith.addi %6, %184 : vector<8x1xi32>
    %c8_i32_56 = arith.constant 8 : i32
    %186 = vector.broadcast %c8_i32_56 : i32 to vector<8x1xi32>
    %187 = arith.cmpi slt, %185, %186 : vector<8x1xi32>
    %188 = arith.andi %183, %187 : vector<8x1xi1>
    %c11 = arith.constant 11 : index
    %189 = memref.load %arg2[%c11] : memref<18xf32, #tpu.memory_space<smem>>
    %cst_57 = arith.constant 0.000000e+00 : f32
    %190 = vector.broadcast %cst_57 : f32 to vector<8x1xf32>
    %191 = arith.select %188, %179, %190 : vector<8x1xi1>, vector<8x1xf32>
    %192 = vector.broadcast %189 : f32 to vector<8x1xf32>
    %193 = arith.mulf %192, %191 : vector<8x1xf32>
    %194 = arith.addf %178, %193 : vector<8x1xf32>
    %c1_i32_58 = arith.constant 1 : i32
    %195 = tpu.dynamic_rotate %143 by %c1_i32_58 dim 0 : vector<8x1xf32>, i32 -> vector<8x1xf32>
    %c-1_i32_59 = arith.constant -1 : i32
    %196 = vector.broadcast %c-1_i32_59 : i32 to vector<8x1xi32>
    %197 = arith.addi %6, %196 : vector<8x1xi32>
    %c0_i32_60 = arith.constant 0 : i32
    %198 = vector.broadcast %c0_i32_60 : i32 to vector<8x1xi32>
    %199 = arith.cmpi sge, %197, %198 : vector<8x1xi32>
    %c-1_i32_61 = arith.constant -1 : i32
    %200 = vector.broadcast %c-1_i32_61 : i32 to vector<8x1xi32>
    %201 = arith.addi %6, %200 : vector<8x1xi32>
    %c8_i32_62 = arith.constant 8 : i32
    %202 = vector.broadcast %c8_i32_62 : i32 to vector<8x1xi32>
    %203 = arith.cmpi slt, %201, %202 : vector<8x1xi32>
    %204 = arith.andi %199, %203 : vector<8x1xi1>
    %c12 = arith.constant 12 : index
    %205 = memref.load %arg2[%c12] : memref<18xf32, #tpu.memory_space<smem>>
    %cst_63 = arith.constant 0.000000e+00 : f32
    %206 = vector.broadcast %cst_63 : f32 to vector<8x1xf32>
    %207 = arith.select %204, %195, %206 : vector<8x1xi1>, vector<8x1xf32>
    %208 = vector.broadcast %205 : f32 to vector<8x1xf32>
    %209 = arith.mulf %208, %207 : vector<8x1xf32>
    %210 = arith.addf %194, %209 : vector<8x1xf32>
    %c7_i32_64 = arith.constant 7 : i32
    %211 = tpu.dynamic_rotate %143 by %c7_i32_64 dim 0 : vector<8x1xf32>, i32 -> vector<8x1xf32>
    %c1_i32_65 = arith.constant 1 : i32
    %212 = vector.broadcast %c1_i32_65 : i32 to vector<8x1xi32>
    %213 = arith.addi %6, %212 : vector<8x1xi32>
    %c0_i32_66 = arith.constant 0 : i32
    %214 = vector.broadcast %c0_i32_66 : i32 to vector<8x1xi32>
    %215 = arith.cmpi sge, %213, %214 : vector<8x1xi32>
    %c1_i32_67 = arith.constant 1 : i32
    %216 = vector.broadcast %c1_i32_67 : i32 to vector<8x1xi32>
    %217 = arith.addi %6, %216 : vector<8x1xi32>
    %c8_i32_68 = arith.constant 8 : i32
    %218 = vector.broadcast %c8_i32_68 : i32 to vector<8x1xi32>
    %219 = arith.cmpi slt, %217, %218 : vector<8x1xi32>
    %220 = arith.andi %215, %219 : vector<8x1xi1>
    %c14 = arith.constant 14 : index
    %221 = memref.load %arg2[%c14] : memref<18xf32, #tpu.memory_space<smem>>
    %cst_69 = arith.constant 0.000000e+00 : f32
    %222 = vector.broadcast %cst_69 : f32 to vector<8x1xf32>
    %223 = arith.select %220, %211, %222 : vector<8x1xi1>, vector<8x1xf32>
    %224 = vector.broadcast %221 : f32 to vector<8x1xf32>
    %225 = arith.mulf %224, %223 : vector<8x1xf32>
    %226 = arith.addf %210, %225 : vector<8x1xf32>
    %c6_i32_70 = arith.constant 6 : i32
    %227 = tpu.dynamic_rotate %143 by %c6_i32_70 dim 0 : vector<8x1xf32>, i32 -> vector<8x1xf32>
    %c2_i32_71 = arith.constant 2 : i32
    %228 = vector.broadcast %c2_i32_71 : i32 to vector<8x1xi32>
    %229 = arith.addi %6, %228 : vector<8x1xi32>
    %c0_i32_72 = arith.constant 0 : i32
    %230 = vector.broadcast %c0_i32_72 : i32 to vector<8x1xi32>
    %231 = arith.cmpi sge, %229, %230 : vector<8x1xi32>
    %c2_i32_73 = arith.constant 2 : i32
    %232 = vector.broadcast %c2_i32_73 : i32 to vector<8x1xi32>
    %233 = arith.addi %6, %232 : vector<8x1xi32>
    %c8_i32_74 = arith.constant 8 : i32
    %234 = vector.broadcast %c8_i32_74 : i32 to vector<8x1xi32>
    %235 = arith.cmpi slt, %233, %234 : vector<8x1xi32>
    %236 = arith.andi %231, %235 : vector<8x1xi1>
    %c15 = arith.constant 15 : index
    %237 = memref.load %arg2[%c15] : memref<18xf32, #tpu.memory_space<smem>>
    %cst_75 = arith.constant 0.000000e+00 : f32
    %238 = vector.broadcast %cst_75 : f32 to vector<8x1xf32>
    %239 = arith.select %236, %227, %238 : vector<8x1xi1>, vector<8x1xf32>
    %240 = vector.broadcast %237 : f32 to vector<8x1xf32>
    %241 = arith.mulf %240, %239 : vector<8x1xf32>
    %242 = arith.addf %226, %241 : vector<8x1xf32>
    %c5_i32_76 = arith.constant 5 : i32
    %243 = tpu.dynamic_rotate %143 by %c5_i32_76 dim 0 : vector<8x1xf32>, i32 -> vector<8x1xf32>
    %c3_i32_77 = arith.constant 3 : i32
    %244 = vector.broadcast %c3_i32_77 : i32 to vector<8x1xi32>
    %245 = arith.addi %6, %244 : vector<8x1xi32>
    %c0_i32_78 = arith.constant 0 : i32
    %246 = vector.broadcast %c0_i32_78 : i32 to vector<8x1xi32>
    %247 = arith.cmpi sge, %245, %246 : vector<8x1xi32>
    %c3_i32_79 = arith.constant 3 : i32
    %248 = vector.broadcast %c3_i32_79 : i32 to vector<8x1xi32>
    %249 = arith.addi %6, %248 : vector<8x1xi32>
    %c8_i32_80 = arith.constant 8 : i32
    %250 = vector.broadcast %c8_i32_80 : i32 to vector<8x1xi32>
    %251 = arith.cmpi slt, %249, %250 : vector<8x1xi32>
    %252 = arith.andi %247, %251 : vector<8x1xi1>
    %c16 = arith.constant 16 : index
    %253 = memref.load %arg2[%c16] : memref<18xf32, #tpu.memory_space<smem>>
    %cst_81 = arith.constant 0.000000e+00 : f32
    %254 = vector.broadcast %cst_81 : f32 to vector<8x1xf32>
    %255 = arith.select %252, %243, %254 : vector<8x1xi1>, vector<8x1xf32>
    %256 = vector.broadcast %253 : f32 to vector<8x1xf32>
    %257 = arith.mulf %256, %255 : vector<8x1xf32>
    %258 = arith.addf %242, %257 : vector<8x1xf32>
    %c4_i32_82 = arith.constant 4 : i32
    %259 = tpu.dynamic_rotate %143 by %c4_i32_82 dim 0 : vector<8x1xf32>, i32 -> vector<8x1xf32>
    %c4_i32_83 = arith.constant 4 : i32
    %260 = vector.broadcast %c4_i32_83 : i32 to vector<8x1xi32>
    %261 = arith.addi %6, %260 : vector<8x1xi32>
    %c0_i32_84 = arith.constant 0 : i32
    %262 = vector.broadcast %c0_i32_84 : i32 to vector<8x1xi32>
    %263 = arith.cmpi sge, %261, %262 : vector<8x1xi32>
    %c4_i32_85 = arith.constant 4 : i32
    %264 = vector.broadcast %c4_i32_85 : i32 to vector<8x1xi32>
    %265 = arith.addi %6, %264 : vector<8x1xi32>
    %c8_i32_86 = arith.constant 8 : i32
    %266 = vector.broadcast %c8_i32_86 : i32 to vector<8x1xi32>
    %267 = arith.cmpi slt, %265, %266 : vector<8x1xi32>
    %268 = arith.andi %263, %267 : vector<8x1xi1>
    %c17 = arith.constant 17 : index
    %269 = memref.load %arg2[%c17] : memref<18xf32, #tpu.memory_space<smem>>
    %cst_87 = arith.constant 0.000000e+00 : f32
    %270 = vector.broadcast %cst_87 : f32 to vector<8x1xf32>
    %271 = arith.select %268, %259, %270 : vector<8x1xi1>, vector<8x1xf32>
    %272 = vector.broadcast %269 : f32 to vector<8x1xf32>
    %273 = arith.mulf %272, %271 : vector<8x1xf32>
    %274 = arith.addf %258, %273 : vector<8x1xf32>
    %275 = arith.negf %274 : vector<8x1xf32>
    %276 = math.exp %275 : vector<8x1xf32>
    %cst_88 = arith.constant 1.000000e+00 : f32
    %277 = vector.broadcast %cst_88 : f32 to vector<8x1xf32>
    %278 = arith.addf %277, %276 : vector<8x1xf32>
    %279 = arith.divf %277, %278 : vector<8x1xf32>
    %280 = arith.mulf %142, %279 : vector<8x1xf32>
    %281 = vector.broadcast %280 : vector<8x1xf32> to vector<8x256xf32>
    %282 = arith.mulf %1, %281 : vector<8x256xf32>
    %c0_89 = arith.constant 0 : index
    %c0_90 = arith.constant 0 : index
    %c0_91 = arith.constant 0 : index
    %283 = vector.load %arg5[%c0_89, %c0_90, %c0_91] : memref<1x8x256xf32, #tpu.memory_space<vmem>>, vector<1x8x256xf32>
    %284 = vector.shape_cast %283 : vector<1x8x256xf32> to vector<8x256xf32>
    %285 = vector.shape_cast %282 : vector<8x256xf32> to vector<1x8x256xf32>
    tpu.vector_store %arg5[%c0_89, %c0_90, %c0_91], %285 {strides = array<i32>} : memref<1x8x256xf32, #tpu.memory_space<vmem>>, vector<1x8x256xf32>,
    %c0_92 = arith.constant 0 : index
    %c0_93 = arith.constant 0 : index
    %c0_94 = arith.constant 0 : index
    %286 = vector.load %arg5[%c0_92, %c0_93, %c0_94] : memref<1x8x256xf32, #tpu.memory_space<vmem>>, vector<1x8x256xf32>
    %287 = vector.shape_cast %286 : vector<1x8x256xf32> to vector<8x256xf32>
    %cst_95 = arith.constant dense<0xFF800000> : vector<256xf32>
    %288 = vector.multi_reduction <maximumf>, %287, %cst_95 [0] : vector<8x256xf32> to vector<256xf32>
    %289 = vector.shape_cast %288 : vector<256xf32> to vector<1x256xf32>
    %cst_96 = arith.constant dense<0.000000e+00> : vector<256xf32>
    %290 = vector.multi_reduction <add>, %287, %cst_96 [0] : vector<8x256xf32> to vector<256xf32>
    %291 = vector.shape_cast %290 : vector<256xf32> to vector<1x256xf32>
    %cst_97 = arith.constant 1.250000e-01 : f32
    %292 = vector.broadcast %cst_97 : f32 to vector<1x256xf32>
    %293 = arith.mulf %291, %292 : vector<1x256xf32>
    %294 = tpu.iota {dimensions = array<i32: 0>} : vector<2x1xi32>
    %c0_i32_98 = arith.constant 0 : i32
    %295 = vector.broadcast %c0_i32_98 : i32 to vector<2x1xi32>
    %296 = arith.cmpi eq, %294, %295 : vector<2x1xi32>
    %297 = arith.extui %296 : vector<2x1xi1> to vector<2x1xi32>
    %298 = arith.sitofp %297 : vector<2x1xi32> to vector<2x1xf32>
    %cst_99 = arith.constant 1.000000e+00 : f32
    %299 = vector.broadcast %cst_99 : f32 to vector<2x1xf32>
    %300 = arith.subf %299, %298 : vector<2x1xf32>
    %301 = vector.broadcast %289 : vector<1x256xf32> to vector<2x256xf32>
    %302 = vector.broadcast %298 : vector<2x1xf32> to vector<2x256xf32>
    %303 = arith.mulf %301, %302 : vector<2x256xf32>
    %304 = vector.broadcast %293 : vector<1x256xf32> to vector<2x256xf32>
    %305 = vector.broadcast %300 : vector<2x1xf32> to vector<2x256xf32>
    %306 = arith.mulf %304, %305 : vector<2x256xf32>
    %307 = arith.addf %303, %306 : vector<2x256xf32>
    %308 = tpu.iota {dimensions = array<i32: 1>} : vector<1x256xi32>
    %309 = arith.sitofp %308 : vector<1x256xi32> to vector<1x256xf32>
    %cst_100 = arith.constant 5.000000e-01 : f32
    %310 = vector.broadcast %cst_100 : f32 to vector<1x256xf32>
    %311 = arith.addf %309, %310 : vector<1x256xf32>
    %cst_101 = arith.constant 6.250000e-02 : f32
    %312 = vector.broadcast %cst_101 : f32 to vector<1x256xf32>
    %313 = arith.mulf %311, %312 : vector<1x256xf32>
    %314 = math.floor %313 : vector<1x256xf32>
    %cst_102 = arith.constant 1.600000e+01 : f32
    %315 = vector.broadcast %cst_102 : f32 to vector<1x256xf32>
    %316 = arith.mulf %314, %315 : vector<1x256xf32>
    %317 = arith.subf %309, %316 : vector<1x256xf32>
    %cst_103 = arith.constant -3.000000e+00 : f32
    %318 = vector.broadcast %cst_103 : f32 to vector<1x256xf32>
    %319 = arith.addf %317, %318 : vector<1x256xf32>
    %cst_104 = arith.constant 0.000000e+00 : f32
    %320 = vector.broadcast %cst_104 : f32 to vector<1x256xf32>
    %321 = arith.cmpf oge, %319, %320 : vector<1x256xf32>
    %cst_105 = arith.constant -3.000000e+00 : f32
    %322 = vector.broadcast %cst_105 : f32 to vector<1x256xf32>
    %323 = arith.addf %317, %322 : vector<1x256xf32>
    %cst_106 = arith.constant 1.500000e+01 : f32
    %324 = vector.broadcast %cst_106 : f32 to vector<1x256xf32>
    %325 = arith.cmpf ole, %323, %324 : vector<1x256xf32>
    %326 = arith.andi %321, %325 : vector<1x256xi1>
    %cst_107 = arith.constant -2.000000e+00 : f32
    %327 = vector.broadcast %cst_107 : f32 to vector<1x256xf32>
    %328 = arith.addf %317, %327 : vector<1x256xf32>
    %cst_108 = arith.constant 0.000000e+00 : f32
    %329 = vector.broadcast %cst_108 : f32 to vector<1x256xf32>
    %330 = arith.cmpf oge, %328, %329 : vector<1x256xf32>
    %cst_109 = arith.constant -2.000000e+00 : f32
    %331 = vector.broadcast %cst_109 : f32 to vector<1x256xf32>
    %332 = arith.addf %317, %331 : vector<1x256xf32>
    %cst_110 = arith.constant 1.500000e+01 : f32
    %333 = vector.broadcast %cst_110 : f32 to vector<1x256xf32>
    %334 = arith.cmpf ole, %332, %333 : vector<1x256xf32>
    %335 = arith.andi %330, %334 : vector<1x256xi1>
    %cst_111 = arith.constant -1.000000e+00 : f32
    %336 = vector.broadcast %cst_111 : f32 to vector<1x256xf32>
    %337 = arith.addf %317, %336 : vector<1x256xf32>
    %cst_112 = arith.constant 0.000000e+00 : f32
    %338 = vector.broadcast %cst_112 : f32 to vector<1x256xf32>
    %339 = arith.cmpf oge, %337, %338 : vector<1x256xf32>
    %cst_113 = arith.constant -1.000000e+00 : f32
    %340 = vector.broadcast %cst_113 : f32 to vector<1x256xf32>
    %341 = arith.addf %317, %340 : vector<1x256xf32>
    %cst_114 = arith.constant 1.500000e+01 : f32
    %342 = vector.broadcast %cst_114 : f32 to vector<1x256xf32>
    %343 = arith.cmpf ole, %341, %342 : vector<1x256xf32>
    %344 = arith.andi %339, %343 : vector<1x256xi1>
    %cst_115 = arith.constant 0.000000e+00 : f32
    %345 = vector.broadcast %cst_115 : f32 to vector<1x256xf32>
    %346 = arith.addf %317, %345 : vector<1x256xf32>
    %cst_116 = arith.constant 0.000000e+00 : f32
    %347 = vector.broadcast %cst_116 : f32 to vector<1x256xf32>
    %348 = arith.cmpf oge, %346, %347 : vector<1x256xf32>
    %cst_117 = arith.constant 0.000000e+00 : f32
    %349 = vector.broadcast %cst_117 : f32 to vector<1x256xf32>
    %350 = arith.addf %317, %349 : vector<1x256xf32>
    %cst_118 = arith.constant 1.500000e+01 : f32
    %351 = vector.broadcast %cst_118 : f32 to vector<1x256xf32>
    %352 = arith.cmpf ole, %350, %351 : vector<1x256xf32>
    %353 = arith.andi %348, %352 : vector<1x256xi1>
    %cst_119 = arith.constant 1.000000e+00 : f32
    %354 = vector.broadcast %cst_119 : f32 to vector<1x256xf32>
    %355 = arith.addf %317, %354 : vector<1x256xf32>
    %cst_120 = arith.constant 0.000000e+00 : f32
    %356 = vector.broadcast %cst_120 : f32 to vector<1x256xf32>
    %357 = arith.cmpf oge, %355, %356 : vector<1x256xf32>
    %cst_121 = arith.constant 1.000000e+00 : f32
    %358 = vector.broadcast %cst_121 : f32 to vector<1x256xf32>
    %359 = arith.addf %317, %358 : vector<1x256xf32>
    %cst_122 = arith.constant 1.500000e+01 : f32
    %360 = vector.broadcast %cst_122 : f32 to vector<1x256xf32>
    %361 = arith.cmpf ole, %359, %360 : vector<1x256xf32>
    %362 = arith.andi %357, %361 : vector<1x256xi1>
    %cst_123 = arith.constant 2.000000e+00 : f32
    %363 = vector.broadcast %cst_123 : f32 to vector<1x256xf32>
    %364 = arith.addf %317, %363 : vector<1x256xf32>
    %cst_124 = arith.constant 0.000000e+00 : f32
    %365 = vector.broadcast %cst_124 : f32 to vector<1x256xf32>
    %366 = arith.cmpf oge, %364, %365 : vector<1x256xf32>
    %cst_125 = arith.constant 2.000000e+00 : f32
    %367 = vector.broadcast %cst_125 : f32 to vector<1x256xf32>
    %368 = arith.addf %317, %367 : vector<1x256xf32>
    %cst_126 = arith.constant 1.500000e+01 : f32
    %369 = vector.broadcast %cst_126 : f32 to vector<1x256xf32>
    %370 = arith.cmpf ole, %368, %369 : vector<1x256xf32>
    %371 = arith.andi %366, %370 : vector<1x256xi1>
    %cst_127 = arith.constant 3.000000e+00 : f32
    %372 = vector.broadcast %cst_127 : f32 to vector<1x256xf32>
    %373 = arith.addf %317, %372 : vector<1x256xf32>
    %cst_128 = arith.constant 0.000000e+00 : f32
    %374 = vector.broadcast %cst_128 : f32 to vector<1x256xf32>
    %375 = arith.cmpf oge, %373, %374 : vector<1x256xf32>
    %cst_129 = arith.constant 3.000000e+00 : f32
    %376 = vector.broadcast %cst_129 : f32 to vector<1x256xf32>
    %377 = arith.addf %317, %376 : vector<1x256xf32>
    %cst_130 = arith.constant 1.500000e+01 : f32
    %378 = vector.broadcast %cst_130 : f32 to vector<1x256xf32>
    %379 = arith.cmpf ole, %377, %378 : vector<1x256xf32>
    %380 = arith.andi %375, %379 : vector<1x256xi1>
    %cst_131 = arith.constant 0.000000e+00 : f32
    %381 = vector.broadcast %cst_131 : f32 to vector<2x256xf32>
    %cst_132 = arith.constant 0.000000e+00 : f32
    %382 = vector.broadcast %cst_132 : f32 to vector<2x256xf32>
    %cst_133 = arith.constant 0.000000e+00 : f32
    %383 = vector.broadcast %cst_133 : f32 to vector<2x256xf32>
    %cst_134 = arith.constant 0.000000e+00 : f32
    %384 = vector.broadcast %cst_134 : f32 to vector<2x256xf32>
    %cst_135 = arith.constant -3.000000e+00 : f32
    %385 = vector.broadcast %cst_135 : f32 to vector<1x256xf32>
    %386 = arith.addf %314, %385 : vector<1x256xf32>
    %cst_136 = arith.constant 0.000000e+00 : f32
    %387 = vector.broadcast %cst_136 : f32 to vector<1x256xf32>
    %388 = arith.cmpf oge, %386, %387 : vector<1x256xf32>
    %cst_137 = arith.constant -3.000000e+00 : f32
    %389 = vector.broadcast %cst_137 : f32 to vector<1x256xf32>
    %390 = arith.addf %314, %389 : vector<1x256xf32>
    %cst_138 = arith.constant 1.500000e+01 : f32
    %391 = vector.broadcast %cst_138 : f32 to vector<1x256xf32>
    %392 = arith.cmpf ole, %390, %391 : vector<1x256xf32>
    %393 = arith.andi %388, %392 : vector<1x256xi1>
    %c51_i32 = arith.constant 51 : i32
    %394 = tpu.dynamic_rotate %307 by %c51_i32 dim 1 : vector<2x256xf32>, i32 -> vector<2x256xf32>
    %c0_139 = arith.constant 0 : index
    %395 = memref.load %arg3[%c0_139] : memref<98xf32, #tpu.memory_space<smem>>
    %396 = vector.broadcast %395 : f32 to vector<2x1xf32>
    %397 = arith.mulf %396, %298 : vector<2x1xf32>
    %c49 = arith.constant 49 : index
    %398 = memref.load %arg3[%c49] : memref<98xf32, #tpu.memory_space<smem>>
    %399 = vector.broadcast %398 : f32 to vector<2x1xf32>
    %400 = arith.mulf %399, %300 : vector<2x1xf32>
    %401 = arith.addf %397, %400 : vector<2x1xf32>
    %402 = arith.andi %393, %326 : vector<1x256xi1>
    %403 = vector.broadcast %401 : vector<2x1xf32> to vector<2x256xf32>
    %404 = arith.mulf %403, %394 : vector<2x256xf32>
    %cst_140 = arith.constant 0.000000e+00 : f32
    %405 = vector.shape_cast %402 : vector<1x256xi1> to vector<1x256xi1>
    %406 = vector.broadcast %405 : vector<1x256xi1> to vector<2x256xi1>
    %407 = vector.broadcast %cst_140 : f32 to vector<2x256xf32>
    %408 = arith.select %406, %404, %407 : vector<2x256xi1>, vector<2x256xf32>
    %409 = arith.addf %381, %408 : vector<2x256xf32>
    %c50_i32 = arith.constant 50 : i32
    %410 = tpu.dynamic_rotate %307 by %c50_i32 dim 1 : vector<2x256xf32>, i32 -> vector<2x256xf32>
    %c1_141 = arith.constant 1 : index
    %411 = memref.load %arg3[%c1_141] : memref<98xf32, #tpu.memory_space<smem>>
    %412 = vector.broadcast %411 : f32 to vector<2x1xf32>
    %413 = arith.mulf %412, %298 : vector<2x1xf32>
    %c50 = arith.constant 50 : index
    %414 = memref.load %arg3[%c50] : memref<98xf32, #tpu.memory_space<smem>>
    %415 = vector.broadcast %414 : f32 to vector<2x1xf32>
    %416 = arith.mulf %415, %300 : vector<2x1xf32>
    %417 = arith.addf %413, %416 : vector<2x1xf32>
    %418 = arith.andi %393, %335 : vector<1x256xi1>
    %419 = vector.broadcast %417 : vector<2x1xf32> to vector<2x256xf32>
    %420 = arith.mulf %419, %410 : vector<2x256xf32>
    %cst_142 = arith.constant 0.000000e+00 : f32
    %421 = vector.shape_cast %418 : vector<1x256xi1> to vector<1x256xi1>
    %422 = vector.broadcast %421 : vector<1x256xi1> to vector<2x256xi1>
    %423 = vector.broadcast %cst_142 : f32 to vector<2x256xf32>
    %424 = arith.select %422, %420, %423 : vector<2x256xi1>, vector<2x256xf32>
    %425 = arith.addf %382, %424 : vector<2x256xf32>
    %c49_i32 = arith.constant 49 : i32
    %426 = tpu.dynamic_rotate %307 by %c49_i32 dim 1 : vector<2x256xf32>, i32 -> vector<2x256xf32>
    %c2_143 = arith.constant 2 : index
    %427 = memref.load %arg3[%c2_143] : memref<98xf32, #tpu.memory_space<smem>>
    %428 = vector.broadcast %427 : f32 to vector<2x1xf32>
    %429 = arith.mulf %428, %298 : vector<2x1xf32>
    %c51 = arith.constant 51 : index
    %430 = memref.load %arg3[%c51] : memref<98xf32, #tpu.memory_space<smem>>
    %431 = vector.broadcast %430 : f32 to vector<2x1xf32>
    %432 = arith.mulf %431, %300 : vector<2x1xf32>
    %433 = arith.addf %429, %432 : vector<2x1xf32>
    %434 = arith.andi %393, %344 : vector<1x256xi1>
    %435 = vector.broadcast %433 : vector<2x1xf32> to vector<2x256xf32>
    %436 = arith.mulf %435, %426 : vector<2x256xf32>
    %cst_144 = arith.constant 0.000000e+00 : f32
    %437 = vector.shape_cast %434 : vector<1x256xi1> to vector<1x256xi1>
    %438 = vector.broadcast %437 : vector<1x256xi1> to vector<2x256xi1>
    %439 = vector.broadcast %cst_144 : f32 to vector<2x256xf32>
    %440 = arith.select %438, %436, %439 : vector<2x256xi1>, vector<2x256xf32>
    %441 = arith.addf %383, %440 : vector<2x256xf32>
    %c48_i32 = arith.constant 48 : i32
    %442 = tpu.dynamic_rotate %307 by %c48_i32 dim 1 : vector<2x256xf32>, i32 -> vector<2x256xf32>
    %c3_145 = arith.constant 3 : index
    %443 = memref.load %arg3[%c3_145] : memref<98xf32, #tpu.memory_space<smem>>
    %444 = vector.broadcast %443 : f32 to vector<2x1xf32>
    %445 = arith.mulf %444, %298 : vector<2x1xf32>
    %c52 = arith.constant 52 : index
    %446 = memref.load %arg3[%c52] : memref<98xf32, #tpu.memory_space<smem>>
    %447 = vector.broadcast %446 : f32 to vector<2x1xf32>
    %448 = arith.mulf %447, %300 : vector<2x1xf32>
    %449 = arith.addf %445, %448 : vector<2x1xf32>
    %450 = arith.andi %393, %353 : vector<1x256xi1>
    %451 = vector.broadcast %449 : vector<2x1xf32> to vector<2x256xf32>
    %452 = arith.mulf %451, %442 : vector<2x256xf32>
    %cst_146 = arith.constant 0.000000e+00 : f32
    %453 = vector.shape_cast %450 : vector<1x256xi1> to vector<1x256xi1>
    %454 = vector.broadcast %453 : vector<1x256xi1> to vector<2x256xi1>
    %455 = vector.broadcast %cst_146 : f32 to vector<2x256xf32>
    %456 = arith.select %454, %452, %455 : vector<2x256xi1>, vector<2x256xf32>
    %457 = arith.addf %384, %456 : vector<2x256xf32>
    %c47_i32 = arith.constant 47 : i32
    %458 = tpu.dynamic_rotate %307 by %c47_i32 dim 1 : vector<2x256xf32>, i32 -> vector<2x256xf32>
    %c4_147 = arith.constant 4 : index
    %459 = memref.load %arg3[%c4_147] : memref<98xf32, #tpu.memory_space<smem>>
    %460 = vector.broadcast %459 : f32 to vector<2x1xf32>
    %461 = arith.mulf %460, %298 : vector<2x1xf32>
    %c53 = arith.constant 53 : index
    %462 = memref.load %arg3[%c53] : memref<98xf32, #tpu.memory_space<smem>>
    %463 = vector.broadcast %462 : f32 to vector<2x1xf32>
    %464 = arith.mulf %463, %300 : vector<2x1xf32>
    %465 = arith.addf %461, %464 : vector<2x1xf32>
    %466 = arith.andi %393, %362 : vector<1x256xi1>
    %467 = vector.broadcast %465 : vector<2x1xf32> to vector<2x256xf32>
    %468 = arith.mulf %467, %458 : vector<2x256xf32>
    %cst_148 = arith.constant 0.000000e+00 : f32
    %469 = vector.shape_cast %466 : vector<1x256xi1> to vector<1x256xi1>
    %470 = vector.broadcast %469 : vector<1x256xi1> to vector<2x256xi1>
    %471 = vector.broadcast %cst_148 : f32 to vector<2x256xf32>
    %472 = arith.select %470, %468, %471 : vector<2x256xi1>, vector<2x256xf32>
    %473 = arith.addf %409, %472 : vector<2x256xf32>
    %c46_i32 = arith.constant 46 : i32
    %474 = tpu.dynamic_rotate %307 by %c46_i32 dim 1 : vector<2x256xf32>, i32 -> vector<2x256xf32>
    %c5_149 = arith.constant 5 : index
    %475 = memref.load %arg3[%c5_149] : memref<98xf32, #tpu.memory_space<smem>>
    %476 = vector.broadcast %475 : f32 to vector<2x1xf32>
    %477 = arith.mulf %476, %298 : vector<2x1xf32>
    %c54 = arith.constant 54 : index
    %478 = memref.load %arg3[%c54] : memref<98xf32, #tpu.memory_space<smem>>
    %479 = vector.broadcast %478 : f32 to vector<2x1xf32>
    %480 = arith.mulf %479, %300 : vector<2x1xf32>
    %481 = arith.addf %477, %480 : vector<2x1xf32>
    %482 = arith.andi %393, %371 : vector<1x256xi1>
    %483 = vector.broadcast %481 : vector<2x1xf32> to vector<2x256xf32>
    %484 = arith.mulf %483, %474 : vector<2x256xf32>
    %cst_150 = arith.constant 0.000000e+00 : f32
    %485 = vector.shape_cast %482 : vector<1x256xi1> to vector<1x256xi1>
    %486 = vector.broadcast %485 : vector<1x256xi1> to vector<2x256xi1>
    %487 = vector.broadcast %cst_150 : f32 to vector<2x256xf32>
    %488 = arith.select %486, %484, %487 : vector<2x256xi1>, vector<2x256xf32>
    %489 = arith.addf %425, %488 : vector<2x256xf32>
    %c45_i32 = arith.constant 45 : i32
    %490 = tpu.dynamic_rotate %307 by %c45_i32 dim 1 : vector<2x256xf32>, i32 -> vector<2x256xf32>
    %c6_151 = arith.constant 6 : index
    %491 = memref.load %arg3[%c6_151] : memref<98xf32, #tpu.memory_space<smem>>
    %492 = vector.broadcast %491 : f32 to vector<2x1xf32>
    %493 = arith.mulf %492, %298 : vector<2x1xf32>
    %c55 = arith.constant 55 : index
    %494 = memref.load %arg3[%c55] : memref<98xf32, #tpu.memory_space<smem>>
    %495 = vector.broadcast %494 : f32 to vector<2x1xf32>
    %496 = arith.mulf %495, %300 : vector<2x1xf32>
    %497 = arith.addf %493, %496 : vector<2x1xf32>
    %498 = arith.andi %393, %380 : vector<1x256xi1>
    %499 = vector.broadcast %497 : vector<2x1xf32> to vector<2x256xf32>
    %500 = arith.mulf %499, %490 : vector<2x256xf32>
    %cst_152 = arith.constant 0.000000e+00 : f32
    %501 = vector.shape_cast %498 : vector<1x256xi1> to vector<1x256xi1>
    %502 = vector.broadcast %501 : vector<1x256xi1> to vector<2x256xi1>
    %503 = vector.broadcast %cst_152 : f32 to vector<2x256xf32>
    %504 = arith.select %502, %500, %503 : vector<2x256xi1>, vector<2x256xf32>
    %505 = arith.addf %441, %504 : vector<2x256xf32>
    %cst_153 = arith.constant -2.000000e+00 : f32
    %506 = vector.broadcast %cst_153 : f32 to vector<1x256xf32>
    %507 = arith.addf %314, %506 : vector<1x256xf32>
    %cst_154 = arith.constant 0.000000e+00 : f32
    %508 = vector.broadcast %cst_154 : f32 to vector<1x256xf32>
    %509 = arith.cmpf oge, %507, %508 : vector<1x256xf32>
    %cst_155 = arith.constant -2.000000e+00 : f32
    %510 = vector.broadcast %cst_155 : f32 to vector<1x256xf32>
    %511 = arith.addf %314, %510 : vector<1x256xf32>
    %cst_156 = arith.constant 1.500000e+01 : f32
    %512 = vector.broadcast %cst_156 : f32 to vector<1x256xf32>
    %513 = arith.cmpf ole, %511, %512 : vector<1x256xf32>
    %514 = arith.andi %509, %513 : vector<1x256xi1>
    %c35_i32 = arith.constant 35 : i32
    %515 = tpu.dynamic_rotate %307 by %c35_i32 dim 1 : vector<2x256xf32>, i32 -> vector<2x256xf32>
    %c7_157 = arith.constant 7 : index
    %516 = memref.load %arg3[%c7_157] : memref<98xf32, #tpu.memory_space<smem>>
    %517 = vector.broadcast %516 : f32 to vector<2x1xf32>
    %518 = arith.mulf %517, %298 : vector<2x1xf32>
    %c56 = arith.constant 56 : index
    %519 = memref.load %arg3[%c56] : memref<98xf32, #tpu.memory_space<smem>>
    %520 = vector.broadcast %519 : f32 to vector<2x1xf32>
    %521 = arith.mulf %520, %300 : vector<2x1xf32>
    %522 = arith.addf %518, %521 : vector<2x1xf32>
    %523 = arith.andi %514, %326 : vector<1x256xi1>
    %524 = vector.broadcast %522 : vector<2x1xf32> to vector<2x256xf32>
    %525 = arith.mulf %524, %515 : vector<2x256xf32>
    %cst_158 = arith.constant 0.000000e+00 : f32
    %526 = vector.shape_cast %523 : vector<1x256xi1> to vector<1x256xi1>
    %527 = vector.broadcast %526 : vector<1x256xi1> to vector<2x256xi1>
    %528 = vector.broadcast %cst_158 : f32 to vector<2x256xf32>
    %529 = arith.select %527, %525, %528 : vector<2x256xi1>, vector<2x256xf32>
    %530 = arith.addf %457, %529 : vector<2x256xf32>
    %c34_i32 = arith.constant 34 : i32
    %531 = tpu.dynamic_rotate %307 by %c34_i32 dim 1 : vector<2x256xf32>, i32 -> vector<2x256xf32>
    %c8_159 = arith.constant 8 : index
    %532 = memref.load %arg3[%c8_159] : memref<98xf32, #tpu.memory_space<smem>>
    %533 = vector.broadcast %532 : f32 to vector<2x1xf32>
    %534 = arith.mulf %533, %298 : vector<2x1xf32>
    %c57 = arith.constant 57 : index
    %535 = memref.load %arg3[%c57] : memref<98xf32, #tpu.memory_space<smem>>
    %536 = vector.broadcast %535 : f32 to vector<2x1xf32>
    %537 = arith.mulf %536, %300 : vector<2x1xf32>
    %538 = arith.addf %534, %537 : vector<2x1xf32>
    %539 = arith.andi %514, %335 : vector<1x256xi1>
    %540 = vector.broadcast %538 : vector<2x1xf32> to vector<2x256xf32>
    %541 = arith.mulf %540, %531 : vector<2x256xf32>
    %cst_160 = arith.constant 0.000000e+00 : f32
    %542 = vector.shape_cast %539 : vector<1x256xi1> to vector<1x256xi1>
    %543 = vector.broadcast %542 : vector<1x256xi1> to vector<2x256xi1>
    %544 = vector.broadcast %cst_160 : f32 to vector<2x256xf32>
    %545 = arith.select %543, %541, %544 : vector<2x256xi1>, vector<2x256xf32>
    %546 = arith.addf %473, %545 : vector<2x256xf32>
    %c33_i32 = arith.constant 33 : i32
    %547 = tpu.dynamic_rotate %307 by %c33_i32 dim 1 : vector<2x256xf32>, i32 -> vector<2x256xf32>
    %c9_161 = arith.constant 9 : index
    %548 = memref.load %arg3[%c9_161] : memref<98xf32, #tpu.memory_space<smem>>
    %549 = vector.broadcast %548 : f32 to vector<2x1xf32>
    %550 = arith.mulf %549, %298 : vector<2x1xf32>
    %c58 = arith.constant 58 : index
    %551 = memref.load %arg3[%c58] : memref<98xf32, #tpu.memory_space<smem>>
    %552 = vector.broadcast %551 : f32 to vector<2x1xf32>
    %553 = arith.mulf %552, %300 : vector<2x1xf32>
    %554 = arith.addf %550, %553 : vector<2x1xf32>
    %555 = arith.andi %514, %344 : vector<1x256xi1>
    %556 = vector.broadcast %554 : vector<2x1xf32> to vector<2x256xf32>
    %557 = arith.mulf %556, %547 : vector<2x256xf32>
    %cst_162 = arith.constant 0.000000e+00 : f32
    %558 = vector.shape_cast %555 : vector<1x256xi1> to vector<1x256xi1>
    %559 = vector.broadcast %558 : vector<1x256xi1> to vector<2x256xi1>
    %560 = vector.broadcast %cst_162 : f32 to vector<2x256xf32>
    %561 = arith.select %559, %557, %560 : vector<2x256xi1>, vector<2x256xf32>
    %562 = arith.addf %489, %561 : vector<2x256xf32>
    %c32_i32 = arith.constant 32 : i32
    %563 = tpu.dynamic_rotate %307 by %c32_i32 dim 1 : vector<2x256xf32>, i32 -> vector<2x256xf32>
    %c10_163 = arith.constant 10 : index
    %564 = memref.load %arg3[%c10_163] : memref<98xf32, #tpu.memory_space<smem>>
    %565 = vector.broadcast %564 : f32 to vector<2x1xf32>
    %566 = arith.mulf %565, %298 : vector<2x1xf32>
    %c59 = arith.constant 59 : index
    %567 = memref.load %arg3[%c59] : memref<98xf32, #tpu.memory_space<smem>>
    %568 = vector.broadcast %567 : f32 to vector<2x1xf32>
    %569 = arith.mulf %568, %300 : vector<2x1xf32>
    %570 = arith.addf %566, %569 : vector<2x1xf32>
    %571 = arith.andi %514, %353 : vector<1x256xi1>
    %572 = vector.broadcast %570 : vector<2x1xf32> to vector<2x256xf32>
    %573 = arith.mulf %572, %563 : vector<2x256xf32>
    %cst_164 = arith.constant 0.000000e+00 : f32
    %574 = vector.shape_cast %571 : vector<1x256xi1> to vector<1x256xi1>
    %575 = vector.broadcast %574 : vector<1x256xi1> to vector<2x256xi1>
    %576 = vector.broadcast %cst_164 : f32 to vector<2x256xf32>
    %577 = arith.select %575, %573, %576 : vector<2x256xi1>, vector<2x256xf32>
    %578 = arith.addf %505, %577 : vector<2x256xf32>
    %c31_i32 = arith.constant 31 : i32
    %579 = tpu.dynamic_rotate %307 by %c31_i32 dim 1 : vector<2x256xf32>, i32 -> vector<2x256xf32>
    %c11_165 = arith.constant 11 : index
    %580 = memref.load %arg3[%c11_165] : memref<98xf32, #tpu.memory_space<smem>>
    %581 = vector.broadcast %580 : f32 to vector<2x1xf32>
    %582 = arith.mulf %581, %298 : vector<2x1xf32>
    %c60 = arith.constant 60 : index
    %583 = memref.load %arg3[%c60] : memref<98xf32, #tpu.memory_space<smem>>
    %584 = vector.broadcast %583 : f32 to vector<2x1xf32>
    %585 = arith.mulf %584, %300 : vector<2x1xf32>
    %586 = arith.addf %582, %585 : vector<2x1xf32>
    %587 = arith.andi %514, %362 : vector<1x256xi1>
    %588 = vector.broadcast %586 : vector<2x1xf32> to vector<2x256xf32>
    %589 = arith.mulf %588, %579 : vector<2x256xf32>
    %cst_166 = arith.constant 0.000000e+00 : f32
    %590 = vector.shape_cast %587 : vector<1x256xi1> to vector<1x256xi1>
    %591 = vector.broadcast %590 : vector<1x256xi1> to vector<2x256xi1>
    %592 = vector.broadcast %cst_166 : f32 to vector<2x256xf32>
    %593 = arith.select %591, %589, %592 : vector<2x256xi1>, vector<2x256xf32>
    %594 = arith.addf %530, %593 : vector<2x256xf32>
    %c30_i32 = arith.constant 30 : i32
    %595 = tpu.dynamic_rotate %307 by %c30_i32 dim 1 : vector<2x256xf32>, i32 -> vector<2x256xf32>
    %c12_167 = arith.constant 12 : index
    %596 = memref.load %arg3[%c12_167] : memref<98xf32, #tpu.memory_space<smem>>
    %597 = vector.broadcast %596 : f32 to vector<2x1xf32>
    %598 = arith.mulf %597, %298 : vector<2x1xf32>
    %c61 = arith.constant 61 : index
    %599 = memref.load %arg3[%c61] : memref<98xf32, #tpu.memory_space<smem>>
    %600 = vector.broadcast %599 : f32 to vector<2x1xf32>
    %601 = arith.mulf %600, %300 : vector<2x1xf32>
    %602 = arith.addf %598, %601 : vector<2x1xf32>
    %603 = arith.andi %514, %371 : vector<1x256xi1>
    %604 = vector.broadcast %602 : vector<2x1xf32> to vector<2x256xf32>
    %605 = arith.mulf %604, %595 : vector<2x256xf32>
    %cst_168 = arith.constant 0.000000e+00 : f32
    %606 = vector.shape_cast %603 : vector<1x256xi1> to vector<1x256xi1>
    %607 = vector.broadcast %606 : vector<1x256xi1> to vector<2x256xi1>
    %608 = vector.broadcast %cst_168 : f32 to vector<2x256xf32>
    %609 = arith.select %607, %605, %608 : vector<2x256xi1>, vector<2x256xf32>
    %610 = arith.addf %546, %609 : vector<2x256xf32>
    %c29_i32 = arith.constant 29 : i32
    %611 = tpu.dynamic_rotate %307 by %c29_i32 dim 1 : vector<2x256xf32>, i32 -> vector<2x256xf32>
    %c13_169 = arith.constant 13 : index
    %612 = memref.load %arg3[%c13_169] : memref<98xf32, #tpu.memory_space<smem>>
    %613 = vector.broadcast %612 : f32 to vector<2x1xf32>
    %614 = arith.mulf %613, %298 : vector<2x1xf32>
    %c62 = arith.constant 62 : index
    %615 = memref.load %arg3[%c62] : memref<98xf32, #tpu.memory_space<smem>>
    %616 = vector.broadcast %615 : f32 to vector<2x1xf32>
    %617 = arith.mulf %616, %300 : vector<2x1xf32>
    %618 = arith.addf %614, %617 : vector<2x1xf32>
    %619 = arith.andi %514, %380 : vector<1x256xi1>
    %620 = vector.broadcast %618 : vector<2x1xf32> to vector<2x256xf32>
    %621 = arith.mulf %620, %611 : vector<2x256xf32>
    %cst_170 = arith.constant 0.000000e+00 : f32
    %622 = vector.shape_cast %619 : vector<1x256xi1> to vector<1x256xi1>
    %623 = vector.broadcast %622 : vector<1x256xi1> to vector<2x256xi1>
    %624 = vector.broadcast %cst_170 : f32 to vector<2x256xf32>
    %625 = arith.select %623, %621, %624 : vector<2x256xi1>, vector<2x256xf32>
    %626 = arith.addf %562, %625 : vector<2x256xf32>
    %cst_171 = arith.constant -1.000000e+00 : f32
    %627 = vector.broadcast %cst_171 : f32 to vector<1x256xf32>
    %628 = arith.addf %314, %627 : vector<1x256xf32>
    %cst_172 = arith.constant 0.000000e+00 : f32
    %629 = vector.broadcast %cst_172 : f32 to vector<1x256xf32>
    %630 = arith.cmpf oge, %628, %629 : vector<1x256xf32>
    %cst_173 = arith.constant -1.000000e+00 : f32
    %631 = vector.broadcast %cst_173 : f32 to vector<1x256xf32>
    %632 = arith.addf %314, %631 : vector<1x256xf32>
    %cst_174 = arith.constant 1.500000e+01 : f32
    %633 = vector.broadcast %cst_174 : f32 to vector<1x256xf32>
    %634 = arith.cmpf ole, %632, %633 : vector<1x256xf32>
    %635 = arith.andi %630, %634 : vector<1x256xi1>
    %c19_i32 = arith.constant 19 : i32
    %636 = tpu.dynamic_rotate %307 by %c19_i32 dim 1 : vector<2x256xf32>, i32 -> vector<2x256xf32>
    %c14_175 = arith.constant 14 : index
    %637 = memref.load %arg3[%c14_175] : memref<98xf32, #tpu.memory_space<smem>>
    %638 = vector.broadcast %637 : f32 to vector<2x1xf32>
    %639 = arith.mulf %638, %298 : vector<2x1xf32>
    %c63 = arith.constant 63 : index
    %640 = memref.load %arg3[%c63] : memref<98xf32, #tpu.memory_space<smem>>
    %641 = vector.broadcast %640 : f32 to vector<2x1xf32>
    %642 = arith.mulf %641, %300 : vector<2x1xf32>
    %643 = arith.addf %639, %642 : vector<2x1xf32>
    %644 = arith.andi %635, %326 : vector<1x256xi1>
    %645 = vector.broadcast %643 : vector<2x1xf32> to vector<2x256xf32>
    %646 = arith.mulf %645, %636 : vector<2x256xf32>
    %cst_176 = arith.constant 0.000000e+00 : f32
    %647 = vector.shape_cast %644 : vector<1x256xi1> to vector<1x256xi1>
    %648 = vector.broadcast %647 : vector<1x256xi1> to vector<2x256xi1>
    %649 = vector.broadcast %cst_176 : f32 to vector<2x256xf32>
    %650 = arith.select %648, %646, %649 : vector<2x256xi1>, vector<2x256xf32>
    %651 = arith.addf %578, %650 : vector<2x256xf32>
    %c18_i32 = arith.constant 18 : i32
    %652 = tpu.dynamic_rotate %307 by %c18_i32 dim 1 : vector<2x256xf32>, i32 -> vector<2x256xf32>
    %c15_177 = arith.constant 15 : index
    %653 = memref.load %arg3[%c15_177] : memref<98xf32, #tpu.memory_space<smem>>
    %654 = vector.broadcast %653 : f32 to vector<2x1xf32>
    %655 = arith.mulf %654, %298 : vector<2x1xf32>
    %c64 = arith.constant 64 : index
    %656 = memref.load %arg3[%c64] : memref<98xf32, #tpu.memory_space<smem>>
    %657 = vector.broadcast %656 : f32 to vector<2x1xf32>
    %658 = arith.mulf %657, %300 : vector<2x1xf32>
    %659 = arith.addf %655, %658 : vector<2x1xf32>
    %660 = arith.andi %635, %335 : vector<1x256xi1>
    %661 = vector.broadcast %659 : vector<2x1xf32> to vector<2x256xf32>
    %662 = arith.mulf %661, %652 : vector<2x256xf32>
    %cst_178 = arith.constant 0.000000e+00 : f32
    %663 = vector.shape_cast %660 : vector<1x256xi1> to vector<1x256xi1>
    %664 = vector.broadcast %663 : vector<1x256xi1> to vector<2x256xi1>
    %665 = vector.broadcast %cst_178 : f32 to vector<2x256xf32>
    %666 = arith.select %664, %662, %665 : vector<2x256xi1>, vector<2x256xf32>
    %667 = arith.addf %594, %666 : vector<2x256xf32>
    %c17_i32 = arith.constant 17 : i32
    %668 = tpu.dynamic_rotate %307 by %c17_i32 dim 1 : vector<2x256xf32>, i32 -> vector<2x256xf32>
    %c16_179 = arith.constant 16 : index
    %669 = memref.load %arg3[%c16_179] : memref<98xf32, #tpu.memory_space<smem>>
    %670 = vector.broadcast %669 : f32 to vector<2x1xf32>
    %671 = arith.mulf %670, %298 : vector<2x1xf32>
    %c65 = arith.constant 65 : index
    %672 = memref.load %arg3[%c65] : memref<98xf32, #tpu.memory_space<smem>>
    %673 = vector.broadcast %672 : f32 to vector<2x1xf32>
    %674 = arith.mulf %673, %300 : vector<2x1xf32>
    %675 = arith.addf %671, %674 : vector<2x1xf32>
    %676 = arith.andi %635, %344 : vector<1x256xi1>
    %677 = vector.broadcast %675 : vector<2x1xf32> to vector<2x256xf32>
    %678 = arith.mulf %677, %668 : vector<2x256xf32>
    %cst_180 = arith.constant 0.000000e+00 : f32
    %679 = vector.shape_cast %676 : vector<1x256xi1> to vector<1x256xi1>
    %680 = vector.broadcast %679 : vector<1x256xi1> to vector<2x256xi1>
    %681 = vector.broadcast %cst_180 : f32 to vector<2x256xf32>
    %682 = arith.select %680, %678, %681 : vector<2x256xi1>, vector<2x256xf32>
    %683 = arith.addf %610, %682 : vector<2x256xf32>
    %c16_i32 = arith.constant 16 : i32
    %684 = tpu.dynamic_rotate %307 by %c16_i32 dim 1 : vector<2x256xf32>, i32 -> vector<2x256xf32>
    %c17_181 = arith.constant 17 : index
    %685 = memref.load %arg3[%c17_181] : memref<98xf32, #tpu.memory_space<smem>>
    %686 = vector.broadcast %685 : f32 to vector<2x1xf32>
    %687 = arith.mulf %686, %298 : vector<2x1xf32>
    %c66 = arith.constant 66 : index
    %688 = memref.load %arg3[%c66] : memref<98xf32, #tpu.memory_space<smem>>
    %689 = vector.broadcast %688 : f32 to vector<2x1xf32>
    %690 = arith.mulf %689, %300 : vector<2x1xf32>
    %691 = arith.addf %687, %690 : vector<2x1xf32>
    %692 = arith.andi %635, %353 : vector<1x256xi1>
    %693 = vector.broadcast %691 : vector<2x1xf32> to vector<2x256xf32>
    %694 = arith.mulf %693, %684 : vector<2x256xf32>
    %cst_182 = arith.constant 0.000000e+00 : f32
    %695 = vector.shape_cast %692 : vector<1x256xi1> to vector<1x256xi1>
    %696 = vector.broadcast %695 : vector<1x256xi1> to vector<2x256xi1>
    %697 = vector.broadcast %cst_182 : f32 to vector<2x256xf32>
    %698 = arith.select %696, %694, %697 : vector<2x256xi1>, vector<2x256xf32>
    %699 = arith.addf %626, %698 : vector<2x256xf32>
    %c15_i32 = arith.constant 15 : i32
    %700 = tpu.dynamic_rotate %307 by %c15_i32 dim 1 : vector<2x256xf32>, i32 -> vector<2x256xf32>
    %c18 = arith.constant 18 : index
    %701 = memref.load %arg3[%c18] : memref<98xf32, #tpu.memory_space<smem>>
    %702 = vector.broadcast %701 : f32 to vector<2x1xf32>
    %703 = arith.mulf %702, %298 : vector<2x1xf32>
    %c67 = arith.constant 67 : index
    %704 = memref.load %arg3[%c67] : memref<98xf32, #tpu.memory_space<smem>>
    %705 = vector.broadcast %704 : f32 to vector<2x1xf32>
    %706 = arith.mulf %705, %300 : vector<2x1xf32>
    %707 = arith.addf %703, %706 : vector<2x1xf32>
    %708 = arith.andi %635, %362 : vector<1x256xi1>
    %709 = vector.broadcast %707 : vector<2x1xf32> to vector<2x256xf32>
    %710 = arith.mulf %709, %700 : vector<2x256xf32>
    %cst_183 = arith.constant 0.000000e+00 : f32
    %711 = vector.shape_cast %708 : vector<1x256xi1> to vector<1x256xi1>
    %712 = vector.broadcast %711 : vector<1x256xi1> to vector<2x256xi1>
    %713 = vector.broadcast %cst_183 : f32 to vector<2x256xf32>
    %714 = arith.select %712, %710, %713 : vector<2x256xi1>, vector<2x256xf32>
    %715 = arith.addf %651, %714 : vector<2x256xf32>
    %c14_i32 = arith.constant 14 : i32
    %716 = tpu.dynamic_rotate %307 by %c14_i32 dim 1 : vector<2x256xf32>, i32 -> vector<2x256xf32>
    %c19 = arith.constant 19 : index
    %717 = memref.load %arg3[%c19] : memref<98xf32, #tpu.memory_space<smem>>
    %718 = vector.broadcast %717 : f32 to vector<2x1xf32>
    %719 = arith.mulf %718, %298 : vector<2x1xf32>
    %c68 = arith.constant 68 : index
    %720 = memref.load %arg3[%c68] : memref<98xf32, #tpu.memory_space<smem>>
    %721 = vector.broadcast %720 : f32 to vector<2x1xf32>
    %722 = arith.mulf %721, %300 : vector<2x1xf32>
    %723 = arith.addf %719, %722 : vector<2x1xf32>
    %724 = arith.andi %635, %371 : vector<1x256xi1>
    %725 = vector.broadcast %723 : vector<2x1xf32> to vector<2x256xf32>
    %726 = arith.mulf %725, %716 : vector<2x256xf32>
    %cst_184 = arith.constant 0.000000e+00 : f32
    %727 = vector.shape_cast %724 : vector<1x256xi1> to vector<1x256xi1>
    %728 = vector.broadcast %727 : vector<1x256xi1> to vector<2x256xi1>
    %729 = vector.broadcast %cst_184 : f32 to vector<2x256xf32>
    %730 = arith.select %728, %726, %729 : vector<2x256xi1>, vector<2x256xf32>
    %731 = arith.addf %667, %730 : vector<2x256xf32>
    %c13_i32 = arith.constant 13 : i32
    %732 = tpu.dynamic_rotate %307 by %c13_i32 dim 1 : vector<2x256xf32>, i32 -> vector<2x256xf32>
    %c20 = arith.constant 20 : index
    %733 = memref.load %arg3[%c20] : memref<98xf32, #tpu.memory_space<smem>>
    %734 = vector.broadcast %733 : f32 to vector<2x1xf32>
    %735 = arith.mulf %734, %298 : vector<2x1xf32>
    %c69 = arith.constant 69 : index
    %736 = memref.load %arg3[%c69] : memref<98xf32, #tpu.memory_space<smem>>
    %737 = vector.broadcast %736 : f32 to vector<2x1xf32>
    %738 = arith.mulf %737, %300 : vector<2x1xf32>
    %739 = arith.addf %735, %738 : vector<2x1xf32>
    %740 = arith.andi %635, %380 : vector<1x256xi1>
    %741 = vector.broadcast %739 : vector<2x1xf32> to vector<2x256xf32>
    %742 = arith.mulf %741, %732 : vector<2x256xf32>
    %cst_185 = arith.constant 0.000000e+00 : f32
    %743 = vector.shape_cast %740 : vector<1x256xi1> to vector<1x256xi1>
    %744 = vector.broadcast %743 : vector<1x256xi1> to vector<2x256xi1>
    %745 = vector.broadcast %cst_185 : f32 to vector<2x256xf32>
    %746 = arith.select %744, %742, %745 : vector<2x256xi1>, vector<2x256xf32>
    %747 = arith.addf %683, %746 : vector<2x256xf32>
    %cst_186 = arith.constant 0.000000e+00 : f32
    %748 = vector.broadcast %cst_186 : f32 to vector<1x256xf32>
    %749 = arith.addf %314, %748 : vector<1x256xf32>
    %cst_187 = arith.constant 0.000000e+00 : f32
    %750 = vector.broadcast %cst_187 : f32 to vector<1x256xf32>
    %751 = arith.cmpf oge, %749, %750 : vector<1x256xf32>
    %cst_188 = arith.constant 0.000000e+00 : f32
    %752 = vector.broadcast %cst_188 : f32 to vector<1x256xf32>
    %753 = arith.addf %314, %752 : vector<1x256xf32>
    %cst_189 = arith.constant 1.500000e+01 : f32
    %754 = vector.broadcast %cst_189 : f32 to vector<1x256xf32>
    %755 = arith.cmpf ole, %753, %754 : vector<1x256xf32>
    %756 = arith.andi %751, %755 : vector<1x256xi1>
    %c3_i32_190 = arith.constant 3 : i32
    %757 = tpu.dynamic_rotate %307 by %c3_i32_190 dim 1 : vector<2x256xf32>, i32 -> vector<2x256xf32>
    %c21 = arith.constant 21 : index
    %758 = memref.load %arg3[%c21] : memref<98xf32, #tpu.memory_space<smem>>
    %759 = vector.broadcast %758 : f32 to vector<2x1xf32>
    %760 = arith.mulf %759, %298 : vector<2x1xf32>
    %c70 = arith.constant 70 : index
    %761 = memref.load %arg3[%c70] : memref<98xf32, #tpu.memory_space<smem>>
    %762 = vector.broadcast %761 : f32 to vector<2x1xf32>
    %763 = arith.mulf %762, %300 : vector<2x1xf32>
    %764 = arith.addf %760, %763 : vector<2x1xf32>
    %765 = arith.andi %756, %326 : vector<1x256xi1>
    %766 = vector.broadcast %764 : vector<2x1xf32> to vector<2x256xf32>
    %767 = arith.mulf %766, %757 : vector<2x256xf32>
    %cst_191 = arith.constant 0.000000e+00 : f32
    %768 = vector.shape_cast %765 : vector<1x256xi1> to vector<1x256xi1>
    %769 = vector.broadcast %768 : vector<1x256xi1> to vector<2x256xi1>
    %770 = vector.broadcast %cst_191 : f32 to vector<2x256xf32>
    %771 = arith.select %769, %767, %770 : vector<2x256xi1>, vector<2x256xf32>
    %772 = arith.addf %699, %771 : vector<2x256xf32>
    %c2_i32_192 = arith.constant 2 : i32
    %773 = tpu.dynamic_rotate %307 by %c2_i32_192 dim 1 : vector<2x256xf32>, i32 -> vector<2x256xf32>
    %c22 = arith.constant 22 : index
    %774 = memref.load %arg3[%c22] : memref<98xf32, #tpu.memory_space<smem>>
    %775 = vector.broadcast %774 : f32 to vector<2x1xf32>
    %776 = arith.mulf %775, %298 : vector<2x1xf32>
    %c71 = arith.constant 71 : index
    %777 = memref.load %arg3[%c71] : memref<98xf32, #tpu.memory_space<smem>>
    %778 = vector.broadcast %777 : f32 to vector<2x1xf32>
    %779 = arith.mulf %778, %300 : vector<2x1xf32>
    %780 = arith.addf %776, %779 : vector<2x1xf32>
    %781 = arith.andi %756, %335 : vector<1x256xi1>
    %782 = vector.broadcast %780 : vector<2x1xf32> to vector<2x256xf32>
    %783 = arith.mulf %782, %773 : vector<2x256xf32>
    %cst_193 = arith.constant 0.000000e+00 : f32
    %784 = vector.shape_cast %781 : vector<1x256xi1> to vector<1x256xi1>
    %785 = vector.broadcast %784 : vector<1x256xi1> to vector<2x256xi1>
    %786 = vector.broadcast %cst_193 : f32 to vector<2x256xf32>
    %787 = arith.select %785, %783, %786 : vector<2x256xi1>, vector<2x256xf32>
    %788 = arith.addf %715, %787 : vector<2x256xf32>
    %c1_i32_194 = arith.constant 1 : i32
    %789 = tpu.dynamic_rotate %307 by %c1_i32_194 dim 1 : vector<2x256xf32>, i32 -> vector<2x256xf32>
    %c23 = arith.constant 23 : index
    %790 = memref.load %arg3[%c23] : memref<98xf32, #tpu.memory_space<smem>>
    %791 = vector.broadcast %790 : f32 to vector<2x1xf32>
    %792 = arith.mulf %791, %298 : vector<2x1xf32>
    %c72 = arith.constant 72 : index
    %793 = memref.load %arg3[%c72] : memref<98xf32, #tpu.memory_space<smem>>
    %794 = vector.broadcast %793 : f32 to vector<2x1xf32>
    %795 = arith.mulf %794, %300 : vector<2x1xf32>
    %796 = arith.addf %792, %795 : vector<2x1xf32>
    %797 = arith.andi %756, %344 : vector<1x256xi1>
    %798 = vector.broadcast %796 : vector<2x1xf32> to vector<2x256xf32>
    %799 = arith.mulf %798, %789 : vector<2x256xf32>
    %cst_195 = arith.constant 0.000000e+00 : f32
    %800 = vector.shape_cast %797 : vector<1x256xi1> to vector<1x256xi1>
    %801 = vector.broadcast %800 : vector<1x256xi1> to vector<2x256xi1>
    %802 = vector.broadcast %cst_195 : f32 to vector<2x256xf32>
    %803 = arith.select %801, %799, %802 : vector<2x256xi1>, vector<2x256xf32>
    %804 = arith.addf %731, %803 : vector<2x256xf32>
    %c24 = arith.constant 24 : index
    %805 = memref.load %arg3[%c24] : memref<98xf32, #tpu.memory_space<smem>>
    %806 = vector.broadcast %805 : f32 to vector<2x1xf32>
    %807 = arith.mulf %806, %298 : vector<2x1xf32>
    %c73 = arith.constant 73 : index
    %808 = memref.load %arg3[%c73] : memref<98xf32, #tpu.memory_space<smem>>
    %809 = vector.broadcast %808 : f32 to vector<2x1xf32>
    %810 = arith.mulf %809, %300 : vector<2x1xf32>
    %811 = arith.addf %807, %810 : vector<2x1xf32>
    %812 = arith.andi %756, %353 : vector<1x256xi1>
    %813 = vector.broadcast %811 : vector<2x1xf32> to vector<2x256xf32>
    %814 = arith.mulf %813, %307 : vector<2x256xf32>
    %cst_196 = arith.constant 0.000000e+00 : f32
    %815 = vector.shape_cast %812 : vector<1x256xi1> to vector<1x256xi1>
    %816 = vector.broadcast %815 : vector<1x256xi1> to vector<2x256xi1>
    %817 = vector.broadcast %cst_196 : f32 to vector<2x256xf32>
    %818 = arith.select %816, %814, %817 : vector<2x256xi1>, vector<2x256xf32>
    %819 = arith.addf %747, %818 : vector<2x256xf32>
    %c255_i32 = arith.constant 255 : i32
    %820 = tpu.dynamic_rotate %307 by %c255_i32 dim 1 : vector<2x256xf32>, i32 -> vector<2x256xf32>
    %c25 = arith.constant 25 : index
    %821 = memref.load %arg3[%c25] : memref<98xf32, #tpu.memory_space<smem>>
    %822 = vector.broadcast %821 : f32 to vector<2x1xf32>
    %823 = arith.mulf %822, %298 : vector<2x1xf32>
    %c74 = arith.constant 74 : index
    %824 = memref.load %arg3[%c74] : memref<98xf32, #tpu.memory_space<smem>>
    %825 = vector.broadcast %824 : f32 to vector<2x1xf32>
    %826 = arith.mulf %825, %300 : vector<2x1xf32>
    %827 = arith.addf %823, %826 : vector<2x1xf32>
    %828 = arith.andi %756, %362 : vector<1x256xi1>
    %829 = vector.broadcast %827 : vector<2x1xf32> to vector<2x256xf32>
    %830 = arith.mulf %829, %820 : vector<2x256xf32>
    %cst_197 = arith.constant 0.000000e+00 : f32
    %831 = vector.shape_cast %828 : vector<1x256xi1> to vector<1x256xi1>
    %832 = vector.broadcast %831 : vector<1x256xi1> to vector<2x256xi1>
    %833 = vector.broadcast %cst_197 : f32 to vector<2x256xf32>
    %834 = arith.select %832, %830, %833 : vector<2x256xi1>, vector<2x256xf32>
    %835 = arith.addf %772, %834 : vector<2x256xf32>
    %c254_i32 = arith.constant 254 : i32
    %836 = tpu.dynamic_rotate %307 by %c254_i32 dim 1 : vector<2x256xf32>, i32 -> vector<2x256xf32>
    %c26 = arith.constant 26 : index
    %837 = memref.load %arg3[%c26] : memref<98xf32, #tpu.memory_space<smem>>
    %838 = vector.broadcast %837 : f32 to vector<2x1xf32>
    %839 = arith.mulf %838, %298 : vector<2x1xf32>
    %c75 = arith.constant 75 : index
    %840 = memref.load %arg3[%c75] : memref<98xf32, #tpu.memory_space<smem>>
    %841 = vector.broadcast %840 : f32 to vector<2x1xf32>
    %842 = arith.mulf %841, %300 : vector<2x1xf32>
    %843 = arith.addf %839, %842 : vector<2x1xf32>
    %844 = arith.andi %756, %371 : vector<1x256xi1>
    %845 = vector.broadcast %843 : vector<2x1xf32> to vector<2x256xf32>
    %846 = arith.mulf %845, %836 : vector<2x256xf32>
    %cst_198 = arith.constant 0.000000e+00 : f32
    %847 = vector.shape_cast %844 : vector<1x256xi1> to vector<1x256xi1>
    %848 = vector.broadcast %847 : vector<1x256xi1> to vector<2x256xi1>
    %849 = vector.broadcast %cst_198 : f32 to vector<2x256xf32>
    %850 = arith.select %848, %846, %849 : vector<2x256xi1>, vector<2x256xf32>
    %851 = arith.addf %788, %850 : vector<2x256xf32>
    %c253_i32 = arith.constant 253 : i32
    %852 = tpu.dynamic_rotate %307 by %c253_i32 dim 1 : vector<2x256xf32>, i32 -> vector<2x256xf32>
    %c27 = arith.constant 27 : index
    %853 = memref.load %arg3[%c27] : memref<98xf32, #tpu.memory_space<smem>>
    %854 = vector.broadcast %853 : f32 to vector<2x1xf32>
    %855 = arith.mulf %854, %298 : vector<2x1xf32>
    %c76 = arith.constant 76 : index
    %856 = memref.load %arg3[%c76] : memref<98xf32, #tpu.memory_space<smem>>
    %857 = vector.broadcast %856 : f32 to vector<2x1xf32>
    %858 = arith.mulf %857, %300 : vector<2x1xf32>
    %859 = arith.addf %855, %858 : vector<2x1xf32>
    %860 = arith.andi %756, %380 : vector<1x256xi1>
    %861 = vector.broadcast %859 : vector<2x1xf32> to vector<2x256xf32>
    %862 = arith.mulf %861, %852 : vector<2x256xf32>
    %cst_199 = arith.constant 0.000000e+00 : f32
    %863 = vector.shape_cast %860 : vector<1x256xi1> to vector<1x256xi1>
    %864 = vector.broadcast %863 : vector<1x256xi1> to vector<2x256xi1>
    %865 = vector.broadcast %cst_199 : f32 to vector<2x256xf32>
    %866 = arith.select %864, %862, %865 : vector<2x256xi1>, vector<2x256xf32>
    %867 = arith.addf %804, %866 : vector<2x256xf32>
    %cst_200 = arith.constant 1.000000e+00 : f32
    %868 = vector.broadcast %cst_200 : f32 to vector<1x256xf32>
    %869 = arith.addf %314, %868 : vector<1x256xf32>
    %cst_201 = arith.constant 0.000000e+00 : f32
    %870 = vector.broadcast %cst_201 : f32 to vector<1x256xf32>
    %871 = arith.cmpf oge, %869, %870 : vector<1x256xf32>
    %cst_202 = arith.constant 1.000000e+00 : f32
    %872 = vector.broadcast %cst_202 : f32 to vector<1x256xf32>
    %873 = arith.addf %314, %872 : vector<1x256xf32>
    %cst_203 = arith.constant 1.500000e+01 : f32
    %874 = vector.broadcast %cst_203 : f32 to vector<1x256xf32>
    %875 = arith.cmpf ole, %873, %874 : vector<1x256xf32>
    %876 = arith.andi %871, %875 : vector<1x256xi1>
    %c243_i32 = arith.constant 243 : i32
    %877 = tpu.dynamic_rotate %307 by %c243_i32 dim 1 : vector<2x256xf32>, i32 -> vector<2x256xf32>
    %c28 = arith.constant 28 : index
    %878 = memref.load %arg3[%c28] : memref<98xf32, #tpu.memory_space<smem>>
    %879 = vector.broadcast %878 : f32 to vector<2x1xf32>
    %880 = arith.mulf %879, %298 : vector<2x1xf32>
    %c77 = arith.constant 77 : index
    %881 = memref.load %arg3[%c77] : memref<98xf32, #tpu.memory_space<smem>>
    %882 = vector.broadcast %881 : f32 to vector<2x1xf32>
    %883 = arith.mulf %882, %300 : vector<2x1xf32>
    %884 = arith.addf %880, %883 : vector<2x1xf32>
    %885 = arith.andi %876, %326 : vector<1x256xi1>
    %886 = vector.broadcast %884 : vector<2x1xf32> to vector<2x256xf32>
    %887 = arith.mulf %886, %877 : vector<2x256xf32>
    %cst_204 = arith.constant 0.000000e+00 : f32
    %888 = vector.shape_cast %885 : vector<1x256xi1> to vector<1x256xi1>
    %889 = vector.broadcast %888 : vector<1x256xi1> to vector<2x256xi1>
    %890 = vector.broadcast %cst_204 : f32 to vector<2x256xf32>
    %891 = arith.select %889, %887, %890 : vector<2x256xi1>, vector<2x256xf32>
    %892 = arith.addf %819, %891 : vector<2x256xf32>
    %c242_i32 = arith.constant 242 : i32
    %893 = tpu.dynamic_rotate %307 by %c242_i32 dim 1 : vector<2x256xf32>, i32 -> vector<2x256xf32>
    %c29 = arith.constant 29 : index
    %894 = memref.load %arg3[%c29] : memref<98xf32, #tpu.memory_space<smem>>
    %895 = vector.broadcast %894 : f32 to vector<2x1xf32>
    %896 = arith.mulf %895, %298 : vector<2x1xf32>
    %c78 = arith.constant 78 : index
    %897 = memref.load %arg3[%c78] : memref<98xf32, #tpu.memory_space<smem>>
    %898 = vector.broadcast %897 : f32 to vector<2x1xf32>
    %899 = arith.mulf %898, %300 : vector<2x1xf32>
    %900 = arith.addf %896, %899 : vector<2x1xf32>
    %901 = arith.andi %876, %335 : vector<1x256xi1>
    %902 = vector.broadcast %900 : vector<2x1xf32> to vector<2x256xf32>
    %903 = arith.mulf %902, %893 : vector<2x256xf32>
    %cst_205 = arith.constant 0.000000e+00 : f32
    %904 = vector.shape_cast %901 : vector<1x256xi1> to vector<1x256xi1>
    %905 = vector.broadcast %904 : vector<1x256xi1> to vector<2x256xi1>
    %906 = vector.broadcast %cst_205 : f32 to vector<2x256xf32>
    %907 = arith.select %905, %903, %906 : vector<2x256xi1>, vector<2x256xf32>
    %908 = arith.addf %835, %907 : vector<2x256xf32>
    %c241_i32 = arith.constant 241 : i32
    %909 = tpu.dynamic_rotate %307 by %c241_i32 dim 1 : vector<2x256xf32>, i32 -> vector<2x256xf32>
    %c30 = arith.constant 30 : index
    %910 = memref.load %arg3[%c30] : memref<98xf32, #tpu.memory_space<smem>>
    %911 = vector.broadcast %910 : f32 to vector<2x1xf32>
    %912 = arith.mulf %911, %298 : vector<2x1xf32>
    %c79 = arith.constant 79 : index
    %913 = memref.load %arg3[%c79] : memref<98xf32, #tpu.memory_space<smem>>
    %914 = vector.broadcast %913 : f32 to vector<2x1xf32>
    %915 = arith.mulf %914, %300 : vector<2x1xf32>
    %916 = arith.addf %912, %915 : vector<2x1xf32>
    %917 = arith.andi %876, %344 : vector<1x256xi1>
    %918 = vector.broadcast %916 : vector<2x1xf32> to vector<2x256xf32>
    %919 = arith.mulf %918, %909 : vector<2x256xf32>
    %cst_206 = arith.constant 0.000000e+00 : f32
    %920 = vector.shape_cast %917 : vector<1x256xi1> to vector<1x256xi1>
    %921 = vector.broadcast %920 : vector<1x256xi1> to vector<2x256xi1>
    %922 = vector.broadcast %cst_206 : f32 to vector<2x256xf32>
    %923 = arith.select %921, %919, %922 : vector<2x256xi1>, vector<2x256xf32>
    %924 = arith.addf %851, %923 : vector<2x256xf32>
    %c240_i32 = arith.constant 240 : i32
    %925 = tpu.dynamic_rotate %307 by %c240_i32 dim 1 : vector<2x256xf32>, i32 -> vector<2x256xf32>
    %c31 = arith.constant 31 : index
    %926 = memref.load %arg3[%c31] : memref<98xf32, #tpu.memory_space<smem>>
    %927 = vector.broadcast %926 : f32 to vector<2x1xf32>
    %928 = arith.mulf %927, %298 : vector<2x1xf32>
    %c80 = arith.constant 80 : index
    %929 = memref.load %arg3[%c80] : memref<98xf32, #tpu.memory_space<smem>>
    %930 = vector.broadcast %929 : f32 to vector<2x1xf32>
    %931 = arith.mulf %930, %300 : vector<2x1xf32>
    %932 = arith.addf %928, %931 : vector<2x1xf32>
    %933 = arith.andi %876, %353 : vector<1x256xi1>
    %934 = vector.broadcast %932 : vector<2x1xf32> to vector<2x256xf32>
    %935 = arith.mulf %934, %925 : vector<2x256xf32>
    %cst_207 = arith.constant 0.000000e+00 : f32
    %936 = vector.shape_cast %933 : vector<1x256xi1> to vector<1x256xi1>
    %937 = vector.broadcast %936 : vector<1x256xi1> to vector<2x256xi1>
    %938 = vector.broadcast %cst_207 : f32 to vector<2x256xf32>
    %939 = arith.select %937, %935, %938 : vector<2x256xi1>, vector<2x256xf32>
    %940 = arith.addf %867, %939 : vector<2x256xf32>
    %c239_i32 = arith.constant 239 : i32
    %941 = tpu.dynamic_rotate %307 by %c239_i32 dim 1 : vector<2x256xf32>, i32 -> vector<2x256xf32>
    %c32 = arith.constant 32 : index
    %942 = memref.load %arg3[%c32] : memref<98xf32, #tpu.memory_space<smem>>
    %943 = vector.broadcast %942 : f32 to vector<2x1xf32>
    %944 = arith.mulf %943, %298 : vector<2x1xf32>
    %c81 = arith.constant 81 : index
    %945 = memref.load %arg3[%c81] : memref<98xf32, #tpu.memory_space<smem>>
    %946 = vector.broadcast %945 : f32 to vector<2x1xf32>
    %947 = arith.mulf %946, %300 : vector<2x1xf32>
    %948 = arith.addf %944, %947 : vector<2x1xf32>
    %949 = arith.andi %876, %362 : vector<1x256xi1>
    %950 = vector.broadcast %948 : vector<2x1xf32> to vector<2x256xf32>
    %951 = arith.mulf %950, %941 : vector<2x256xf32>
    %cst_208 = arith.constant 0.000000e+00 : f32
    %952 = vector.shape_cast %949 : vector<1x256xi1> to vector<1x256xi1>
    %953 = vector.broadcast %952 : vector<1x256xi1> to vector<2x256xi1>
    %954 = vector.broadcast %cst_208 : f32 to vector<2x256xf32>
    %955 = arith.select %953, %951, %954 : vector<2x256xi1>, vector<2x256xf32>
    %956 = arith.addf %892, %955 : vector<2x256xf32>
    %c238_i32 = arith.constant 238 : i32
    %957 = tpu.dynamic_rotate %307 by %c238_i32 dim 1 : vector<2x256xf32>, i32 -> vector<2x256xf32>
    %c33 = arith.constant 33 : index
    %958 = memref.load %arg3[%c33] : memref<98xf32, #tpu.memory_space<smem>>
    %959 = vector.broadcast %958 : f32 to vector<2x1xf32>
    %960 = arith.mulf %959, %298 : vector<2x1xf32>
    %c82 = arith.constant 82 : index
    %961 = memref.load %arg3[%c82] : memref<98xf32, #tpu.memory_space<smem>>
    %962 = vector.broadcast %961 : f32 to vector<2x1xf32>
    %963 = arith.mulf %962, %300 : vector<2x1xf32>
    %964 = arith.addf %960, %963 : vector<2x1xf32>
    %965 = arith.andi %876, %371 : vector<1x256xi1>
    %966 = vector.broadcast %964 : vector<2x1xf32> to vector<2x256xf32>
    %967 = arith.mulf %966, %957 : vector<2x256xf32>
    %cst_209 = arith.constant 0.000000e+00 : f32
    %968 = vector.shape_cast %965 : vector<1x256xi1> to vector<1x256xi1>
    %969 = vector.broadcast %968 : vector<1x256xi1> to vector<2x256xi1>
    %970 = vector.broadcast %cst_209 : f32 to vector<2x256xf32>
    %971 = arith.select %969, %967, %970 : vector<2x256xi1>, vector<2x256xf32>
    %972 = arith.addf %908, %971 : vector<2x256xf32>
    %c237_i32 = arith.constant 237 : i32
    %973 = tpu.dynamic_rotate %307 by %c237_i32 dim 1 : vector<2x256xf32>, i32 -> vector<2x256xf32>
    %c34 = arith.constant 34 : index
    %974 = memref.load %arg3[%c34] : memref<98xf32, #tpu.memory_space<smem>>
    %975 = vector.broadcast %974 : f32 to vector<2x1xf32>
    %976 = arith.mulf %975, %298 : vector<2x1xf32>
    %c83 = arith.constant 83 : index
    %977 = memref.load %arg3[%c83] : memref<98xf32, #tpu.memory_space<smem>>
    %978 = vector.broadcast %977 : f32 to vector<2x1xf32>
    %979 = arith.mulf %978, %300 : vector<2x1xf32>
    %980 = arith.addf %976, %979 : vector<2x1xf32>
    %981 = arith.andi %876, %380 : vector<1x256xi1>
    %982 = vector.broadcast %980 : vector<2x1xf32> to vector<2x256xf32>
    %983 = arith.mulf %982, %973 : vector<2x256xf32>
    %cst_210 = arith.constant 0.000000e+00 : f32
    %984 = vector.shape_cast %981 : vector<1x256xi1> to vector<1x256xi1>
    %985 = vector.broadcast %984 : vector<1x256xi1> to vector<2x256xi1>
    %986 = vector.broadcast %cst_210 : f32 to vector<2x256xf32>
    %987 = arith.select %985, %983, %986 : vector<2x256xi1>, vector<2x256xf32>
    %988 = arith.addf %924, %987 : vector<2x256xf32>
    %cst_211 = arith.constant 2.000000e+00 : f32
    %989 = vector.broadcast %cst_211 : f32 to vector<1x256xf32>
    %990 = arith.addf %314, %989 : vector<1x256xf32>
    %cst_212 = arith.constant 0.000000e+00 : f32
    %991 = vector.broadcast %cst_212 : f32 to vector<1x256xf32>
    %992 = arith.cmpf oge, %990, %991 : vector<1x256xf32>
    %cst_213 = arith.constant 2.000000e+00 : f32
    %993 = vector.broadcast %cst_213 : f32 to vector<1x256xf32>
    %994 = arith.addf %314, %993 : vector<1x256xf32>
    %cst_214 = arith.constant 1.500000e+01 : f32
    %995 = vector.broadcast %cst_214 : f32 to vector<1x256xf32>
    %996 = arith.cmpf ole, %994, %995 : vector<1x256xf32>
    %997 = arith.andi %992, %996 : vector<1x256xi1>
    %c227_i32 = arith.constant 227 : i32
    %998 = tpu.dynamic_rotate %307 by %c227_i32 dim 1 : vector<2x256xf32>, i32 -> vector<2x256xf32>
    %c35 = arith.constant 35 : index
    %999 = memref.load %arg3[%c35] : memref<98xf32, #tpu.memory_space<smem>>
    %1000 = vector.broadcast %999 : f32 to vector<2x1xf32>
    %1001 = arith.mulf %1000, %298 : vector<2x1xf32>
    %c84 = arith.constant 84 : index
    %1002 = memref.load %arg3[%c84] : memref<98xf32, #tpu.memory_space<smem>>
    %1003 = vector.broadcast %1002 : f32 to vector<2x1xf32>
    %1004 = arith.mulf %1003, %300 : vector<2x1xf32>
    %1005 = arith.addf %1001, %1004 : vector<2x1xf32>
    %1006 = arith.andi %997, %326 : vector<1x256xi1>
    %1007 = vector.broadcast %1005 : vector<2x1xf32> to vector<2x256xf32>
    %1008 = arith.mulf %1007, %998 : vector<2x256xf32>
    %cst_215 = arith.constant 0.000000e+00 : f32
    %1009 = vector.shape_cast %1006 : vector<1x256xi1> to vector<1x256xi1>
    %1010 = vector.broadcast %1009 : vector<1x256xi1> to vector<2x256xi1>
    %1011 = vector.broadcast %cst_215 : f32 to vector<2x256xf32>
    %1012 = arith.select %1010, %1008, %1011 : vector<2x256xi1>, vector<2x256xf32>
    %1013 = arith.addf %940, %1012 : vector<2x256xf32>
    %c226_i32 = arith.constant 226 : i32
    %1014 = tpu.dynamic_rotate %307 by %c226_i32 dim 1 : vector<2x256xf32>, i32 -> vector<2x256xf32>
    %c36 = arith.constant 36 : index
    %1015 = memref.load %arg3[%c36] : memref<98xf32, #tpu.memory_space<smem>>
    %1016 = vector.broadcast %1015 : f32 to vector<2x1xf32>
    %1017 = arith.mulf %1016, %298 : vector<2x1xf32>
    %c85 = arith.constant 85 : index
    %1018 = memref.load %arg3[%c85] : memref<98xf32, #tpu.memory_space<smem>>
    %1019 = vector.broadcast %1018 : f32 to vector<2x1xf32>
    %1020 = arith.mulf %1019, %300 : vector<2x1xf32>
    %1021 = arith.addf %1017, %1020 : vector<2x1xf32>
    %1022 = arith.andi %997, %335 : vector<1x256xi1>
    %1023 = vector.broadcast %1021 : vector<2x1xf32> to vector<2x256xf32>
    %1024 = arith.mulf %1023, %1014 : vector<2x256xf32>
    %cst_216 = arith.constant 0.000000e+00 : f32
    %1025 = vector.shape_cast %1022 : vector<1x256xi1> to vector<1x256xi1>
    %1026 = vector.broadcast %1025 : vector<1x256xi1> to vector<2x256xi1>
    %1027 = vector.broadcast %cst_216 : f32 to vector<2x256xf32>
    %1028 = arith.select %1026, %1024, %1027 : vector<2x256xi1>, vector<2x256xf32>
    %1029 = arith.addf %956, %1028 : vector<2x256xf32>
    %c225_i32 = arith.constant 225 : i32
    %1030 = tpu.dynamic_rotate %307 by %c225_i32 dim 1 : vector<2x256xf32>, i32 -> vector<2x256xf32>
    %c37 = arith.constant 37 : index
    %1031 = memref.load %arg3[%c37] : memref<98xf32, #tpu.memory_space<smem>>
    %1032 = vector.broadcast %1031 : f32 to vector<2x1xf32>
    %1033 = arith.mulf %1032, %298 : vector<2x1xf32>
    %c86 = arith.constant 86 : index
    %1034 = memref.load %arg3[%c86] : memref<98xf32, #tpu.memory_space<smem>>
    %1035 = vector.broadcast %1034 : f32 to vector<2x1xf32>
    %1036 = arith.mulf %1035, %300 : vector<2x1xf32>
    %1037 = arith.addf %1033, %1036 : vector<2x1xf32>
    %1038 = arith.andi %997, %344 : vector<1x256xi1>
    %1039 = vector.broadcast %1037 : vector<2x1xf32> to vector<2x256xf32>
    %1040 = arith.mulf %1039, %1030 : vector<2x256xf32>
    %cst_217 = arith.constant 0.000000e+00 : f32
    %1041 = vector.shape_cast %1038 : vector<1x256xi1> to vector<1x256xi1>
    %1042 = vector.broadcast %1041 : vector<1x256xi1> to vector<2x256xi1>
    %1043 = vector.broadcast %cst_217 : f32 to vector<2x256xf32>
    %1044 = arith.select %1042, %1040, %1043 : vector<2x256xi1>, vector<2x256xf32>
    %1045 = arith.addf %972, %1044 : vector<2x256xf32>
    %c224_i32 = arith.constant 224 : i32
    %1046 = tpu.dynamic_rotate %307 by %c224_i32 dim 1 : vector<2x256xf32>, i32 -> vector<2x256xf32>
    %c38 = arith.constant 38 : index
    %1047 = memref.load %arg3[%c38] : memref<98xf32, #tpu.memory_space<smem>>
    %1048 = vector.broadcast %1047 : f32 to vector<2x1xf32>
    %1049 = arith.mulf %1048, %298 : vector<2x1xf32>
    %c87 = arith.constant 87 : index
    %1050 = memref.load %arg3[%c87] : memref<98xf32, #tpu.memory_space<smem>>
    %1051 = vector.broadcast %1050 : f32 to vector<2x1xf32>
    %1052 = arith.mulf %1051, %300 : vector<2x1xf32>
    %1053 = arith.addf %1049, %1052 : vector<2x1xf32>
    %1054 = arith.andi %997, %353 : vector<1x256xi1>
    %1055 = vector.broadcast %1053 : vector<2x1xf32> to vector<2x256xf32>
    %1056 = arith.mulf %1055, %1046 : vector<2x256xf32>
    %cst_218 = arith.constant 0.000000e+00 : f32
    %1057 = vector.shape_cast %1054 : vector<1x256xi1> to vector<1x256xi1>
    %1058 = vector.broadcast %1057 : vector<1x256xi1> to vector<2x256xi1>
    %1059 = vector.broadcast %cst_218 : f32 to vector<2x256xf32>
    %1060 = arith.select %1058, %1056, %1059 : vector<2x256xi1>, vector<2x256xf32>
    %1061 = arith.addf %988, %1060 : vector<2x256xf32>
    %c223_i32 = arith.constant 223 : i32
    %1062 = tpu.dynamic_rotate %307 by %c223_i32 dim 1 : vector<2x256xf32>, i32 -> vector<2x256xf32>
    %c39 = arith.constant 39 : index
    %1063 = memref.load %arg3[%c39] : memref<98xf32, #tpu.memory_space<smem>>
    %1064 = vector.broadcast %1063 : f32 to vector<2x1xf32>
    %1065 = arith.mulf %1064, %298 : vector<2x1xf32>
    %c88 = arith.constant 88 : index
    %1066 = memref.load %arg3[%c88] : memref<98xf32, #tpu.memory_space<smem>>
    %1067 = vector.broadcast %1066 : f32 to vector<2x1xf32>
    %1068 = arith.mulf %1067, %300 : vector<2x1xf32>
    %1069 = arith.addf %1065, %1068 : vector<2x1xf32>
    %1070 = arith.andi %997, %362 : vector<1x256xi1>
    %1071 = vector.broadcast %1069 : vector<2x1xf32> to vector<2x256xf32>
    %1072 = arith.mulf %1071, %1062 : vector<2x256xf32>
    %cst_219 = arith.constant 0.000000e+00 : f32
    %1073 = vector.shape_cast %1070 : vector<1x256xi1> to vector<1x256xi1>
    %1074 = vector.broadcast %1073 : vector<1x256xi1> to vector<2x256xi1>
    %1075 = vector.broadcast %cst_219 : f32 to vector<2x256xf32>
    %1076 = arith.select %1074, %1072, %1075 : vector<2x256xi1>, vector<2x256xf32>
    %1077 = arith.addf %1013, %1076 : vector<2x256xf32>
    %c222_i32 = arith.constant 222 : i32
    %1078 = tpu.dynamic_rotate %307 by %c222_i32 dim 1 : vector<2x256xf32>, i32 -> vector<2x256xf32>
    %c40 = arith.constant 40 : index
    %1079 = memref.load %arg3[%c40] : memref<98xf32, #tpu.memory_space<smem>>
    %1080 = vector.broadcast %1079 : f32 to vector<2x1xf32>
    %1081 = arith.mulf %1080, %298 : vector<2x1xf32>
    %c89 = arith.constant 89 : index
    %1082 = memref.load %arg3[%c89] : memref<98xf32, #tpu.memory_space<smem>>
    %1083 = vector.broadcast %1082 : f32 to vector<2x1xf32>
    %1084 = arith.mulf %1083, %300 : vector<2x1xf32>
    %1085 = arith.addf %1081, %1084 : vector<2x1xf32>
    %1086 = arith.andi %997, %371 : vector<1x256xi1>
    %1087 = vector.broadcast %1085 : vector<2x1xf32> to vector<2x256xf32>
    %1088 = arith.mulf %1087, %1078 : vector<2x256xf32>
    %cst_220 = arith.constant 0.000000e+00 : f32
    %1089 = vector.shape_cast %1086 : vector<1x256xi1> to vector<1x256xi1>
    %1090 = vector.broadcast %1089 : vector<1x256xi1> to vector<2x256xi1>
    %1091 = vector.broadcast %cst_220 : f32 to vector<2x256xf32>
    %1092 = arith.select %1090, %1088, %1091 : vector<2x256xi1>, vector<2x256xf32>
    %1093 = arith.addf %1029, %1092 : vector<2x256xf32>
    %c221_i32 = arith.constant 221 : i32
    %1094 = tpu.dynamic_rotate %307 by %c221_i32 dim 1 : vector<2x256xf32>, i32 -> vector<2x256xf32>
    %c41 = arith.constant 41 : index
    %1095 = memref.load %arg3[%c41] : memref<98xf32, #tpu.memory_space<smem>>
    %1096 = vector.broadcast %1095 : f32 to vector<2x1xf32>
    %1097 = arith.mulf %1096, %298 : vector<2x1xf32>
    %c90 = arith.constant 90 : index
    %1098 = memref.load %arg3[%c90] : memref<98xf32, #tpu.memory_space<smem>>
    %1099 = vector.broadcast %1098 : f32 to vector<2x1xf32>
    %1100 = arith.mulf %1099, %300 : vector<2x1xf32>
    %1101 = arith.addf %1097, %1100 : vector<2x1xf32>
    %1102 = arith.andi %997, %380 : vector<1x256xi1>
    %1103 = vector.broadcast %1101 : vector<2x1xf32> to vector<2x256xf32>
    %1104 = arith.mulf %1103, %1094 : vector<2x256xf32>
    %cst_221 = arith.constant 0.000000e+00 : f32
    %1105 = vector.shape_cast %1102 : vector<1x256xi1> to vector<1x256xi1>
    %1106 = vector.broadcast %1105 : vector<1x256xi1> to vector<2x256xi1>
    %1107 = vector.broadcast %cst_221 : f32 to vector<2x256xf32>
    %1108 = arith.select %1106, %1104, %1107 : vector<2x256xi1>, vector<2x256xf32>
    %1109 = arith.addf %1045, %1108 : vector<2x256xf32>
    %cst_222 = arith.constant 3.000000e+00 : f32
    %1110 = vector.broadcast %cst_222 : f32 to vector<1x256xf32>
    %1111 = arith.addf %314, %1110 : vector<1x256xf32>
    %cst_223 = arith.constant 0.000000e+00 : f32
    %1112 = vector.broadcast %cst_223 : f32 to vector<1x256xf32>
    %1113 = arith.cmpf oge, %1111, %1112 : vector<1x256xf32>
    %cst_224 = arith.constant 3.000000e+00 : f32
    %1114 = vector.broadcast %cst_224 : f32 to vector<1x256xf32>
    %1115 = arith.addf %314, %1114 : vector<1x256xf32>
    %cst_225 = arith.constant 1.500000e+01 : f32
    %1116 = vector.broadcast %cst_225 : f32 to vector<1x256xf32>
    %1117 = arith.cmpf ole, %1115, %1116 : vector<1x256xf32>
    %1118 = arith.andi %1113, %1117 : vector<1x256xi1>
    %c211_i32 = arith.constant 211 : i32
    %1119 = tpu.dynamic_rotate %307 by %c211_i32 dim 1 : vector<2x256xf32>, i32 -> vector<2x256xf32>
    %c42 = arith.constant 42 : index
    %1120 = memref.load %arg3[%c42] : memref<98xf32, #tpu.memory_space<smem>>
    %1121 = vector.broadcast %1120 : f32 to vector<2x1xf32>
    %1122 = arith.mulf %1121, %298 : vector<2x1xf32>
    %c91 = arith.constant 91 : index
    %1123 = memref.load %arg3[%c91] : memref<98xf32, #tpu.memory_space<smem>>
    %1124 = vector.broadcast %1123 : f32 to vector<2x1xf32>
    %1125 = arith.mulf %1124, %300 : vector<2x1xf32>
    %1126 = arith.addf %1122, %1125 : vector<2x1xf32>
    %1127 = arith.andi %1118, %326 : vector<1x256xi1>
    %1128 = vector.broadcast %1126 : vector<2x1xf32> to vector<2x256xf32>
    %1129 = arith.mulf %1128, %1119 : vector<2x256xf32>
    %cst_226 = arith.constant 0.000000e+00 : f32
    %1130 = vector.shape_cast %1127 : vector<1x256xi1> to vector<1x256xi1>
    %1131 = vector.broadcast %1130 : vector<1x256xi1> to vector<2x256xi1>
    %1132 = vector.broadcast %cst_226 : f32 to vector<2x256xf32>
    %1133 = arith.select %1131, %1129, %1132 : vector<2x256xi1>, vector<2x256xf32>
    %1134 = arith.addf %1061, %1133 : vector<2x256xf32>
    %c210_i32 = arith.constant 210 : i32
    %1135 = tpu.dynamic_rotate %307 by %c210_i32 dim 1 : vector<2x256xf32>, i32 -> vector<2x256xf32>
    %c43 = arith.constant 43 : index
    %1136 = memref.load %arg3[%c43] : memref<98xf32, #tpu.memory_space<smem>>
    %1137 = vector.broadcast %1136 : f32 to vector<2x1xf32>
    %1138 = arith.mulf %1137, %298 : vector<2x1xf32>
    %c92 = arith.constant 92 : index
    %1139 = memref.load %arg3[%c92] : memref<98xf32, #tpu.memory_space<smem>>
    %1140 = vector.broadcast %1139 : f32 to vector<2x1xf32>
    %1141 = arith.mulf %1140, %300 : vector<2x1xf32>
    %1142 = arith.addf %1138, %1141 : vector<2x1xf32>
    %1143 = arith.andi %1118, %335 : vector<1x256xi1>
    %1144 = vector.broadcast %1142 : vector<2x1xf32> to vector<2x256xf32>
    %1145 = arith.mulf %1144, %1135 : vector<2x256xf32>
    %cst_227 = arith.constant 0.000000e+00 : f32
    %1146 = vector.shape_cast %1143 : vector<1x256xi1> to vector<1x256xi1>
    %1147 = vector.broadcast %1146 : vector<1x256xi1> to vector<2x256xi1>
    %1148 = vector.broadcast %cst_227 : f32 to vector<2x256xf32>
    %1149 = arith.select %1147, %1145, %1148 : vector<2x256xi1>, vector<2x256xf32>
    %1150 = arith.addf %1077, %1149 : vector<2x256xf32>
    %c209_i32 = arith.constant 209 : i32
    %1151 = tpu.dynamic_rotate %307 by %c209_i32 dim 1 : vector<2x256xf32>, i32 -> vector<2x256xf32>
    %c44 = arith.constant 44 : index
    %1152 = memref.load %arg3[%c44] : memref<98xf32, #tpu.memory_space<smem>>
    %1153 = vector.broadcast %1152 : f32 to vector<2x1xf32>
    %1154 = arith.mulf %1153, %298 : vector<2x1xf32>
    %c93 = arith.constant 93 : index
    %1155 = memref.load %arg3[%c93] : memref<98xf32, #tpu.memory_space<smem>>
    %1156 = vector.broadcast %1155 : f32 to vector<2x1xf32>
    %1157 = arith.mulf %1156, %300 : vector<2x1xf32>
    %1158 = arith.addf %1154, %1157 : vector<2x1xf32>
    %1159 = arith.andi %1118, %344 : vector<1x256xi1>
    %1160 = vector.broadcast %1158 : vector<2x1xf32> to vector<2x256xf32>
    %1161 = arith.mulf %1160, %1151 : vector<2x256xf32>
    %cst_228 = arith.constant 0.000000e+00 : f32
    %1162 = vector.shape_cast %1159 : vector<1x256xi1> to vector<1x256xi1>
    %1163 = vector.broadcast %1162 : vector<1x256xi1> to vector<2x256xi1>
    %1164 = vector.broadcast %cst_228 : f32 to vector<2x256xf32>
    %1165 = arith.select %1163, %1161, %1164 : vector<2x256xi1>, vector<2x256xf32>
    %1166 = arith.addf %1093, %1165 : vector<2x256xf32>
    %c208_i32 = arith.constant 208 : i32
    %1167 = tpu.dynamic_rotate %307 by %c208_i32 dim 1 : vector<2x256xf32>, i32 -> vector<2x256xf32>
    %c45 = arith.constant 45 : index
    %1168 = memref.load %arg3[%c45] : memref<98xf32, #tpu.memory_space<smem>>
    %1169 = vector.broadcast %1168 : f32 to vector<2x1xf32>
    %1170 = arith.mulf %1169, %298 : vector<2x1xf32>
    %c94 = arith.constant 94 : index
    %1171 = memref.load %arg3[%c94] : memref<98xf32, #tpu.memory_space<smem>>
    %1172 = vector.broadcast %1171 : f32 to vector<2x1xf32>
    %1173 = arith.mulf %1172, %300 : vector<2x1xf32>
    %1174 = arith.addf %1170, %1173 : vector<2x1xf32>
    %1175 = arith.andi %1118, %353 : vector<1x256xi1>
    %1176 = vector.broadcast %1174 : vector<2x1xf32> to vector<2x256xf32>
    %1177 = arith.mulf %1176, %1167 : vector<2x256xf32>
    %cst_229 = arith.constant 0.000000e+00 : f32
    %1178 = vector.shape_cast %1175 : vector<1x256xi1> to vector<1x256xi1>
    %1179 = vector.broadcast %1178 : vector<1x256xi1> to vector<2x256xi1>
    %1180 = vector.broadcast %cst_229 : f32 to vector<2x256xf32>
    %1181 = arith.select %1179, %1177, %1180 : vector<2x256xi1>, vector<2x256xf32>
    %1182 = arith.addf %1109, %1181 : vector<2x256xf32>
    %c207_i32 = arith.constant 207 : i32
    %1183 = tpu.dynamic_rotate %307 by %c207_i32 dim 1 : vector<2x256xf32>, i32 -> vector<2x256xf32>
    %c46 = arith.constant 46 : index
    %1184 = memref.load %arg3[%c46] : memref<98xf32, #tpu.memory_space<smem>>
    %1185 = vector.broadcast %1184 : f32 to vector<2x1xf32>
    %1186 = arith.mulf %1185, %298 : vector<2x1xf32>
    %c95 = arith.constant 95 : index
    %1187 = memref.load %arg3[%c95] : memref<98xf32, #tpu.memory_space<smem>>
    %1188 = vector.broadcast %1187 : f32 to vector<2x1xf32>
    %1189 = arith.mulf %1188, %300 : vector<2x1xf32>
    %1190 = arith.addf %1186, %1189 : vector<2x1xf32>
    %1191 = arith.andi %1118, %362 : vector<1x256xi1>
    %1192 = vector.broadcast %1190 : vector<2x1xf32> to vector<2x256xf32>
    %1193 = arith.mulf %1192, %1183 : vector<2x256xf32>
    %cst_230 = arith.constant 0.000000e+00 : f32
    %1194 = vector.shape_cast %1191 : vector<1x256xi1> to vector<1x256xi1>
    %1195 = vector.broadcast %1194 : vector<1x256xi1> to vector<2x256xi1>
    %1196 = vector.broadcast %cst_230 : f32 to vector<2x256xf32>
    %1197 = arith.select %1195, %1193, %1196 : vector<2x256xi1>, vector<2x256xf32>
    %1198 = arith.addf %1134, %1197 : vector<2x256xf32>
    %c206_i32 = arith.constant 206 : i32
    %1199 = tpu.dynamic_rotate %307 by %c206_i32 dim 1 : vector<2x256xf32>, i32 -> vector<2x256xf32>
    %c47 = arith.constant 47 : index
    %1200 = memref.load %arg3[%c47] : memref<98xf32, #tpu.memory_space<smem>>
    %1201 = vector.broadcast %1200 : f32 to vector<2x1xf32>
    %1202 = arith.mulf %1201, %298 : vector<2x1xf32>
    %c96 = arith.constant 96 : index
    %1203 = memref.load %arg3[%c96] : memref<98xf32, #tpu.memory_space<smem>>
    %1204 = vector.broadcast %1203 : f32 to vector<2x1xf32>
    %1205 = arith.mulf %1204, %300 : vector<2x1xf32>
    %1206 = arith.addf %1202, %1205 : vector<2x1xf32>
    %1207 = arith.andi %1118, %371 : vector<1x256xi1>
    %1208 = vector.broadcast %1206 : vector<2x1xf32> to vector<2x256xf32>
    %1209 = arith.mulf %1208, %1199 : vector<2x256xf32>
    %cst_231 = arith.constant 0.000000e+00 : f32
    %1210 = vector.shape_cast %1207 : vector<1x256xi1> to vector<1x256xi1>
    %1211 = vector.broadcast %1210 : vector<1x256xi1> to vector<2x256xi1>
    %1212 = vector.broadcast %cst_231 : f32 to vector<2x256xf32>
    %1213 = arith.select %1211, %1209, %1212 : vector<2x256xi1>, vector<2x256xf32>
    %1214 = arith.addf %1150, %1213 : vector<2x256xf32>
    %c205_i32 = arith.constant 205 : i32
    %1215 = tpu.dynamic_rotate %307 by %c205_i32 dim 1 : vector<2x256xf32>, i32 -> vector<2x256xf32>
    %c48 = arith.constant 48 : index
    %1216 = memref.load %arg3[%c48] : memref<98xf32, #tpu.memory_space<smem>>
    %1217 = vector.broadcast %1216 : f32 to vector<2x1xf32>
    %1218 = arith.mulf %1217, %298 : vector<2x1xf32>
    %c97 = arith.constant 97 : index
    %1219 = memref.load %arg3[%c97] : memref<98xf32, #tpu.memory_space<smem>>
    %1220 = vector.broadcast %1219 : f32 to vector<2x1xf32>
    %1221 = arith.mulf %1220, %300 : vector<2x1xf32>
    %1222 = arith.addf %1218, %1221 : vector<2x1xf32>
    %1223 = arith.andi %1118, %380 : vector<1x256xi1>
    %1224 = vector.broadcast %1222 : vector<2x1xf32> to vector<2x256xf32>
    %1225 = arith.mulf %1224, %1215 : vector<2x256xf32>
    %cst_232 = arith.constant 0.000000e+00 : f32
    %1226 = vector.shape_cast %1223 : vector<1x256xi1> to vector<1x256xi1>
    %1227 = vector.broadcast %1226 : vector<1x256xi1> to vector<2x256xi1>
    %1228 = vector.broadcast %cst_232 : f32 to vector<2x256xf32>
    %1229 = arith.select %1227, %1225, %1228 : vector<2x256xi1>, vector<2x256xf32>
    %1230 = arith.addf %1166, %1229 : vector<2x256xf32>
    %1231 = arith.addf %1230, %1182 : vector<2x256xf32>
    %1232 = arith.addf %1198, %1214 : vector<2x256xf32>
    %1233 = arith.addf %1231, %1232 : vector<2x256xf32>
    %cst_233 = arith.constant dense<0.000000e+00> : vector<256xf32>
    %1234 = vector.multi_reduction <add>, %1233, %cst_233 [0] : vector<2x256xf32> to vector<256xf32>
    %1235 = vector.shape_cast %1234 : vector<256xf32> to vector<1x256xf32>
    %c0_234 = arith.constant 0 : index
    %1236 = memref.load %arg4[%c0_234] : memref<1xf32, #tpu.memory_space<smem>>
    %1237 = vector.broadcast %1236 : f32 to vector<1x256xf32>
    %1238 = arith.addf %1235, %1237 : vector<1x256xf32>
    %1239 = arith.negf %1238 : vector<1x256xf32>
    %1240 = math.exp %1239 : vector<1x256xf32>
    %cst_235 = arith.constant 1.000000e+00 : f32
    %1241 = vector.broadcast %cst_235 : f32 to vector<1x256xf32>
    %1242 = arith.addf %1241, %1240 : vector<1x256xf32>
    %1243 = arith.divf %1241, %1242 : vector<1x256xf32>
    %c0_236 = arith.constant 0 : index
    %c0_237 = arith.constant 0 : index
    %c0_238 = arith.constant 0 : index
    %1244 = vector.load %arg5[%c0_236, %c0_237, %c0_238] : memref<1x8x256xf32, #tpu.memory_space<vmem>>, vector<1x8x256xf32>
    %1245 = vector.shape_cast %1244 : vector<1x8x256xf32> to vector<8x256xf32>
    %1246 = vector.broadcast %1243 : vector<1x256xf32> to vector<8x256xf32>
    %1247 = arith.mulf %1245, %1246 : vector<8x256xf32>
    %c0_239 = arith.constant 0 : index
    %c0_240 = arith.constant 0 : index
    %c0_241 = arith.constant 0 : index
    %1248 = vector.load %arg5[%c0_239, %c0_240, %c0_241] : memref<1x8x256xf32, #tpu.memory_space<vmem>>, vector<1x8x256xf32>
    %1249 = vector.shape_cast %1248 : vector<1x8x256xf32> to vector<8x256xf32>
    %1250 = vector.shape_cast %1247 : vector<8x256xf32> to vector<1x8x256xf32>
    tpu.vector_store %arg5[%c0_239, %c0_240, %c0_241], %1250 {strides = array<i32>} : memref<1x8x256xf32, #tpu.memory_space<vmem>>, vector<1x8x256xf32>,
    return
  }
  func.func @transform_0(%arg0: i32) -> (i32, i32, i32) {
    %c0_i32 = arith.constant 0 : i32
    %c0_i32_0 = arith.constant 0 : i32
    %c0_i32_1 = arith.constant 0 : i32
    return %arg0, %c0_i32, %c0_i32_0 : i32, i32, i32
  }
  func.func @transform_1(%arg0: i32) -> i32 {
    %c0_i32 = arith.constant 0 : i32
    %c0_i32_0 = arith.constant 0 : i32
    return %c0_i32 : i32
  }
  func.func @transform_2(%arg0: i32) -> i32 {
    %c0_i32 = arith.constant 0 : i32
    %c0_i32_0 = arith.constant 0 : i32
    return %c0_i32 : i32
  }
  func.func @transform_3(%arg0: i32) -> i32 {
    %c0_i32 = arith.constant 0 : i32
    %c0_i32_0 = arith.constant 0 : i32
    return %c0_i32 : i32
  }
  func.func @transform_4(%arg0: i32) -> (i32, i32, i32) {
    %c0_i32 = arith.constant 0 : i32
    %c0_i32_0 = arith.constant 0 : i32
    %c0_i32_1 = arith.constant 0 : i32
    return %arg0, %c0_i32, %c0_i32_0 : i32, i32, i32
  }
}

</mosaic_0001>

<bundles_post_ra>
// kernel: tpu_custom_call.1
= control target key start
LH: loop header
LB: loop body
LE: loop exit
PB: predicated region body
PF: predicated region fallthrough
CT: control target
= control target key end

     0   :  { %s5240_s0 = inlined_call_operand.hbm [shape: f32[2,8,256], index: 0, kind: input, shape index: {}]   ;;  %s5241_s1 = inlined_call_operand.vmem [shape: f32[18], index: 1, kind: input, shape index: {}]   ;;  %s5242_s2 = inlined_call_operand.vmem [shape: f32[98], index: 2, kind: input, shape index: {}]   ;;  %s5243_s3 = inlined_call_operand.<no memory space> [shape: f32[1], index: 3, kind: input, shape index: {}]   ;;  %s5244_s4 = inlined_call_operand.hbm [shape: f32[2,8,256], index: 4, kind: output, shape index: {}]  }
   0x1   :  { %5338 = sst [smem:[#allocation37_spill]] %s5240_s0 }
   0x2   :  { %5339 = sst [smem:[#allocation38_spill]] %s5241_s1 }
   0x3   :  { %9 = sst [smem:[#allocation2]] %s5243_s3 }
   0x4   :  { %10 = vsyncpa [#allocation4], 0 }
   0x5   :  { %12 = vsyncpa [#allocation4 + $0x1], 0 }
   0x6   :  { %13 = vsyncpa [#allocation6], 0 }
   0x7   :  { %14 = vsyncpa [#allocation9], 0 }
   0x8   :  { %15 = vsyncpa [#allocation5], 0 }
   0x9   :  { %17 = vsyncpa [#allocation5 + $0x1], 0  ;;  %s2476_s17 = smov 0   ;;  %s2478_s18 = smov 0  }
   0xa   :  { %s2480_s19 = smov 0   ;;  %s2482_s20 = smov 0  }
   0xb LB: > { %s2497_s3 = sadd.s32 4294967295, %s2392_s20   ;;  %s1985_s21 = sadd.s32 4294967294, %s2392_s20   ;;  %s2392_s20 = sphi %s2482_s20, %s5712_s20   ;;  %s2388_s19 = sphi %s2480_s19, %s5711_s19   ;;  %s2384_s18 = sphi %s2478_s18, %s5710_s18   ;;  %s2380_s17 = sphi %s2476_s17, %s5709_s17  }
   0xc   : > { %p43_p0 = scmp.ne.s32.totalorder %s2384_s18, %s2380_s17  ;;  %p5245_p1 = scmp.eq.s32.totalorder %s2497_s3, 0 }
   0xd   : > { %p136_p3 = scmp.eq.s32.totalorder %s1985_s21, 1  ;;  %p1986_p5 = scmp.ge.s32.totalorder %s2392_s20, 1 }
   0xe   : > { %p2506_p4 = por %p5245_p1, %p43_p0  ;;  %p143_p7 = scmp.lt.s32.totalorder %s2392_s20, 3 }
   0xf   : > { %p2511_p6 = por %p136_p3, %p43_p0  ;;  %s5342_s1 = sld [smem:[#allocation38_spill]] }
  0x10   : > { %s5340_s22 = scalar_select %p2506_p4, 1, 0 }
  0x11   : > { %s5341_s23 = scalar_select %p2511_p6, 1, 0 }
  0x12   : > { %p2519_p8 = pnand %p1986_p5, %p143_p7  ;;  %s167_s30 = sshll.u32 %s5242_s2, 4  ;;  %s168_s30 = int_to_ptr.vmem [resolvable:$true] %s167_s30 }
  0x13   : > { %s2536_s6 = sadd.s32 1, %s2392_s20  }
  0x14   : > { %s5343_s27 = scalar_select %p2519_p8, 1, 0 }
  0x15   : > { %s156_s26 = sshll.u32 %s5342_s1, 4  ;;  %p2136_p10 = pneg %p2519_p8  ;;  %s157_s26 = int_to_ptr.vmem [resolvable:$true] %s156_s26 }
  0x16   : > { %s27_s7 = ssub.s32 %s2392_s20, %s2536_s6  ;;  %s2258_s8 = scalar_lea.vmem %s157_s26, 16 }
  0x17   : > { %p2531_p11 = pnand %p2136_p10, %p5245_p1  ;;  %p2259_p12 = scmp.ne.s32.totalorder %s157_s26, %s2258_s8 }
  0x18   : > { %p2266_p5 = scmp.lt.s32.totalorder %s157_s26, %s157_s26  ;;  %p2267_p7 = scmp.lt.s32.totalorder %s2258_s8, %s2258_s8 }
  0x19   : > { %p2260_p13 = pneg %p2531_p11 }
  0x1a   : > { %p2268_p9 = por %p2267_p7, %p2266_p5 }
  0x1b   : > { %p2261_p0 = pnand %p2260_p13, %p2259_p12 }
  0x1d   : > { %p2262_p3 = pneg %p2261_p0 }
  0x1f   : > { %p2269_p2 = pnand %p2268_p9, %p2262_p3 }
  0x21   : > { %2272 = shalt.err (!%p2269_p2)
}
  0x22   : > { %s2394_s9 = smov [#allocation7]   ;;  %s2273_s10 = scalar_lea.vmem %s168_s30, 16 }
  0x23   : > { %2139 = dma.vmem_to_smem (!%p2531_p11), %s157_s26, 16, %s2394_s9, [#allocation6]  }
  0x24   : > { %p2274_p10 = scmp.ne.s32.totalorder %s168_s30, %s2273_s10  ;;  %p2281_p4 = scmp.lt.s32.totalorder %s168_s30, %s168_s30 }
  0x25   : > { %p2282_p8 = scmp.lt.s32.totalorder %s2273_s10, %s2273_s10 }
  0x26   : > { %p2276_p1 = pnand %p2274_p10, %p2260_p13 }
  0x27   : > { %p2283_p12 = por %p2282_p8, %p2281_p4 }
  0x28   : > { %p2277_p6 = pneg %p2276_p1 }
  0x2a   : > { %p2284_p0 = pnand %p2283_p12, %p2277_p6 }
  0x2c   : > { %2287 = shalt.err (!%p2284_p0)
}
  0x2d   : > { %s2395_s11 = smov [#allocation8]   ;;  %p28_p2 = scmp.eq.s32.totalorder %s27_s7, 0 }
  0x2e   : > { %2142 = dma.vmem_to_smem (!%p2531_p11), %s168_s30, 16, %s2395_s11, [#allocation9]  }
  0x2f   : > { %s30_s12 = sadd.s32 1, %s2388_s19  ;;  %p37_p1 = scmp.ne.s32.totalorder %s2388_s19, %s2384_s18 }
  0x30   : > { %p38_p9 = scmp.eq.s32.totalorder %s2392_s20, 0  ;;  %p5345_p6 = scmp.eq.s32.totalorder %s2497_s3, 1 }
  0x31   : > { %s2551_s13 = scalar_select %p28_p2, %s2388_s19, %s30_s12  }
  0x32   : > { %p39_p4 = por %p38_p9, %p37_p1  ;;  %p2555_p8 = por %p5345_p6, %p37_p1 }
  0x33   : > { %p2153_p13 = scmp.lt.s32.totalorder %s2392_s20, 2  ;;  %s181_s15 = sand.u32 1, %s2388_s19  }
  0x34   : > { %s1990_s16 = sshll.u32 %s181_s15, 4  ;;  %s2122_s21 = sshll.u32 %s2392_s20, 8 }
  0x35   : > { %s5347_s0 = sld [smem:[#allocation37_spill]]  ;;  %s185_s28 = scalar_lea.vmem [#allocation3], %s1990_s16 }
  0x36   : > { %s193_s29 = sshll.u32 %s185_s28, 4  ;;  %p2569_p11 = pnand %p2153_p13, %p39_p4  ;;  %s2567_s29 = int_to_ptr.vmem [resolvable:$true] %s193_s29 }
  0x37   : > { %s182_s5 = scalar_lea.sflag [#allocation4], %s181_s15 }
  0x38   : > { %p2290_p5 = pneg %p2569_p11 }
  0x3b   : > { %s2565_s26 = scalar_lea.hbm %s5347_s0, %s2122_s21  ;;  %s2293_s10 = scalar_lea.hbm %s5347_s0, 512 }
  0x3c   : > { %s2288_s7 = scalar_lea.hbm %s2565_s26, 256  ;;  %p2294_p12 = scmp.lt.u32.totalorder %s2565_s26, %s5347_s0 }
  0x3d   : > { %p2289_p3 = scmp.ne.s32.totalorder %s2565_s26, %s2288_s7  ;;  %p2295_p0 = scmp.lt.u32.totalorder %s2293_s10, %s2288_s7 }
  0x3e   : > { %p2297_p1 = scmp.lt.u32.totalorder %s2288_s7, %s2565_s26 }
  0x3f   : > { %p2291_p7 = pnand %p2290_p5, %p2289_p3  ;;  %p2296_p2 = por %p2295_p0, %p2294_p12 }
  0x41   : > { %p2292_p10 = pneg %p2291_p7  ;;  %p2298_p9 = por %p2297_p1, %p2296_p2 }
  0x43   : > { %p2299_p4 = pnand %p2298_p9, %p2292_p10 }
  0x45   : > { %2302 = shalt.err (!%p2299_p4)
}
  0x46   : > { %s2303_s15 = scalar_lea.vmem %s2567_s29, 256  ;;  %s2396_s16 = smov [#allocation3]  }
  0x47   : > { %p2304_p6 = scmp.ne.s32.totalorder %s2567_s29, %s2303_s15  ;;  %s2308_s21 = sshll.u32 %s2396_s16, 4  ;;  %s2309_s21 = int_to_ptr.vmem [resolvable:$false] %s2308_s21 }
  0x48   : > { %s2310_s24 = scalar_lea.vmem %s2309_s21, 512  ;;  %p2311_p7 = scmp.lt.s32.totalorder %s2567_s29, %s2309_s21 }
  0x49   : > { %p2306_p13 = pnand %p2304_p6, %p2290_p5  ;;  %p2312_p12 = scmp.lt.s32.totalorder %s2310_s24, %s2303_s15 }
  0x4b   : > { %p2307_p3 = pneg %p2306_p13  ;;  %p2313_p0 = por %p2312_p12, %p2311_p7 }
  0x4d   : > { %p2314_p2 = pnand %p2313_p0, %p2307_p3 }
  0x4f   : > { %2317 = shalt.err (!%p2314_p2)
}
  0x50   : > { %2146 = dma.hbm_to_vmem [thread:$0]  (!%p2569_p11), %s2565_s26, 256, %s2567_s29, %s182_s5  }
  0x51   : > { %p5349_p10 = scmp.ne.s32.totalorder %s5343_s27, 0 }
  0x53   : > { %202 = sbr.rel (%p5349_p10) target bundleno = 915 (0x393), region = 36 }
  0x5a   : > { %s2601_s25 = sand.u32 1, %s2384_s18   ;;  %p5350_p5 = scmp.ne.s32.totalorder %s5340_s22, 0 }
  0x5b   : > { %s5248_s28 = sshll.u32 %s2601_s25, 4  ;;  %s205_s7 = scalar_lea.sflag [#allocation4], %s2601_s25 }
  0x5c   : > { %s208_s8 = scalar_lea.vmem [#allocation3], %s5248_s28 }
  0x5d   : > { %2363 = dma.done.wait (%p5350_p5), %s205_s7, 256  }
  0x5e   : > { %2365 = vsyncadd (%p5350_p5), %s205_s7, 4294967040  ;;  %p5351_p11 = scmp.eq.s32.totalorder %s2497_s3, 0 }
  0x60   : > { %2367 = dma.done.wait (%p5351_p11), [#allocation6], 16   ;;  %p5352_p1 = pmov %p5351_p11 }
  0x62   : > { %2369 = vsyncadd (%p5352_p1), [#allocation6], 4294967280  ;;  %p5353_p9 = pmov %p5352_p1 }
  0x63   : > { %p5354_p4 = pmov %p5352_p1 }
  0x64   : > { %2371 = dma.done.wait (%p5353_p9), [#allocation9], 16  }
  0x65   : > { %2373 = vsyncadd (%p5354_p4), [#allocation9], 4294967280 }
  0x66   : > { %221 = sfence }
  0x67   : > { %v2619_v0 = vld [vmem:[%s208_s8] sm:$0xff]  ;;  %v2621_v1 = vld [vmem:[%s208_s8 + $0x8] sm:$0xff]  ;;  %v2397_v3 = vmov 0   ;;  %v248_v4 = vlaneseq  ;;  %s1998_s22 = sld [smem:[#allocation7 + $0x4]]  ;;  %s258_s27 = sld [smem:[#allocation7]] }
  0x68   : > { %v244_v2 = vadd.f32 %v2621_v1, %v2619_v0  ;;  %2241 = vset.pattern.permute.xlu0 %v2397_v3  ;;  %s2628_s26 = sld [smem:[#allocation7 + $0x1]]  ;;  %s2636_s29 = sld [smem:[#allocation7 + $0x2]] }
  0x69   : > { %v2626_v5 = vshrl.u32 %v248_v4, 7  ;;  %s2643_s30 = sld [smem:[#allocation7 + $0x3]]  ;;  %s2653_s5 = sld [smem:[#allocation7 + $0x5]] }
  0x6a   : > { %245 = vadd.xlane.f32.xlu0 %v244_v2  ;;  %s2665_s9 = sld [smem:[#allocation7 + $0x6]]  ;;  %s2676_s10 = sld [smem:[#allocation7 + $0x7]] }
  0x6b   : > { %v2631_v6 = vadd.s32 4294967292, %v2626_v5  ;;  %v2634_v7 = vadd.s32 4294967293, %v2626_v5  ;;  %v2639_v9 = vadd.s32 4294967294, %v2626_v5  ;;  %v2648_v12 = vadd.s32 4294967295, %v2626_v5  ;;  %s2005_s11 = sld [smem:[#allocation7 + $0x8]]  ;;  %s2007_s12 = sld [smem:[#allocation7 + $0xd]] }
  0x6c   : > { %v2657_v17 = vadd.s32 1, %v2626_v5  ;;  %v2670_v24 = vadd.s32 2, %v2626_v5  ;;  %v2680_v30 = vadd.s32 3, %v2626_v5  ;;  %v2688_v36 = vadd.s32 4, %v2626_v5  ;;  %s2008_s15 = sld [smem:[#allocation7 + $0x9]]  ;;  %s2009_s16 = sld [smem:[#allocation7 + $0xa]] }
  0x6d   : > { %v251_v11 = vstv %s1998_s22  ;;  %vm255_vm0 = vcmp.ge.s32.totalorder %v2631_v6, 0  ;;  %vm265_vm1 = vcmp.ge.s32.totalorder %v2634_v7, 0  ;;  %v260_v14 = vstv %s258_s27  ;;  %s2010_s21 = sld [smem:[#allocation7 + $0xb]]  ;;  %s2011_s24 = sld [smem:[#allocation7 + $0xc]] }
  0x6e   : > { %vm275_vm2 = vcmp.ge.s32.totalorder %v2639_v9, 0  ;;  %v270_v20 = vstv %s2628_s26  ;;  %vm285_vm3 = vcmp.ge.s32.totalorder %v2648_v12, 0  ;;  %v280_v26 = vstv %s2636_s29  ;;  %s2012_s7 = sld [smem:[#allocation7 + $0xe]]  ;;  %s2013_s8 = sld [smem:[#allocation7 + $0xf]] }
  0x6f   : > { %vm296_vm4 = vcmp.lt.s32.totalorder %v2657_v17, 8  ;;  %v290_v32 = vstv %s2643_s30  ;;  %vm306_vm5 = vcmp.lt.s32.totalorder %v2670_v24, 8  ;;  %v300_v38 = vstv %s2653_s5  ;;  %s2014_s22 = sld [smem:[#allocation7 + $0x10]]  ;;  %s2015_s27 = sld [smem:[#allocation7 + $0x11]] }
  0x70   : > { %vm316_vm6 = vcmp.lt.s32.totalorder %v2680_v30, 8  ;;  %v310_v43 = vstv %s2665_s9  ;;  %vm325_vm7 = vcmp.lt.s32.totalorder %v2688_v36, 8  ;;  %v320_v47 = vstv %s2676_s10  ;;  %s2399_s26 = smov 45   ;;  %s2400_s29 = smov 51  }
  0x71   : > { %v329_v51 = vstv %s2005_s11  ;;  %v340_v62 = vstv %s2007_s12  ;;  %vm433_vm8 = vcmp.eq.s32.totalorder %v2626_v5, 0  ;;  %s2401_s30 = smov 35   ;;  %s2402_s5 = smov 34  }
  0x72   : > { %v345_v2 = vstv %s2008_s15  ;;  %s2403_s9 = smov 50   ;;  %s2404_s10 = smov 33  }
  0x73   : > { %s2405_s11 = smov 32   ;;  %s2406_s12 = smov 49  }
  0x74   : > { %s2407_s15 = smov 31   ;;  %s2893_s28 = sld [smem:[#allocation8 + $0x32]] }
  0x75   : > { %s4472_s0 = sld [smem:[#allocation8 + $0x59]] }
  0x76   : > { %s4480_s1 = sld [smem:[#allocation8 + $0x29]] }
  0xf7   : > { %v246_v8 = vpop.xlane.xlu0 %245 }
  0xf8   : > { %v2641_v10 = vmul.f32 0.00390625, %v246_v8 }
  0xfa   : > { %v253_v13 = vrot.slane %v2641_v10, 4  ;;  %v263_v15 = vrot.slane %v2641_v10, 5  ;;  %v273_v16 = vrot.slane %v2641_v10, 6  ;;  %v283_v21 = vrot.slane %v2641_v10, 7 }
  0xfb   : > { %v252_v22 = vmul.f32 %v251_v11, %v2641_v10  ;;  %v293_v27 = vrot.slane %v2641_v10, 1  ;;  %v303_v33 = vrot.slane %v2641_v10, 2  ;;  %v313_v39 = vrot.slane %v2641_v10, 3 }
  0xfc   : > { %v259_v18 = vsel %vm255_vm0, %v253_v13, 0.0  ;;  %v269_v19 = vsel %vm265_vm1, %v263_v15, 0.0  ;;  %v279_v25 = vsel %vm275_vm2, %v273_v16, 0.0  ;;  %v289_v31 = vsel %vm285_vm3, %v283_v21, 0.0 }
  0xfd   : > { %v261_v23 = vmul.f32 %v260_v14, %v259_v18  ;;  %v271_v29 = vmul.f32 %v270_v20, %v269_v19  ;;  %v281_v35 = vmul.f32 %v280_v26, %v279_v25  ;;  %v299_v37 = vsel %vm296_vm4, %v293_v27, 0.0 }
  0xfe   : > { %v291_v41 = vmul.f32 %v290_v32, %v289_v31  ;;  %v309_v42 = vsel %vm306_vm5, %v303_v33, 0.0  ;;  %v301_v45 = vmul.f32 %v300_v38, %v299_v37  ;;  %v319_v46 = vsel %vm316_vm6, %v313_v39, 0.0 }
  0xff   : > { %v262_v28 = vadd.f32 %v261_v23, %v252_v22  ;;  %v311_v49 = vmul.f32 %v310_v43, %v309_v42  ;;  %v328_v50 = vsel %vm325_vm7, %v253_v13, 0.0  ;;  %v321_v53 = vmul.f32 %v320_v47, %v319_v46 }
 0x100   : > { %v330_v55 = vmul.f32 %v329_v51, %v328_v50  ;;  %v351_v14 = vstv %s2009_s16  ;;  %v357_v19 = vstv %s2010_s21  ;;  %v363_v23 = vstv %s2011_s24  ;;  %s2408_s16 = smov 30   ;;  %s2409_s21 = smov 48  }
 0x101   : > { %v272_v34 = vadd.f32 %v271_v29, %v262_v28  ;;  %v369_v28 = vstv %s2012_s7  ;;  %v375_v33 = vstv %s2013_s8  ;;  %v381_v37 = vstv %s2014_s22  ;;  %s2410_s24 = smov 29   ;;  %s2411_s7 = smov 19  }
 0x102   : > { %s2412_s8 = smov 47   ;;  %s2413_s22 = smov 18  }
 0x103   : > { %v282_v40 = vadd.f32 %v281_v35, %v272_v34 }
 0x105   : > { %v292_v44 = vadd.f32 %v291_v41, %v282_v40  ;;  %v386_v40 = vstv %s2015_s27  ;;  %s2414_s27 = smov 17  }
 0x107   : > { %v302_v48 = vadd.f32 %v301_v45, %v292_v44 }
 0x109   : > { %v312_v52 = vadd.f32 %v311_v49, %v302_v48 }
 0x10b   : > { %v322_v54 = vadd.f32 %v321_v53, %v312_v52 }
 0x10d   : > { %v331_v56 = vadd.f32 %v330_v55, %v322_v54 }
 0x10f   : > { %v2006_v57 = vmul.f32 -1.442695, %v331_v56 }
 0x111   : > { %2242 = vpow2.f32 %v2006_v57 }
 0x11b   : > { %v2243_v58 = vpop.eup %2242 }
 0x11c   : > { %v335_v59 = vadd.f32 1.0, %v2243_v58 }
 0x11e   : > { %2244 = vrcp.f32 %v335_v59 }
 0x128   : > { %v2245_v60 = vpop.eup %2244 }
 0x129   : > { %v338_v61 = vmul.f32 %v2245_v60, %v2641_v10 }
 0x12b   : > { %v342_v63 = vrot.slane %v338_v61, 4  ;;  %v348_v3 = vrot.slane %v338_v61, 5  ;;  %v354_v8 = vrot.slane %v338_v61, 6  ;;  %v360_v15 = vrot.slane %v338_v61, 7 }
 0x12c   : > { %v341_v16 = vmul.f32 %v340_v62, %v338_v61  ;;  %v366_v20 = vrot.slane %v338_v61, 1  ;;  %v372_v25 = vrot.slane %v338_v61, 2  ;;  %v378_v29 = vrot.slane %v338_v61, 3 }
 0x12d   : > { %v344_v11 = vsel %vm255_vm0, %v342_v63, 0.0  ;;  %v350_v13 = vsel %vm265_vm1, %v348_v3, 0.0  ;;  %v356_v10 = vsel %vm275_vm2, %v354_v8, 0.0  ;;  %v362_v6 = vsel %vm285_vm3, %v360_v15, 0.0 }
 0x12e   : > { %v346_v18 = vmul.f32 %v345_v2, %v344_v11  ;;  %v352_v22 = vmul.f32 %v351_v14, %v350_v13  ;;  %v358_v26 = vmul.f32 %v357_v19, %v356_v10  ;;  %v368_v27 = vsel %vm296_vm4, %v366_v20, 0.0 }
 0x12f   : > { %v364_v31 = vmul.f32 %v363_v23, %v362_v6  ;;  %v374_v32 = vsel %vm306_vm5, %v372_v25, 0.0  ;;  %v370_v35 = vmul.f32 %v369_v28, %v368_v27  ;;  %v380_v12 = vsel %vm316_vm6, %v378_v29, 0.0 }
 0x130   : > { %v347_v21 = vadd.f32 %v346_v18, %v341_v16  ;;  %v376_v39 = vmul.f32 %v375_v33, %v374_v32  ;;  %v385_v17 = vsel %vm325_vm7, %v342_v63, 0.0  ;;  %v382_v42 = vmul.f32 %v381_v37, %v380_v12 }
 0x131   : > { %v387_v44 = vmul.f32 %v386_v40, %v385_v17 }
 0x132   : > { %v353_v7 = vadd.f32 %v352_v22, %v347_v21 }
 0x134   : > { %v359_v9 = vadd.f32 %v358_v26, %v353_v7  ;;  %v2840_v7 = vand.u32 127, %v248_v4 }
 0x136   : > { %v365_v34 = vadd.f32 %v364_v31, %v359_v9  ;;  %v445_v26 = vadd.s32 128, %v2840_v7  ;;  %v446_v27 = vcvt.s32.f32 %v2840_v7  ;;  %vm604_vm5 = vcmp.lt.s32.totalorder %v2840_v7, 48 }
 0x138   : > { %v371_v38 = vadd.f32 %v370_v35, %v365_v34  ;;  %v447_v4 = vcvt.s32.f32 %v445_v26  ;;  %v448_v9 = vadd.f32 0.5, %v446_v27 }
 0x13a   : > { %v377_v41 = vadd.f32 %v376_v39, %v371_v38  ;;  %v449_v31 = vadd.f32 0.5, %v447_v4  ;;  %v450_v33 = vmul.f32 0.0625, %v448_v9 }
 0x13c   : > { %v383_v43 = vadd.f32 %v382_v42, %v377_v41  ;;  %v451_v35 = vmul.f32 0.0625, %v449_v31  ;;  %v2872_v12 = vfloor.f32 %v450_v33 }
 0x13e   : > { %v388_v45 = vadd.f32 %v387_v44, %v383_v43  ;;  %v2878_v39 = vfloor.f32 %v451_v35  ;;  %v454_v17 = vmul.f32 16.0, %v2872_v12 }
 0x140   : > { %v2016_v24 = vmul.f32 -1.442695, %v388_v45  ;;  %5357 = vst [vmem:[#allocation17_spill] sm:$0xff] %v2878_v39  ;;  %v455_v42 = vmul.f32 16.0, %v2878_v39  ;;  %v2906_v43 = vsub.f32 %v446_v27, %v454_v17 }
 0x142   : > { %2246 = vpow2.f32 %v2016_v24  ;;  %v2912_v24 = vsub.f32 %v447_v4, %v455_v42  ;;  %vm484_vm14 = vcmp.ge.f32.partialorder %v2906_v43, 0.0  ;;  %vm486_vm15 = vcmp.le.f32.partialorder %v2906_v43, 15.0 }
 0x144   : > { %vm485_vm3 = vcmp.ge.f32.partialorder %v2912_v24, 0.0  ;;  %vm487_vm4 = vcmp.le.f32.partialorder %v2912_v24, 15.0  ;;  %v3016_v27 = vadd.f32 1.0, %v2912_v24 }
 0x14c   : > { %v2247_v46 = vpop.eup %2246 }
 0x14d   : > { %v392_v47 = vadd.f32 1.0, %v2247_v46  ;;  %v2919_v46 = vadd.f32 -3.0, %v2906_v43 }
 0x14f   : > { %2248 = vrcp.f32 %v392_v47  ;;  %v2926_v47 = vadd.f32 -3.0, %v2912_v24  ;;  %vm460_vm9 = vcmp.ge.f32.partialorder %v2919_v46, 0.0  ;;  %vm462_vm11 = vcmp.le.f32.partialorder %v2919_v46, 15.0 }
 0x150   : > { %vm3058_vm7 = vmand %vm460_vm9, %vm462_vm11  ;;  %v5363_v46 = vmov 0 }
 0x151   : > { %vm461_vm10 = vcmp.ge.f32.partialorder %v2926_v47, 0.0  ;;  %vm463_vm12 = vcmp.le.f32.partialorder %v2926_v47, 15.0 }
 0x152   : > { %vm3076_vm6 = vmand %vm461_vm10, %vm463_vm12 }
 0x153   : > { %v5364_v46 = vsel %vm3076_vm6, 4294967295, %v5363_v46  ;;  %vm3101_vm12 = vmand %vm484_vm14, %vm486_vm15 }
 0x154   : > { %vm3135_vm14 = vmand %vm485_vm3, %vm487_vm4 }
 0x159   : > { %v2249_v48 = vpop.eup %2248 }
 0x15a   : > { %v395_v30 = vmul.f32 %v2249_v48, %v2245_v60 }
 0x15c   : > { %398 = vperm.xlu0 %2241, %v395_v30  }
 0x1db   : > { %v399_v49 = vpop.permute.xlu0 %398 }
 0x1dc   : > { %v2722_v50 = vmul.f32 %v399_v49, %v2619_v0  ;;  %v2725_v36 = vmul.f32 %v399_v49, %v2621_v1  ;;  %v2398_v1 = vmov 0.0   ;;  %v2931_v49 = vadd.f32 -3.0, %v2872_v12 }
 0x1dd   : > { %v2734_v60 = vsel %vm433_vm8, 1.0, %v2398_v1  ;;  %vm5388_vm8 = vcmp.le.f32.partialorder %v3016_v27, 15.0 }
 0x1de   : > { %5355 = vst [vmem:[#allocation15_spill] sm:$0xff] %v2722_v50  ;;  %5356 = vst [vmem:[#allocation16_spill] sm:$0xff] %v2725_v36  ;;  %v407_v51 = vrot.slane %v2722_v50, 4  ;;  %v413_v52 = vrot.slane %v2725_v36, 4  ;;  %v2737_v11 = vsub.f32 1.0, %v2734_v60  ;;  %vm516_vm13 = vcmp.ge.f32.partialorder %v2931_v49, 0.0 }
 0x1df   : > { %vm518_vm1 = vcmp.le.f32.partialorder %v2931_v49, 15.0  ;;  %v3111_v49 = vadd.f32 3.0, %v2912_v24 }
 0x1e0   : > { %v408_v53 = vmax.f32 %v2722_v50, %v407_v51  ;;  %v414_v54 = vmax.f32 %v2725_v36, %v413_v52  ;;  %v420_v55 = vadd.f32 %v407_v51, %v2722_v50  ;;  %v426_v56 = vadd.f32 %v413_v52, %v2725_v36  ;;  %vm3093_vm10 = vmand %vm516_vm13, %vm518_vm1 }
 0x1e1   : > { %v559_v52 = vstv %s2893_s28  ;;  %s2951_s28 = sld [smem:[#allocation8 + $0x35]] }
 0x1e2   : > { %v409_v57 = vrot.slane %v408_v53, 2  ;;  %v415_v0 = vrot.slane %v414_v54, 2  ;;  %v421_v58 = vrot.slane %v420_v55, 2  ;;  %v427_v59 = vrot.slane %v426_v56, 2 }
 0x1e4   : > { %v410_v61 = vmax.f32 %v408_v53, %v409_v57  ;;  %v416_v62 = vmax.f32 %v414_v54, %v415_v0  ;;  %v422_v63 = vadd.f32 %v421_v58, %v420_v55  ;;  %v428_v2 = vadd.f32 %v427_v59, %v426_v56 }
 0x1e5   : > { %v2940_v55 = vadd.f32 -3.0, %v2878_v39  ;;  %v560_v58 = vmul.f32 %v559_v52, %v2737_v11  ;;  %v5361_v52 = vmov 0 }
 0x1e6   : > { %v411_v5 = vrot.slane %v410_v61, 1  ;;  %v423_v3 = vrot.slane %v422_v63, 1  ;;  %v429_v8 = vrot.slane %v428_v2, 1  ;;  %v417_v14 = vrot.slane %v416_v62, 1 }
 0x1e7   : > { %vm517_vm0 = vcmp.ge.f32.partialorder %v2940_v55, 0.0  ;;  %vm519_vm2 = vcmp.le.f32.partialorder %v2940_v55, 15.0  ;;  %v637_v31 = vstv %s2951_s28  ;;  %s3052_s28 = sld [smem:[#allocation8 + $0x3a]]  ;;  %v5362_v52 = vsel %vm3058_vm7, 4294967295, %v5361_v52 }
 0x1e8   : > { %v412_v13 = vmax.f32 %v410_v61, %v411_v5  ;;  %v424_v15 = vadd.f32 %v423_v3, %v422_v63  ;;  %v430_v16 = vadd.f32 %v429_v8, %v428_v2  ;;  %v418_v19 = vmax.f32 %v416_v62, %v417_v14  ;;  %vm3117_vm13 = vmand %vm517_vm0, %vm519_vm2 }
 0x1e9   : > { %v2966_v61 = vadd.f32 -1.0, %v2906_v43  ;;  %v2982_v3 = vadd.f32 -1.0, %v2912_v24  ;;  %vm5399_vm0 = vcmp.lt.s32.totalorder %v2840_v7, 49 }
 0x1ea   : > { %v431_v18 = vmul.f32 0.125, %v424_v15  ;;  %v432_v10 = vmul.f32 0.125, %v430_v16  ;;  %v437_v20 = vmul.f32 %v2734_v60, %v412_v13  ;;  %v438_v23 = vmul.f32 %v2734_v60, %v418_v19 }
 0x1eb   : > { %v2996_v15 = vadd.f32 -2.0, %v2906_v43  ;;  %v2999_v16 = vadd.f32 -2.0, %v2912_v24  ;;  %vm5374_vm2 = vcmp.le.f32.partialorder %v2966_v61, 15.0  ;;  %vm5375_vm15 = vcmp.ge.f32.partialorder %v2966_v61, 0.0 }
 0x1ec   : > { %v439_v21 = vmul.f32 %v2737_v11, %v431_v18  ;;  %v440_v22 = vmul.f32 %v2737_v11, %v432_v10  ;;  %vm3153_vm1 = vmand %vm5375_vm15, %vm5374_vm2  ;;  %v3167_v61 = vadd.f32 -2.0, %v2872_v12  ;;  %vm5379_vm15 = vcmp.le.f32.partialorder %v2982_v3, 15.0 }
 0x1ed   : > { %vm5380_vm2 = vcmp.ge.f32.partialorder %v2982_v3, 0.0  ;;  %v5385_v3 = vmov 0  ;;  %v775_v50 = vstv %s3052_s28  ;;  %s3525_s28 = sld [smem:[#allocation8 + $0x3e]] }
 0x1ee   : > { %v2742_v6 = vadd.f32 %v439_v21, %v437_v20  ;;  %v2748_v25 = vadd.f32 %v440_v22, %v438_v23  ;;  %v3009_v22 = vadd.f32 1.0, %v2906_v43  ;;  %vm3188_vm3 = vmand %vm5380_vm2, %vm5379_vm15  ;;  %vm5392_vm15 = vcmp.lt.s32.totalorder %v2840_v7, 51 }
 0x1ef   : > { %vm5393_vm4 = vmmov %vm5392_vm15 }
 0x1f0   : > { %678 = vrot.lane.b32.xlu0 %v2742_v6, %s2399_s26  ;;  %522 = vrot.lane.b32.xlu1 %v2742_v6, %s2400_s29  ;;  %vm494_vm11 = vcmp.le.f32.partialorder %v3009_v22, 15.0 }
 0x1f4   : > { %712 = vrot.lane.b32.xlu0 %v2742_v6, %s2401_s30  ;;  %524 = vrot.lane.b32.xlu1 %v2748_v25, %s2400_s29  ;;  %s2415_s29 = smov 46  }
 0x1f8   : > { %738 = vrot.lane.b32.xlu0 %v2742_v6, %s2402_s5  ;;  %548 = vrot.lane.b32.xlu1 %v2742_v6, %s2403_s9 }
 0x1fc   : > { %764 = vrot.lane.b32.xlu0 %v2742_v6, %s2404_s10  ;;  %550 = vrot.lane.b32.xlu1 %v2748_v25, %s2403_s9  ;;  %s2416_s9 = smov 16  }
 0x200   : > { %790 = vrot.lane.b32.xlu0 %v2742_v6, %s2405_s11  ;;  %574 = vrot.lane.b32.xlu1 %v2742_v6, %s2406_s12 }
 0x204   : > { %816 = vrot.lane.b32.xlu0 %v2742_v6, %s2407_s15  ;;  %576 = vrot.lane.b32.xlu1 %v2748_v25, %s2406_s12  ;;  %s2417_s12 = smov 15  }
 0x208   : > { %842 = vrot.lane.b32.xlu0 %v2742_v6, %s2408_s16  ;;  %600 = vrot.lane.b32.xlu1 %v2742_v6, %s2409_s21 }
 0x20c   : > { %868 = vrot.lane.b32.xlu0 %v2742_v6, %s2410_s24  ;;  %602 = vrot.lane.b32.xlu1 %v2748_v25, %s2409_s21  ;;  %s2418_s21 = smov 14  }
 0x210   : > { %902 = vrot.lane.b32.xlu0 %v2742_v6, %s2411_s7  ;;  %626 = vrot.lane.b32.xlu1 %v2742_v6, %s2412_s8 }
 0x214   : > { %928 = vrot.lane.b32.xlu0 %v2742_v6, %s2413_s22  ;;  %628 = vrot.lane.b32.xlu1 %v2748_v25, %s2412_s8  ;;  %s2419_s8 = smov 13  }
 0x218   : > { %954 = vrot.lane.b32.xlu0 %v2742_v6, %s2414_s27  ;;  %652 = vrot.lane.b32.xlu1 %v2742_v6, %s2415_s29 }
 0x21c   : > { %980 = vrot.lane.b32.xlu0 %v2742_v6, %s2416_s9  ;;  %654 = vrot.lane.b32.xlu1 %v2748_v25, %s2415_s29  ;;  %s2420_s29 = smov 3  }
 0x220   : > { %1006 = vrot.lane.b32.xlu0 %v2742_v6, %s2417_s12  ;;  %680 = vrot.lane.b32.xlu1 %v2748_v25, %s2399_s26  ;;  %s2421_s26 = smov 2  }
 0x224   : > { %1032 = vrot.lane.b32.xlu0 %v2742_v6, %s2418_s21  ;;  %714 = vrot.lane.b32.xlu1 %v2748_v25, %s2401_s30  ;;  %s2422_s30 = smov 1  }
 0x228   : > { %1058 = vrot.lane.b32.xlu0 %v2742_v6, %s2419_s8  ;;  %740 = vrot.lane.b32.xlu1 %v2748_v25, %s2402_s5  ;;  %s2423_s5 = smov 127  }
 0x22c   : > { %1092 = vrot.lane.b32.xlu0 %v2742_v6, %s2420_s29  ;;  %766 = vrot.lane.b32.xlu1 %v2748_v25, %s2404_s10  ;;  %s2424_s10 = smov 126  }
 0x230   : > { %1118 = vrot.lane.b32.xlu0 %v2742_v6, %s2421_s26  ;;  %792 = vrot.lane.b32.xlu1 %v2748_v25, %s2405_s11  ;;  %s2425_s11 = smov 125  }
 0x234   : > { %1144 = vrot.lane.b32.xlu0 %v2742_v6, %s2422_s30  ;;  %818 = vrot.lane.b32.xlu1 %v2748_v25, %s2407_s15  ;;  %s2426_s15 = smov 115  }
 0x238   : > { %1189 = vrot.lane.b32.xlu0 %v2742_v6, %s2423_s5  ;;  %844 = vrot.lane.b32.xlu1 %v2748_v25, %s2408_s16  ;;  %s2427_s16 = smov 114  }
 0x23c   : > { %1215 = vrot.lane.b32.xlu0 %v2742_v6, %s2424_s10  ;;  %870 = vrot.lane.b32.xlu1 %v2748_v25, %s2410_s24  ;;  %s2428_s24 = smov 113  }
 0x240   : > { %1241 = vrot.lane.b32.xlu0 %v2742_v6, %s2425_s11  ;;  %904 = vrot.lane.b32.xlu1 %v2748_v25, %s2411_s7  ;;  %s2429_s7 = smov 112  }
 0x244   : > { %1275 = vrot.lane.b32.xlu0 %v2742_v6, %s2426_s15  ;;  %930 = vrot.lane.b32.xlu1 %v2748_v25, %s2413_s22  ;;  %s2430_s22 = smov 111  }
 0x248   : > { %1301 = vrot.lane.b32.xlu0 %v2742_v6, %s2427_s16  ;;  %956 = vrot.lane.b32.xlu1 %v2748_v25, %s2414_s27  ;;  %s2431_s27 = smov 110  }
 0x24c   : > { %1327 = vrot.lane.b32.xlu0 %v2742_v6, %s2428_s24  ;;  %982 = vrot.lane.b32.xlu1 %v2748_v25, %s2416_s9  ;;  %s2432_s9 = smov 109  }
 0x250   : > { %1353 = vrot.lane.b32.xlu0 %v2742_v6, %s2429_s7  ;;  %1008 = vrot.lane.b32.xlu1 %v2748_v25, %s2417_s12  ;;  %s2433_s12 = smov 99  }
 0x254   : > { %1379 = vrot.lane.b32.xlu0 %v2742_v6, %s2430_s22  ;;  %1034 = vrot.lane.b32.xlu1 %v2748_v25, %s2418_s21  ;;  %s5251_s21 = smov 98  }
 0x258   : > { %1405 = vrot.lane.b32.xlu0 %v2742_v6, %s2431_s27  ;;  %1060 = vrot.lane.b32.xlu1 %v2748_v25, %s2419_s8  ;;  %s5249_s8 = smov 97  }
 0x25c   : > { %1431 = vrot.lane.b32.xlu0 %v2742_v6, %s2432_s9  ;;  %1094 = vrot.lane.b32.xlu1 %v2748_v25, %s2420_s29  ;;  %s2880_s29 = sld [smem:[#allocation8]] }
 0x260   : > { %1465 = vrot.lane.b32.xlu0 %v2742_v6, %s2433_s12  ;;  %1120 = vrot.lane.b32.xlu1 %v2748_v25, %s2421_s26  ;;  %s5250_s26 = smov 96  }
 0x262   : > { %v2856_v28 = vpop.permute.xlu0 %678  ;;  %v2858_v29 = vpop.permute.xlu1 %522  ;;  %v530_v48 = vstv %s2880_s29  ;;  %s2439_s29 = smov 93  }
 0x263   : > { %v531_v56 = vmul.f32 %v2734_v60, %v530_v48 }
 0x264   : > { %1491 = vrot.lane.b32.xlu0 %v2742_v6, %s5251_s21  ;;  %1146 = vrot.lane.b32.xlu1 %v2748_v25, %s2422_s30  ;;  %s2886_s30 = sld [smem:[#allocation8 + $0x31]]  ;;  %s2914_s21 = sld [smem:[#allocation8 + $0x3]] }
 0x266   : > { %v2864_v32 = vpop.permute.xlu0 %712  ;;  %v2866_v34 = vpop.permute.xlu1 %524 }
 0x268   : > { %1517 = vrot.lane.b32.xlu0 %v2742_v6, %s5249_s8  ;;  %1191 = vrot.lane.b32.xlu1 %v2748_v25, %s2423_s5  ;;  %s2891_s5 = sld [smem:[#allocation8 + $0x1]]  ;;  %s5252_s8 = smov 95  }
 0x26a   : > { %v2874_v37 = vpop.permute.xlu0 %738  ;;  %v2876_v38 = vpop.permute.xlu1 %548  ;;  %v533_v30 = vstv %s2886_s30  ;;  %s2958_s30 = sld [smem:[#allocation8 + $0x5]]  ;;  %v608_v2 = vstv %s2914_s21  ;;  %s5254_s21 = smov 82  }
 0x26b   : > { %v534_v57 = vmul.f32 %v533_v30, %v2737_v11  ;;  %v609_v19 = vmul.f32 %v2734_v60, %v608_v2  ;;  %v3107_v2 = vadd.f32 2.0, %v2912_v24  ;;  %v5376_v24 = vmov 0 }
 0x26c   : > { %1543 = vrot.lane.b32.xlu0 %v2742_v6, %s5250_s26  ;;  %1217 = vrot.lane.b32.xlu1 %v2748_v25, %s2424_s10  ;;  %s2902_s10 = sld [smem:[#allocation8 + $0x2]]  ;;  %s2904_s26 = sld [smem:[#allocation8 + $0x33]]  ;;  %v5377_v24 = vsel %vm3153_vm1, 4294967295, %v5376_v24 }
 0x26d   : > { %v2993_v14 = vadd.f32 %v534_v57, %v531_v56  ;;  %v3064_v56 = vadd.f32 3.0, %v2906_v43  ;;  %5378 = vst [vmem:[#allocation22_spill] sm:$0xff] %v5377_v24 }
 0x26e   : > { %v2889_v40 = vpop.permute.xlu0 %764  ;;  %v2895_v41 = vpop.permute.xlu1 %550  ;;  %v556_v51 = vstv %s2891_s5  ;;  %s2960_s5 = sld [smem:[#allocation8 + $0x36]] }
 0x26f   : > { %v557_v0 = vmul.f32 %v2734_v60, %v556_v51  ;;  %v3048_v51 = vadd.f32 2.0, %v2906_v43 }
 0x270   : > { %1569 = vrot.lane.b32.xlu0 %v2742_v6, %s5252_s8  ;;  %1243 = vrot.lane.b32.xlu1 %v2748_v25, %s2425_s11  ;;  %s2916_s8 = sld [smem:[#allocation8 + $0x34]]  ;;  %s2438_s11 = smov 94   ;;  %v660_v33 = vstv %s2958_s30 }
 0x271   : > { %v3001_v18 = vadd.f32 %v560_v58, %v557_v0  ;;  %s3068_s30 = sld [smem:[#allocation8 + $0xa]]  ;;  %v638_v58 = vmul.f32 %v637_v31, %v2737_v11 }
 0x272   : > { %v2908_v44 = vpop.permute.xlu0 %790  ;;  %v2910_v45 = vpop.permute.xlu1 %574  ;;  %v582_v59 = vstv %s2902_s10  ;;  %v585_v1 = vstv %s2904_s26  ;;  %s2979_s26 = sld [smem:[#allocation8 + $0x37]]  ;;  %s5253_s10 = smov 83  }
 0x273   : > { %v583_v8 = vmul.f32 %v2734_v60, %v582_v59  ;;  %v586_v13 = vmul.f32 %v585_v1, %v2737_v11  ;;  %v661_v59 = vmul.f32 %v2734_v60, %v660_v33 }
 0x274   : > { %1595 = vrot.lane.b32.xlu0 %v2742_v6, %s2438_s11  ;;  %1277 = vrot.lane.b32.xlu1 %v2748_v25, %s2426_s15  ;;  %s2942_s15 = sld [smem:[#allocation8 + $0x4]]  ;;  %v663_v35 = vstv %s2960_s5  ;;  %s3070_s5 = sld [smem:[#allocation8 + $0x3b]] }
 0x275   : > { %v3024_v9 = vadd.f32 %v586_v13, %v583_v8  ;;  %v664_v47 = vmul.f32 %v663_v35, %v2737_v11  ;;  %v3170_v35 = vadd.f32 -2.0, %v2878_v39 }
 0x276   : > { %v2935_v53 = vpop.permute.xlu0 %816  ;;  %v2937_v54 = vpop.permute.xlu1 %576  ;;  %v611_v5 = vstv %s2916_s8  ;;  %s3030_s8 = sld [smem:[#allocation8 + $0x38]] }
 0x277   : > { %v612_v20 = vmul.f32 %v611_v5, %v2737_v11  ;;  %v3163_v33 = vadd.f32 %v664_v47, %v661_v59 }
 0x278   : > { %1621 = vrot.lane.b32.xlu0 %v2742_v6, %s2439_s29  ;;  %1303 = vrot.lane.b32.xlu1 %v2748_v25, %s2427_s16  ;;  %s2977_s16 = sld [smem:[#allocation8 + $0x6]]  ;;  %v689_v0 = vstv %s2979_s26  ;;  %s3174_s26 = sld [smem:[#allocation8 + $0x3c]] }
 0x279   : > { %v3041_v17 = vadd.f32 %v612_v20, %v609_v19  ;;  %v690_v55 = vmul.f32 %v689_v0, %v2737_v11  ;;  %v5372_v19 = vmov 0 }
 0x27a   : > { %v2968_v62 = vpop.permute.xlu0 %842  ;;  %v601_v63 = vpop.permute.xlu1 %600  ;;  %v634_v4 = vstv %s2942_s15  ;;  %s3036_s15 = sld [smem:[#allocation8 + $0x8]]  ;;  %v5373_v19 = vsel %vm3135_vm14, 4294967295, %v5372_v19  ;;  %vm5421_vm14 = vcmp.le.f32.partialorder %v3167_v61, 15.0 }
 0x27b   : > { %5358 = vst [vmem:[#allocation18_spill] sm:$0xff] %v2968_v62  ;;  %v635_v30 = vmul.f32 %v2734_v60, %v634_v4 }
 0x27c   : > { %1655 = vrot.lane.b32.xlu0 %v2742_v6, %s5253_s10  ;;  %1329 = vrot.lane.b32.xlu1 %v2748_v25, %s2428_s24  ;;  %s3019_s24 = sld [smem:[#allocation8 + $0x7]]  ;;  %s3038_s10 = sld [smem:[#allocation8 + $0x39]] }
 0x27d   : > { %v3157_v31 = vadd.f32 %v638_v58, %v635_v30  ;;  %v723_v30 = vstv %s3030_s8  ;;  %s3475_s8 = sld [smem:[#allocation8 + $0xc]] }
 0x27e   : > { %v3004_v10 = vpop.permute.xlu0 %868  ;;  %v603_v21 = vpop.permute.xlu1 %602  ;;  %v686_v57 = vstv %s2977_s16  ;;  %s3172_s16 = sld [smem:[#allocation8 + $0xb]] }
 0x27f   : > { %5359 = vst [vmem:[#allocation19_spill] sm:$0xff] %v3004_v10  ;;  %v3011_v23 = vsel %vm604_vm5, %v601_v63, %v603_v21  ;;  %v3013_v26 = vsel %vm604_vm5, %v603_v21, %v601_v63  ;;  %vm630_vm5 = vcmp.lt.s32.totalorder %v2840_v7, 47  ;;  %v5367_v63 = vmov 0 }
 0x280   : > { %1681 = vrot.lane.b32.xlu0 %v2742_v6, %s5254_s21  ;;  %1355 = vrot.lane.b32.xlu1 %v2748_v25, %s2429_s7  ;;  %s3050_s7 = sld [smem:[#allocation8 + $0x9]]  ;;  %s2442_s21 = smov 81   ;;  %v5368_v63 = vsel %vm3101_vm12, 4294967295, %v5367_v63  ;;  %v687_v13 = vmul.f32 %v2734_v60, %v686_v57  ;;  %v746_v47 = vstv %s3036_s15  ;;  %vm5415_vm12 = vcmp.le.f32.partialorder %v2999_v16, 15.0 }
 0x281   : > { %s3501_s15 = sld [smem:[#allocation8 + $0x3d]] }
 0x282   : > { %v3043_v42 = vpop.permute.xlu0 %902  ;;  %v627_v48 = vpop.permute.xlu1 %626  ;;  %v720_v4 = vstv %s3019_s24  ;;  %v3208_v58 = vadd.f32 %v690_v55, %v687_v13  ;;  %v527_v13 = vsel %vm5392_vm15, %v2858_v29, %v2866_v34  ;;  %v528_v55 = vsel %vm5393_vm4, %v2866_v34, %v2858_v29  ;;  %s5445_s24 = smov 97  }
 0x283   : > { %5360 = vst [vmem:[#allocation20_spill] sm:$0xff] %v3043_v42  ;;  %v721_v59 = vmul.f32 %v2734_v60, %v720_v4  ;;  %v747_v4 = vmul.f32 %v2734_v60, %v746_v47  ;;  %vm5395_vm15 = vcmp.le.f32.partialorder %v3064_v56, 15.0  ;;  %v5397_v47 = vmov 0 }
 0x284   : > { %1707 = vrot.lane.b32.xlu0 %v2742_v6, %s2442_s21  ;;  %1381 = vrot.lane.b32.xlu1 %v2748_v25, %s2430_s22  ;;  %s2443_s22 = smov 80   ;;  %v776_v42 = vmul.f32 %v775_v50, %v2737_v11  ;;  %vm5403_vm4 = vcmp.le.f32.partialorder %v3111_v49, 15.0 }
 0x286   : > { %v3123_v5 = vpop.permute.xlu0 %928  ;;  %v629_v8 = vpop.permute.xlu1 %628  ;;  %v772_v36 = vstv %s3050_s7  ;;  %s3523_s7 = sld [smem:[#allocation8 + $0xd]] }
 0x287   : > { %5371 = vst [vmem:[#allocation21_spill] sm:$0xff] %v3123_v5  ;;  %v3141_v20 = vsel %vm630_vm5, %v627_v48, %v629_v8  ;;  %v3145_v21 = vsel %vm630_vm5, %v629_v8, %v627_v48  ;;  %v5381_v48 = vmov 0  ;;  %vm5384_vm5 = vcmp.ge.f32.partialorder %v3009_v22, 0.0 }
 0x288   : > { %1733 = vrot.lane.b32.xlu0 %v2742_v6, %s2443_s22  ;;  %1407 = vrot.lane.b32.xlu1 %v2748_v25, %s2431_s27  ;;  %v5382_v48 = vsel %vm3188_vm3, 4294967295, %v5381_v48  ;;  %vm3200_vm9 = vmand %vm5384_vm5, %vm494_vm11  ;;  %v749_v8 = vstv %s3038_s10  ;;  %vm5389_vm11 = vcmp.ge.f32.partialorder %v3016_v27, 0.0  ;;  %v5390_v22 = vmov 0  ;;  %s2444_s27 = smov 79   ;;  %s5427_s10 = smov 98  }
 0x289   : > { %5383 = vst [vmem:[#allocation23_spill] sm:$0xff] %v5382_v48  ;;  %v5386_v3 = vsel %vm3200_vm9, 4294967295, %v5385_v3  ;;  %vm3217_vm5 = vmand %vm5389_vm11, %vm5388_vm8  ;;  %v801_v5 = vstv %s3070_s5  ;;  %v724_v27 = vmul.f32 %v723_v30, %v2737_v11  ;;  %v750_v30 = vmul.f32 %v749_v8, %v2737_v11  ;;  %s3558_s5 = sld [smem:[#allocation8 + $0xe]] }
 0x28a   : > { %v3204_v57 = vpop.permute.xlu0 %954  ;;  %v653_v0 = vpop.permute.xlu1 %652  ;;  %v5391_v22 = vsel %vm3217_vm5, 4294967295, %v5390_v22  ;;  %vm5396_vm11 = vcmp.ge.f32.partialorder %v3064_v56, 0.0  ;;  %v773_v8 = vmul.f32 %v2734_v60, %v772_v36  ;;  %v802_v62 = vmul.f32 %v801_v5, %v2737_v11 }
 0x28b   : > { %5387 = vst [vmem:[#allocation24_spill] sm:$0xff] %v3204_v57  ;;  %v798_v57 = vstv %s3068_s30  ;;  %vm3275_vm2 = vmand %vm5396_vm11, %vm5395_vm15  ;;  %vm5401_vm15 = vcmp.lt.s32.totalorder %v2840_v7, 46  ;;  %vm5404_vm5 = vcmp.ge.f32.partialorder %v3111_v49, 0.0  ;;  %v5405_v5 = vmov 0  ;;  %s5459_s30 = smov 96  }
 0x28c   : > { %1759 = vrot.lane.b32.xlu0 %v2742_v6, %s2444_s27  ;;  %1433 = vrot.lane.b32.xlu1 %v2748_v25, %s2432_s9  ;;  %v5398_v47 = vsel %vm3275_vm2, 4294967295, %v5397_v47  ;;  %v799_v10 = vmul.f32 %v2734_v60, %v798_v57  ;;  %vm5400_vm11 = vmmov %vm5399_vm0  ;;  %v538_v57 = vmul.f32 %v2993_v14, %v528_v55  ;;  %s2445_s9 = smov 78   ;;  %v824_v49 = vstv %s3172_s16  ;;  %s3586_s16 = sld [smem:[#allocation8 + $0x3f]] }
 0x28d   : > { %v580_v56 = vsel %vm5400_vm11, %v2937_v54, %v2910_v45  ;;  %vm5402_vm8 = vmmov %vm5401_vm15  ;;  %vm5408_vm11 = vcmp.ge.f32.partialorder %v3048_v51, 0.0 }
 0x28e   : > { %v3269_v29 = vpop.permute.xlu0 %980  ;;  %v655_v34 = vpop.permute.xlu1 %654  ;;  %vm3303_vm9 = vmand %vm5404_vm5, %vm5403_vm4  ;;  %vm5411_vm5 = vcmp.le.f32.partialorder %v2996_v15, 15.0  ;;  %v590_v55 = vmul.f32 %v3024_v9, %v580_v56  ;;  %v617_v56 = vmul.f32 %v3041_v17, %v3011_v23 }
 0x28f   : > { %5394 = vst [vmem:[#allocation25_spill] sm:$0xff] %v3269_v29  ;;  %v579_v29 = vsel %vm5399_vm0, %v2910_v45, %v2937_v54  ;;  %v3293_v36 = vsel %vm5401_vm15, %v653_v0, %v655_v34  ;;  %v3297_v50 = vsel %vm5402_vm8, %v655_v34, %v653_v0  ;;  %v5406_v5 = vsel %vm3303_vm9, 4294967295, %v5405_v5 }
 0x290   : > { %v539_v45 = vmul.f32 %v2993_v14, %v527_v13  ;;  %vm5407_vm0 = vcmp.le.f32.partialorder %v3048_v51, 15.0  ;;  %v5409_v54 = vmov 0  ;;  %1785 = vrot.lane.b32.xlu0 %v2742_v6, %s2445_s9  ;;  %1467 = vrot.lane.b32.xlu1 %v2748_v25, %s2433_s12  ;;  %v827_v0 = vstv %s3174_s26  ;;  %s2446_s12 = smov 77   ;;  %s5471_s26 = smov 95  }
 0x291   : > { %vm3313_vm15 = vmand %vm5408_vm11, %vm5407_vm0  ;;  %vm5412_vm8 = vcmp.ge.f32.partialorder %v2996_v15, 0.0  ;;  %v5413_v14 = vmov 0  ;;  %v725_v51 = vadd.f32 %v724_v27, %v721_v59  ;;  %v3337_v13 = vadd.f32 %v750_v30, %v747_v4 }
 0x292   : > { %v5410_v54 = vsel %vm3313_vm15, 4294967295, %v5409_v54  ;;  %vm3327_vm4 = vmand %vm5412_vm8, %vm5411_vm5  ;;  %vm5416_vm15 = vcmp.ge.f32.partialorder %v2999_v16, 0.0  ;;  %v5417_v15 = vmov 0  ;;  %v591_v34 = vmul.f32 %v3024_v9, %v579_v29  ;;  %v3349_v39 = vpop.permute.xlu0 %1006  ;;  %v681_v59 = vpop.permute.xlu1 %680 }
 0x293   : > { %v5414_v14 = vsel %vm3327_vm4, 4294967295, %v5413_v14  ;;  %vm3343_vm5 = vmand %vm5416_vm15, %vm5415_vm12  ;;  %v3355_v27 = vadd.f32 %v776_v42, %v773_v8  ;;  %v3357_v4 = vadd.f32 %v802_v62, %v799_v10  ;;  %vm5419_vm12 = vcmp.lt.s32.totalorder %v2840_v7, 45  ;;  %v5501_v8 = vld [vmem:[#allocation20_spill] sm:$0xff] }
 0x294   : > { %v5418_v15 = vsel %vm3343_vm5, 4294967295, %v5417_v15  ;;  %v683_v16 = vsel %vm5419_vm12, %v2856_v28, %v681_v59  ;;  %vm5420_vm15 = vmmov %vm5419_vm12  ;;  %vm5422_vm0 = vcmp.ge.f32.partialorder %v3167_v61, 0.0  ;;  %v3374_v42 = vmul.f32 %v2734_v60, %v824_v49  ;;  %1811 = vrot.lane.b32.xlu0 %v2742_v6, %s2446_s12  ;;  %1493 = vrot.lane.b32.xlu1 %v2748_v25, %s5427_s10  ;;  %s3657_s10 = sld [smem:[#allocation8 + $0xf]] }
 0x295   : > { %v684_v9 = vsel %vm5420_vm15, %v681_v59, %v2856_v28  ;;  %vm3369_vm11 = vmand %vm5422_vm0, %vm5421_vm14  ;;  %v3377_v62 = vmul.f32 %v827_v0, %v2737_v11  ;;  %v695_v29 = vmul.f32 %v3208_v58, %v683_v16  ;;  %vm5428_vm0 = vcmp.le.f32.partialorder %v3170_v35, 15.0 }
 0x296   : > { %vm5425_vm12 = vmand %vm3093_vm10, %vm3058_vm7  ;;  %v694_v61 = vmul.f32 %v3208_v58, %v684_v9  ;;  %vm5429_vm15 = vcmp.ge.f32.partialorder %v3170_v35, 0.0  ;;  %v616_v58 = vmul.f32 %v3041_v17, %v3013_v26  ;;  %vm5432_vm8 = vcmp.le.f32.partialorder %v3107_v2, 15.0 }
 0x297   : > { %v544_v28 = vsel %vm5425_vm12, %v538_v57, 0.0  ;;  %vm5426_vm14 = vmand %vm3117_vm13, %vm3076_vm6  ;;  %v642_v57 = vmul.f32 %v3157_v31, %v3145_v21  ;;  %v5434_v35 = vmov 0  ;;  %v715_v21 = vpop.permute.xlu1 %714 }
 0x298   : > { %v545_v10 = vsel %vm5426_vm14, %v539_v45, 0.0  ;;  %vm3399_vm12 = vmand %vm5429_vm15, %vm5428_vm0  ;;  %v643_v45 = vmul.f32 %v3157_v31, %v3141_v20  ;;  %vm5433_vm0 = vcmp.ge.f32.partialorder %v3107_v2, 0.0  ;;  %v3440_v20 = vpop.permute.xlu0 %1032  ;;  %1519 = vrot.lane.b32.xlu1 %v2748_v25, %s5445_s24  ;;  %s3659_s24 = sld [smem:[#allocation8 + $0x40]] }
 0x299   : > { %vm3416_vm15 = vmand %vm5433_vm0, %vm5432_vm8 }
 0x29a   : > { %v5435_v35 = vsel %vm3416_vm15, 4294967295, %v5434_v35  ;;  %vm5436_vm14 = vmand %vm3093_vm10, %vm3153_vm1 }
 0x29b   : > { %v596_v23 = vsel %vm5436_vm14, %v590_v55, 0.0  ;;  %vm5437_vm5 = vmand %vm3117_vm13, %vm3188_vm3  ;;  %vm5442_vm14 = vcmp.lt.s32.totalorder %v2840_v7, 50  ;;  %vm5450_vm3 = vnez %v5386_v3 }
 0x29c   : > { %v597_v26 = vsel %vm5437_vm5, %v591_v34, 0.0  ;;  %vm5438_vm8 = vmand %vm3093_vm10, %vm3275_vm2  ;;  %v553_v34 = vsel %vm5442_vm14, %v2876_v38, %v2895_v41  ;;  %1545 = vrot.lane.b32.xlu1 %v2748_v25, %s5459_s30  ;;  %s3760_s30 = sld [smem:[#allocation8 + $0x43]] }
 0x29d   : > { %v700_v17 = vsel %vm5438_vm8, %v694_v61, 0.0  ;;  %vm5439_vm0 = vmand %vm3117_vm13, %vm3303_vm9  ;;  %vm5440_vm8 = vcmp.lt.s32.totalorder %v2840_v7, 35  ;;  %v668_v61 = vmul.f32 %v3163_v33, %v3297_v50 }
 0x29e   : > { %v701_v2 = vsel %vm5439_vm0, %v695_v29, 0.0  ;;  %v3446_v31 = vadd.f32 %v700_v17, %v596_v23  ;;  %v717_v0 = vsel %vm5440_vm8, %v2864_v32, %v715_v21  ;;  %vm5441_vm0 = vmmov %vm5440_vm8  ;;  %vm5452_vm8 = vnez %v5391_v22 }
 0x29f   : > { %v3448_v49 = vadd.f32 %v701_v2, %v597_v26  ;;  %v718_v55 = vsel %vm5441_vm0, %v715_v21, %v2864_v32  ;;  %vm5443_vm9 = vmmov %vm5442_vm14  ;;  %v729_v9 = vmul.f32 %v725_v51, %v717_v0  ;;  %vm5446_vm14 = vnez %v5368_v63 }
 0x2a0   : > { %v554_v59 = vsel %vm5443_vm9, %v2895_v41, %v2876_v38  ;;  %v728_v16 = vmul.f32 %v725_v51, %v718_v55  ;;  %vm5447_vm0 = vmand %vm3093_vm10, %vm5446_vm14  ;;  %vm5448_vm9 = vnez %v5373_v19  ;;  %v669_v29 = vmul.f32 %v3163_v33, %v3293_v36  ;;  %v741_v33 = vpop.permute.xlu1 %740  ;;  %1571 = vrot.lane.b32.xlu1 %v2748_v25, %s5471_s26  ;;  %s3834_s26 = sld [smem:[#allocation8 + $0x44]] }
 0x2a1   : > { %v622_v32 = vsel %vm5447_vm0, %v616_v58, 0.0  ;;  %vm5449_vm2 = vmand %vm3117_vm13, %vm5448_vm9  ;;  %vm5457_vm0 = vcmp.lt.s32.totalorder %v2840_v7, 34  ;;  %v564_v26 = vmul.f32 %v3001_v18, %v554_v59  ;;  %v565_v17 = vmul.f32 %v3001_v18, %v553_v34 }
 0x2a2   : > { %v623_v38 = vsel %vm5449_vm2, %v617_v56, 0.0  ;;  %vm5451_vm1 = vmand %vm3093_vm10, %vm5450_vm3  ;;  %v829_v55 = vadd.f32 %v3377_v62, %v3374_v42 }
 0x2a3   : > { %v648_v41 = vsel %vm5451_vm1, %v642_v57, 0.0  ;;  %vm5453_vm5 = vmand %vm3117_vm13, %vm5452_vm8  ;;  %v3517_v57 = vpop.permute.xlu0 %1058 }
 0x2a4   : > { %v649_v51 = vsel %vm5453_vm5, %v643_v45, 0.0  ;;  %vm5454_vm1 = vmand %vm3369_vm11, %vm3058_vm7  ;;  %v743_v45 = vsel %vm5457_vm0, %v2874_v37, %v741_v33  ;;  %1597 = vrot.lane.b32.xlu1 %v2748_v25, %s2438_s11  ;;  %s3674_s11 = sld [smem:[#allocation8 + $0x10]] }
 0x2a5   : > { %v734_v58 = vsel %vm5454_vm1, %v728_v16, 0.0  ;;  %vm5455_vm2 = vmand %vm3399_vm12, %vm3076_vm6  ;;  %vm5456_vm1 = vnez %v5418_v15  ;;  %v755_v21 = vmul.f32 %v3337_v13, %v743_v45  ;;  %v651_v0 = vadd.f32 %v649_v51, %v545_v10  ;;  %v767_v10 = vpop.permute.xlu1 %766 }
 0x2a6   : > { %v735_v56 = vsel %vm5455_vm2, %v729_v9, 0.0  ;;  %v3527_v36 = vadd.f32 %v734_v58, %v622_v32  ;;  %vm5458_vm5 = vmmov %vm5457_vm0  ;;  %vm5460_vm6 = vnez %v5410_v54  ;;  %v879_v45 = vstv %s3525_s28  ;;  %s3758_s28 = sld [smem:[#allocation8 + $0x12]] }
 0x2a7   : > { %v3529_v50 = vadd.f32 %v735_v56, %v623_v38  ;;  %v744_v23 = vsel %vm5458_vm5, %v741_v33, %v2874_v37  ;;  %v650_v37 = vadd.f32 %v648_v41, %v544_v28  ;;  %vm5461_vm2 = vmand %vm3093_vm10, %vm5460_vm6  ;;  %v3580_v28 = vpop.permute.xlu0 %1092  ;;  %v876_v33 = vstv %s3523_s7  ;;  %s3740_s7 = sld [smem:[#allocation8 + $0x42]] }
 0x2a8   : > { %v754_v2 = vmul.f32 %v3337_v13, %v744_v23  ;;  %v674_v18 = vsel %vm5461_vm2, %v668_v61, 0.0  ;;  %vm5462_vm0 = vmand %vm3117_vm13, %vm3416_vm15  ;;  %vm5465_vm2 = vnez %v5377_v24  ;;  %vm5467_vm15 = vcmp.lt.s32.totalorder %v2840_v7, 33  ;;  %1623 = vrot.lane.b32.xlu1 %v2748_v25, %s2439_s29  ;;  %s5481_s29 = smov 83  }
 0x2a9   : > { %v675_v13 = vsel %vm5462_vm0, %v669_v29, 0.0  ;;  %vm5463_vm5 = vmand %vm3369_vm11, %vm3327_vm4  ;;  %v769_v16 = vsel %vm5467_vm15, %v2889_v40, %v767_v10  ;;  %v850_v61 = vstv %s3475_s8  ;;  %v853_v29 = vstv %s3501_s15  ;;  %s3676_s8 = sld [smem:[#allocation8 + $0x41]] }
 0x2aa   : > { %v760_v42 = vsel %vm5463_vm5, %v754_v2, 0.0  ;;  %vm5464_vm7 = vmand %vm3399_vm12, %vm5456_vm1  ;;  %vm5466_vm5 = vnez %v5382_v48  ;;  %v781_v51 = vmul.f32 %v3355_v27, %v769_v16  ;;  %s3738_s15 = sld [smem:[#allocation8 + $0x11]] }
 0x2ab   : > { %v761_v62 = vsel %vm5464_vm7, %v755_v21, 0.0  ;;  %v3588_v34 = vadd.f32 %v760_v42, %v650_v37  ;;  %vm779_vm7 = vmand %vm3399_vm12, %vm5466_vm5  ;;  %v3623_v56 = vpop.permute.xlu0 %1118  ;;  %v880_v42 = vmul.f32 %v879_v45, %v2737_v11 }
 0x2ac   : > { %v3590_v59 = vadd.f32 %v761_v62, %v651_v0  ;;  %vm5468_vm0 = vmmov %vm5467_vm15  ;;  %v787_v58 = vsel %vm779_vm7, %v781_v51, 0.0  ;;  %vm5473_vm15 = vcmp.lt.s32.totalorder %v2840_v7, 32  ;;  %v851_v0 = vmul.f32 %v2734_v60, %v850_v61  ;;  %1657 = vrot.lane.b32.xlu1 %v2748_v25, %s5481_s29  ;;  %s3993_s29 = sld [smem:[#allocation8 + $0x17]] }
 0x2ad   : > { %v770_v9 = vsel %vm5468_vm0, %v767_v10, %v2889_v40  ;;  %vm5469_vm6 = vmand %vm3093_vm10, %vm3327_vm4 }
 0x2ae   : > { %v570_v32 = vsel %vm5469_vm6, %v564_v26, 0.0  ;;  %vm5470_vm5 = vmand %vm3117_vm13, %vm5456_vm1  ;;  %v780_v41 = vmul.f32 %v3355_v27, %v770_v9  ;;  %v793_v27 = vpop.permute.xlu1 %792  ;;  %v910_v9 = vstv %s3558_s5  ;;  %s5492_s5 = smov 82  }
 0x2af   : > { %v571_v38 = vsel %vm5470_vm5, %v565_v17, 0.0  ;;  %v676_v40 = vadd.f32 %v674_v18, %v570_v32  ;;  %vm5472_vm6 = vmand %vm3369_vm11, %vm5465_vm2  ;;  %v795_v17 = vsel %vm5473_vm15, %v2908_v44, %v793_v27  ;;  %v854_v18 = vmul.f32 %v853_v29, %v2737_v11  ;;  %v3666_v10 = vpop.permute.xlu0 %1144 }
 0x2b0   : > { %v677_v1 = vadd.f32 %v675_v13, %v571_v38  ;;  %v786_v43 = vsel %vm5472_vm6, %v780_v41, 0.0  ;;  %vm804_vm10 = vmand %vm3369_vm11, %vm5446_vm14  ;;  %v807_v37 = vmul.f32 %v3357_v4, %v795_v17  ;;  %vm846_vm5 = vcmp.lt.s32.totalorder %v2840_v7, 30  ;;  %1683 = vrot.lane.b32.xlu1 %v2748_v25, %s5492_s5  ;;  %s4092_s5 = sld [smem:[#allocation8 + $0x1b]] }
 0x2b1   : > { %v3631_v23 = vadd.f32 %v786_v43, %v676_v40  ;;  %vm805_vm13 = vmand %vm3399_vm12, %vm5448_vm9  ;;  %v877_v13 = vmul.f32 %v2734_v60, %v876_v33  ;;  %v913_v32 = vstv %s3586_s16  ;;  %s3832_s16 = sld [smem:[#allocation8 + $0x13]] }
 0x2b2   : > { %v3633_v26 = vadd.f32 %v787_v58, %v677_v1  ;;  %vm5474_vm0 = vmmov %vm5473_vm15  ;;  %v813_v62 = vsel %vm805_vm13, %v807_v37, 0.0  ;;  %v819_v16 = vpop.permute.xlu1 %818  ;;  %v911_v58 = vmul.f32 %v2734_v60, %v910_v9  ;;  %v962_v9 = vstv %s3674_s11  ;;  %s3930_s11 = sld [smem:[#allocation8 + $0x47]] }
 0x2b3   : > { %v796_v2 = vsel %vm5474_vm0, %v793_v27, %v2908_v44  ;;  %v3655_v44 = vadd.f32 -1.0, %v2872_v12  ;;  %vm830_vm7 = vmand %vm3369_vm11, %vm5450_vm3  ;;  %v3682_v41 = vadd.f32 %v813_v62, %v3448_v49  ;;  %v5477_v49 = vld [vmem:[#allocation17_spill] sm:$0xff]  ;;  %v881_v43 = vadd.f32 %v880_v42, %v877_v13 }
 0x2b4   : > { %v806_v21 = vmul.f32 %v3357_v4, %v796_v2  ;;  %vm831_vm6 = vmand %vm3399_vm12, %vm5452_vm8  ;;  %v895_v29 = vadd.f32 -1.0, %v5477_v49  ;;  %v914_v27 = vmul.f32 %v913_v32, %v2737_v11  ;;  %vm5478_vm0 = vnez %v5410_v54  ;;  %v5480_v2 = vld [vmem:[#allocation18_spill] sm:$0xff]  ;;  %1709 = vrot.lane.b32.xlu1 %v2748_v25, %s2442_s21  ;;  %s3847_s21 = sld [smem:[#allocation8 + $0x14]] }
 0x2b5   : > { %v936_v13 = vstv %s3657_s10  ;;  %v939_v42 = vstv %s3659_s24  ;;  %v965_v32 = vstv %s3676_s8  ;;  %vm5489_vm8 = vcmp.ge.f32.partialorder %v3655_v44, 0.0  ;;  %s3849_s10 = sld [smem:[#allocation8 + $0x45]]  ;;  %s3908_s24 = sld [smem:[#allocation8 + $0x46]] }
 0x2b6   : > { %v812_v4 = vsel %vm804_vm10, %v806_v21, 0.0  ;;  %vm5475_vm10 = vcmp.lt.s32.totalorder %v2840_v7, 31  ;;  %v845_v33 = vpop.permute.xlu1 %844  ;;  %vm5494_vm3 = vcmp.ge.f32.partialorder %v895_v29, 0.0  ;;  %s3954_s8 = sld [smem:[#allocation8 + $0x18]] }
 0x2b7   : > { %v3679_v38 = vadd.f32 %v812_v4, %v3446_v31  ;;  %v821_v51 = vsel %vm5475_vm10, %v2935_v53, %v819_v16  ;;  %vm5476_vm13 = vmmov %vm5475_vm10  ;;  %v855_v31 = vadd.f32 %v854_v18, %v851_v0  ;;  %v847_v21 = vsel %vm846_vm5, %v5480_v2, %v845_v33  ;;  %v3727_v0 = vpop.permute.xlu0 %1189 }
 0x2b8   : > { %v822_v40 = vsel %vm5476_vm13, %v819_v16, %v2935_v53  ;;  %v833_v61 = vmul.f32 %v829_v55, %v821_v51  ;;  %v848_v37 = vsel %vm846_vm5, %v845_v33, %v5480_v2  ;;  %vm898_vm13 = vcmp.le.f32.partialorder %v3655_v44, 15.0  ;;  %vm5483_vm5 = vmand %vm3369_vm11, %vm5478_vm0  ;;  %1735 = vrot.lane.b32.xlu1 %v2748_v25, %s2443_s22  ;;  %s3906_s22 = sld [smem:[#allocation8 + $0x15]] }
 0x2b9   : > { %v832_v1 = vmul.f32 %v829_v55, %v822_v40  ;;  %v859_v18 = vmul.f32 %v855_v31, %v847_v21  ;;  %vm5485_vm10 = vnez %v5406_v5  ;;  %vm5493_vm0 = vcmp.le.f32.partialorder %v895_v29, 15.0 }
 0x2ba   : > { %v839_v55 = vsel %vm831_vm6, %v833_v61, 0.0  ;;  %vm5482_vm6 = vnez %v5398_v47  ;;  %v871_v16 = vpop.permute.xlu1 %870  ;;  %v963_v44 = vmul.f32 %v2734_v60, %v962_v9  ;;  %v966_v33 = vmul.f32 %v965_v32, %v2737_v11 }
 0x2bb   : > { %v838_v53 = vsel %vm830_vm7, %v832_v1, 0.0  ;;  %v3715_v17 = vadd.f32 %v839_v55, %v3529_v50  ;;  %vm5479_vm7 = vnez %v5435_v35  ;;  %v915_v50 = vadd.f32 %v914_v27, %v911_v58  ;;  %v5486_v1 = vld [vmem:[#allocation19_spill] sm:$0xff]  ;;  %v3794_v2 = vpop.permute.xlu0 %1215 }
 0x2bc   : > { %v3712_v45 = vadd.f32 %v838_v53, %v3527_v36  ;;  %v858_v36 = vmul.f32 %v855_v31, %v848_v37  ;;  %vm5484_vm15 = vmand %vm3399_vm12, %vm5479_vm7  ;;  %v937_v53 = vmul.f32 %v2734_v60, %v936_v13  ;;  %v940_v55 = vmul.f32 %v939_v42, %v2737_v11  ;;  %1761 = vrot.lane.b32.xlu1 %v2748_v25, %s2444_s27  ;;  %s3928_s27 = sld [smem:[#allocation8 + $0x16]] }
 0x2bd   : > { %v865_v62 = vsel %vm5484_vm15, %v859_v18, 0.0  ;;  %vm5487_vm15 = vcmp.lt.s32.totalorder %v2840_v7, 29  ;;  %vm3778_vm7 = vmand %vm5489_vm8, %vm898_vm13  ;;  %vm958_vm13 = vcmp.lt.s32.totalorder %v2840_v7, 17  ;;  %v967_v42 = vadd.f32 %v966_v33, %v963_v44 }
 0x2be   : > { %v864_v4 = vsel %vm5483_vm5, %v858_v36, 0.0  ;;  %v3766_v40 = vadd.f32 %v865_v62, %v3590_v59  ;;  %v873_v61 = vsel %vm5487_vm15, %v5486_v1, %v871_v16  ;;  %vm5488_vm5 = vmmov %vm5487_vm15  ;;  %v905_v21 = vpop.permute.xlu1 %904  ;;  %v991_v62 = vstv %s3740_s7  ;;  %s4015_s7 = sld [smem:[#allocation8 + $0x4a]] }
 0x2bf   : > { %v3763_v51 = vadd.f32 %v864_v4, %v3588_v34  ;;  %v874_v31 = vsel %vm5488_vm5, %v871_v16, %v5486_v1  ;;  %v885_v27 = vmul.f32 %v881_v43, %v873_v61  ;;  %vm3786_vm15 = vmand %vm5494_vm3, %vm5493_vm0  ;;  %vm5499_vm0 = vnez %v5362_v52 }
 0x2c0   : > { %v884_v34 = vmul.f32 %v881_v43, %v874_v31  ;;  %vm5497_vm8 = vmand %vm3369_vm11, %vm5482_vm6  ;;  %vm5500_vm11 = vnez %v5364_v46  ;;  %vm5502_vm5 = vcmp.lt.s32.totalorder %v2840_v7, 19  ;;  %v988_v4 = vstv %s3738_s15  ;;  %1787 = vrot.lane.b32.xlu1 %v2748_v25, %s2445_s9  ;;  %s3967_s9 = sld [smem:[#allocation8 + $0x49]]  ;;  %s3995_s15 = sld [smem:[#allocation8 + $0x48]] }
 0x2c1   : > { %vm5498_vm3 = vmand %vm3399_vm12, %vm5485_vm10  ;;  %v907_v36 = vsel %vm5502_vm5, %v5501_v8, %v905_v21  ;;  %v1014_v32 = vstv %s3758_s28  ;;  %v1017_v1 = vstv %s3760_s30  ;;  %v992_v33 = vmul.f32 %v991_v62, %v2737_v11  ;;  %s4050_s28 = sld [smem:[#allocation8 + $0x1a]]  ;;  %s4052_s30 = sld [smem:[#allocation8 + $0x4b]] }
 0x2c2   : > { %v890_v29 = vsel %vm5497_vm8, %v884_v34, 0.0  ;;  %v891_v43 = vsel %vm5498_vm3, %v885_v27, 0.0  ;;  %vm917_vm12 = vmand %vm3786_vm15, %vm5500_vm11  ;;  %vm932_vm3 = vcmp.lt.s32.totalorder %v2840_v7, 18  ;;  %v931_v9 = vpop.permute.xlu1 %930  ;;  %v5505_v34 = vld [vmem:[#allocation21_spill] sm:$0xff] }
 0x2c3   : > { %v3811_v30 = vadd.f32 %v890_v29, %v3631_v23  ;;  %v3814_v37 = vadd.f32 %v891_v43, %v3633_v26  ;;  %vm5503_vm8 = vmmov %vm5502_vm5  ;;  %v919_v23 = vmul.f32 %v915_v50, %v907_v36  ;;  %v941_v26 = vadd.f32 %v940_v55, %v937_v53  ;;  %v3867_v55 = vpop.permute.xlu0 %1241 }
 0x2c4   : > { %v908_v18 = vsel %vm5503_vm8, %v905_v21, %v5501_v8  ;;  %vm5504_vm5 = vmand %vm3778_vm7, %vm5499_vm0  ;;  %v933_v27 = vsel %vm932_vm3, %v5505_v34, %v931_v9  ;;  %v934_v53 = vsel %vm932_vm3, %v931_v9, %v5505_v34  ;;  %v1015_v29 = vmul.f32 %v2734_v60, %v1014_v32  ;;  %1813 = vrot.lane.b32.xlu1 %v2748_v25, %s2446_s12  ;;  %s4013_s12 = sld [smem:[#allocation8 + $0x19]] }
 0x2c5   : > { %v918_v13 = vmul.f32 %v915_v50, %v908_v18  ;;  %v925_v16 = vsel %vm917_vm12, %v919_v23, 0.0  ;;  %vm942_vm8 = vmand %vm3778_vm7, %vm3327_vm4  ;;  %v945_v44 = vmul.f32 %v941_v26, %v933_v27  ;;  %v1018_v43 = vmul.f32 %v1017_v1, %v2737_v11  ;;  %v5507_v23 = vld [vmem:[#allocation24_spill] sm:$0xff] }
 0x2c6   : > { %v3855_v31 = vadd.f32 %v925_v16, %v3682_v41  ;;  %vm943_vm12 = vmand %vm3786_vm15, %vm5456_vm1  ;;  %v989_v41 = vmul.f32 %v2734_v60, %v988_v4  ;;  %v957_v36 = vpop.permute.xlu1 %956  ;;  %v1040_v16 = vstv %s3832_s16  ;;  %v1043_v9 = vstv %s3834_s26  ;;  %s4094_s16 = sld [smem:[#allocation8 + $0x4c]] }
 0x2c7   : > { %v924_v50 = vsel %vm5504_vm5, %v918_v13, 0.0  ;;  %v951_v8 = vsel %vm943_vm12, %v945_v44, 0.0  ;;  %vm968_vm3 = vmand %vm3778_vm7, %vm5465_vm2  ;;  %vm5506_vm5 = vnez %v5382_v48  ;;  %v960_v4 = vsel %vm958_vm13, %v957_v36, %v5507_v23  ;;  %v3910_v32 = vpop.permute.xlu0 %1275  ;;  %s4147_s26 = sld [smem:[#allocation8 + $0x1c]] }
 0x2c8   : > { %v3852_v61 = vadd.f32 %v924_v50, %v3679_v38  ;;  %v944_v38 = vmul.f32 %v941_v26, %v934_v53  ;;  %v3888_v13 = vadd.f32 %v951_v8, %v3715_v17  ;;  %v959_v26 = vsel %vm958_vm13, %v5507_v23, %v957_v36  ;;  %vm5508_vm13 = vmand %vm3786_vm15, %vm5506_vm5 }
 0x2c9   : > { %v970_v62 = vmul.f32 %v967_v42, %v960_v4  ;;  %vm984_vm12 = vcmp.lt.s32.totalorder %v2840_v7, 16  ;;  %v993_v17 = vadd.f32 %v992_v33, %v989_v41  ;;  %v1019_v50 = vadd.f32 %v1018_v43, %v1015_v29  ;;  %v5509_v41 = vld [vmem:[#allocation25_spill] sm:$0xff] }
 0x2ca   : > { %v950_v21 = vsel %vm942_vm8, %v944_v38, 0.0  ;;  %vm994_vm8 = vmand %vm3778_vm7, %vm5446_vm14  ;;  %v983_v34 = vpop.permute.xlu1 %982  ;;  %v1066_v27 = vstv %s3847_s21  ;;  %v1069_v53 = vstv %s3849_s10  ;;  %vm1122_vm2 = vcmp.lt.s32.totalorder %v2840_v7, 2  ;;  %s4169_s21 = sld [smem:[#allocation8 + $0x4d]] }
 0x2cb   : > { %v3885_v18 = vadd.f32 %v950_v21, %v3712_v45  ;;  %v971_v45 = vmul.f32 %v967_v42, %v959_v26  ;;  %v976_v42 = vsel %vm968_vm3, %v970_v62, 0.0  ;;  %vm995_vm3 = vmand %vm3786_vm15, %vm5448_vm9  ;;  %v985_v33 = vsel %vm984_vm12, %v5509_v41, %v983_v34  ;;  %s4184_s10 = sld [smem:[#allocation8 + $0x1d]] }
 0x2cc   : > { %v3933_v38 = vadd.f32 %v976_v42, %v3763_v51  ;;  %v986_v29 = vsel %vm984_vm12, %v983_v34, %v5509_v41  ;;  %v997_v21 = vmul.f32 %v993_v17, %v985_v33  ;;  %v1041_v51 = vmul.f32 %v2734_v60, %v1040_v16 }
 0x2cd   : > { %v977_v1 = vsel %vm5508_vm13, %v971_v45, 0.0  ;;  %v996_v43 = vmul.f32 %v993_v17, %v986_v29  ;;  %v1067_v8 = vmul.f32 %v2734_v60, %v1066_v27  ;;  %v1070_v36 = vmul.f32 %v1069_v53, %v2737_v11 }
 0x2ce   : > { %v3936_v44 = vadd.f32 %v977_v1, %v3766_v40  ;;  %v1044_v40 = vmul.f32 %v1043_v9, %v2737_v11  ;;  %v1003_v26 = vsel %vm995_vm3, %v997_v21, 0.0  ;;  %vm5510_vm12 = vnez %v5386_v3  ;;  %v1009_v4 = vpop.permute.xlu1 %1008  ;;  %v3985_v9 = vpop.permute.xlu0 %1301 }
 0x2cf   : > { %v1002_v23 = vsel %vm994_vm8, %v996_v43, 0.0  ;;  %v3973_v45 = vadd.f32 %v1003_v26, %v3814_v37  ;;  %vm5511_vm8 = vnez %v5391_v22  ;;  %vm5512_vm9 = vcmp.lt.s32.totalorder %v2840_v7, 15 }
 0x2d0   : > { %v3970_v62 = vadd.f32 %v1002_v23, %v3811_v30  ;;  %v1011_v17 = vsel %vm5512_vm9, %v3349_v39, %v1009_v4  ;;  %vm5513_vm5 = vmmov %vm5512_vm9  ;;  %v1045_v42 = vadd.f32 %v1044_v40, %v1041_v51  ;;  %v1071_v1 = vadd.f32 %v1070_v36, %v1067_v8 }
 0x2d1   : > { %v1012_v16 = vsel %vm5513_vm5, %v1009_v4, %v3349_v39  ;;  %v1023_v37 = vmul.f32 %v1019_v50, %v1011_v17  ;;  %v1100_v34 = vstv %s3906_s22  ;;  %v1103_v27 = vstv %s3908_s24  ;;  %vm5514_vm9 = vmand %vm3778_vm7, %vm5510_vm12  ;;  %s4186_s22 = sld [smem:[#allocation8 + $0x4e]] }
 0x2d2   : > { %v1022_v30 = vmul.f32 %v1019_v50, %v1012_v16  ;;  %vm5515_vm5 = vmand %vm3786_vm15, %vm5511_vm8  ;;  %vm5516_vm3 = vnez %v5410_v54  ;;  %v1035_v53 = vpop.permute.xlu1 %1034  ;;  %v1126_v41 = vstv %s3928_s27  ;;  %v1129_v33 = vstv %s3930_s11  ;;  %v4039_v26 = vpop.permute.xlu0 %1327  ;;  %s4244_s24 = sld [smem:[#allocation8 + $0x1e]]  ;;  %s4246_s27 = sld [smem:[#allocation8 + $0x4f]] }
 0x2d3   : > { %v1029_v50 = vsel %vm5515_vm5, %v1023_v37, 0.0  ;;  %vm5518_vm13 = vcmp.lt.s32.totalorder %v2840_v7, 14  ;;  %v1104_v8 = vmul.f32 %v1103_v27, %v2737_v11  ;;  %vm1088_vm8 = vcmp.le.f32.partialorder %v2872_v12, 15.0  ;;  %s2079_s11 = sld [smem:[#allocation8 + $0x1f]] }
 0x2d4   : > { %v1028_v39 = vsel %vm5514_vm9, %v1022_v30, 0.0  ;;  %v4021_v43 = vadd.f32 %v1029_v50, %v3855_v31  ;;  %vm5517_vm9 = vnez %v5435_v35  ;;  %v1037_v21 = vsel %vm5518_vm13, %v3440_v20, %v1035_v53  ;;  %vm5519_vm14 = vmmov %vm5518_vm13 }
 0x2d5   : > { %v4018_v29 = vadd.f32 %v1028_v39, %v3852_v61  ;;  %vm1047_vm5 = vmand %vm3786_vm15, %vm5517_vm9  ;;  %v1038_v51 = vsel %vm5519_vm14, %v1035_v53, %v3440_v20  ;;  %v1049_v61 = vmul.f32 %v1045_v42, %v1037_v21  ;;  %v1101_v31 = vmul.f32 %v2734_v60, %v1100_v34 }
 0x2d6   : > { %v1048_v40 = vmul.f32 %v1045_v42, %v1038_v51  ;;  %v1127_v36 = vmul.f32 %v2734_v60, %v1126_v41  ;;  %v1130_v23 = vmul.f32 %v1129_v33, %v2737_v11  ;;  %vm5520_vm14 = vmand %vm3778_vm7, %vm5516_vm3  ;;  %v1061_v17 = vpop.permute.xlu1 %1060  ;;  %v1171_v16 = vstv %s3954_s8  ;;  %s2080_s8 = sld [smem:[#allocation8 + $0x50]] }
 0x2d7   : > { %v1055_v4 = vsel %vm1047_vm5, %v1049_v61, 0.0  ;;  %v1174_v30 = vstv %s3967_s9  ;;  %vm5523_vm9 = vcmp.ge.f32.partialorder %v2872_v12, 0.0  ;;  %vm1096_vm5 = vcmp.lt.s32.totalorder %v2840_v7, 3  ;;  %s4424_s9 = sld [smem:[#allocation8 + $0x20]] }
 0x2d8   : > { %v1054_v20 = vsel %vm5520_vm14, %v1048_v40, 0.0  ;;  %v4060_v42 = vadd.f32 %v1055_v4, %v3888_v13  ;;  %vm5521_vm14 = vcmp.lt.s32.totalorder %v2840_v7, 13  ;;  %vm4076_vm3 = vmand %vm5523_vm9, %vm1088_vm8  ;;  %v1105_v50 = vadd.f32 %v1104_v8, %v1101_v31 }
 0x2d9   : > { %v4057_v37 = vadd.f32 %v1054_v20, %v3885_v18  ;;  %v1063_v34 = vsel %vm5521_vm14, %v3517_v57, %v1061_v17  ;;  %vm5522_vm13 = vmmov %vm5521_vm14  ;;  %vm5526_vm14 = vcmp.le.f32.partialorder %v5477_v49, 15.0  ;;  %vm5527_vm12 = vcmp.ge.f32.partialorder %v5477_v49, 0.0 }
 0x2da   : > { %v1064_v27 = vsel %vm5522_vm13, %v1061_v17, %v3517_v57  ;;  %v1075_v18 = vmul.f32 %v1071_v1, %v1063_v34  ;;  %vm4085_vm13 = vmand %vm5527_vm12, %vm5526_vm14  ;;  %v1152_v53 = vstv %s3993_s29  ;;  %v1155_v41 = vstv %s3995_s15  ;;  %v1095_v51 = vpop.permute.xlu1 %1094  ;;  %s4426_s29 = sld [smem:[#allocation8 + $0x51]] }
 0x2db   : > { %v1074_v39 = vmul.f32 %v1071_v1, %v1064_v27  ;;  %v1131_v1 = vadd.f32 %v1130_v23, %v1127_v36  ;;  %vm5530_vm8 = vmand %vm3778_vm7, %vm5482_vm6  ;;  %v1197_v40 = vstv %s4013_s12  ;;  %v1200_v61 = vstv %s4015_s7  ;;  %s4430_s15 = sld [smem:[#allocation8 + $0x21]]  ;;  %s4432_s12 = sld [smem:[#allocation8 + $0x52]] }
 0x2dc   : > { %vm5531_vm12 = vmand %vm3786_vm15, %vm5485_vm10  ;;  %v1097_v59 = vsel %vm1096_vm5, %v3580_v28, %v1095_v51  ;;  %v1098_v8 = vsel %vm1096_vm5, %v1095_v51, %v3580_v28  ;;  %v1153_v23 = vmul.f32 %v2734_v60, %v1152_v53  ;;  %v1156_v20 = vmul.f32 %v1155_v41, %v2737_v11  ;;  %s4434_s7 = sld [smem:[#allocation8 + $0x22]] }
 0x2dd   : > { %v1080_v33 = vsel %vm5530_vm8, %v1074_v39, 0.0  ;;  %v1081_v21 = vsel %vm5531_vm12, %v1075_v18, 0.0  ;;  %vm1106_vm9 = vmand %vm4076_vm3, %vm5499_vm0  ;;  %v1108_v36 = vmul.f32 %v1105_v50, %v1098_v8  ;;  %v1198_v4 = vmul.f32 %v2734_v60, %v1197_v40 }
 0x2de   : > { %v4113_v58 = vadd.f32 %v1080_v33, %v3933_v38  ;;  %v4116_v31 = vadd.f32 %v1081_v21, %v3936_v44  ;;  %vm1107_vm7 = vmand %vm4085_vm13, %vm5500_vm11  ;;  %v4128_v38 = vpop.permute.xlu0 %1353  ;;  %v1109_v44 = vmul.f32 %v1105_v50, %v1097_v59  ;;  %v1201_v17 = vmul.f32 %v1200_v61, %v2737_v11  ;;  %v1121_v18 = vpop.permute.xlu1 %1120 }
 0x2df   : > { %v1172_v34 = vmul.f32 %v2734_v60, %v1171_v16  ;;  %v1175_v27 = vmul.f32 %v1174_v30, %v2737_v11  ;;  %v1114_v28 = vsel %vm1106_vm9, %v1108_v36, 0.0  ;;  %vm1132_vm15 = vmand %vm4076_vm3, %vm3327_vm4  ;;  %v1223_v50 = vstv %s4050_s28  ;;  %s4436_s28 = sld [smem:[#allocation8 + $0x53]] }
 0x2e0   : > { %v1115_v39 = vsel %vm1107_vm7, %v1109_v44, 0.0  ;;  %v1226_v53 = vstv %s4052_s30  ;;  %v4150_v16 = vadd.f32 %v1114_v28, %v3970_v62  ;;  %vm1133_vm5 = vmand %vm4085_vm13, %vm5456_vm1  ;;  %v1123_v41 = vsel %vm1122_vm2, %v3623_v56, %v1121_v18  ;;  %s4442_s30 = sld [smem:[#allocation8 + $0x23]] }
 0x2e1   : > { %v4153_v30 = vadd.f32 %v1115_v39, %v3973_v45  ;;  %v1124_v33 = vsel %vm1122_vm2, %v1121_v18, %v3623_v56  ;;  %v1135_v51 = vmul.f32 %v1131_v1, %v1123_v41  ;;  %vm1148_vm14 = vcmp.lt.s32.totalorder %v2840_v7, 1 }
 0x2e2   : > { %v1134_v21 = vmul.f32 %v1131_v1, %v1124_v33  ;;  %v1157_v62 = vadd.f32 %v1156_v20, %v1153_v23  ;;  %vm1193_vm8 = vcmp.lt.s32.totalorder %v2840_v7, 127  ;;  %v1202_v45 = vadd.f32 %v1201_v17, %v1198_v4  ;;  %v4171_v59 = vpop.permute.xlu0 %1379  ;;  %v1147_v1 = vpop.permute.xlu1 %1146 }
 0x2e3   : > { %v1249_v40 = vstv %s4092_s5  ;;  %v1252_v61 = vstv %s4094_s16  ;;  %v1141_v8 = vsel %vm1133_vm5, %v1135_v51, 0.0  ;;  %vm5532_vm2 = vnez %v5377_v24  ;;  %s4444_s5 = sld [smem:[#allocation8 + $0x54]] }
 0x2e4   : > { %v1140_v56 = vsel %vm1132_vm15, %v1134_v21, 0.0  ;;  %vm1158_vm12 = vmand %vm4076_vm3, %vm5532_vm2  ;;  %v1224_v36 = vmul.f32 %v2734_v60, %v1223_v50  ;;  %v1227_v44 = vmul.f32 %v1226_v53, %v2737_v11  ;;  %v4192_v20 = vadd.f32 %v1141_v8, %v4021_v43  ;;  %s4446_s16 = sld [smem:[#allocation8 + $0x24]] }
 0x2e5   : > { %v4189_v23 = vadd.f32 %v1140_v56, %v4018_v29  ;;  %vm5533_vm9 = vnez %v5382_v48  ;;  %v1149_v4 = vsel %vm1148_vm14, %v3666_v10, %v1147_v1  ;;  %v1150_v17 = vsel %vm1148_vm14, %v1147_v1, %v3666_v10 }
 0x2e6   : > { %vm1159_vm7 = vmand %vm4085_vm13, %vm5533_vm9  ;;  %v1160_v28 = vmul.f32 %v1157_v62, %v1150_v17  ;;  %v1161_v29 = vmul.f32 %v1157_v62, %v1149_v4  ;;  %v1250_v39 = vmul.f32 %v2734_v60, %v1249_v40  ;;  %v1253_v43 = vmul.f32 %v1252_v61, %v2737_v11  ;;  %v1192_v10 = vpop.permute.xlu1 %1191  ;;  %v4234_v40 = vpop.permute.xlu0 %1405 }
 0x2e7   : > { %v1176_v18 = vadd.f32 %v1175_v27, %v1172_v34  ;;  %v1267_v50 = vadd.f32 1.0, %v2872_v12  ;;  %vm5534_vm5 = vnez %v5386_v3  ;;  %v1228_v33 = vadd.f32 %v1227_v44, %v1224_v36 }
 0x2e8   : > { %v1166_v53 = vsel %vm1158_vm12, %v1160_v28, 0.0  ;;  %v1167_v41 = vsel %vm1159_vm7, %v1161_v29, 0.0  ;;  %v1283_v21 = vstv %s4147_s26  ;;  %vm5535_vm15 = vnez %v5391_v22  ;;  %s4448_s26 = sld [smem:[#allocation8 + $0x55]] }
 0x2e9   : > { %v4219_v34 = vadd.f32 %v1166_v53, %v4057_v37  ;;  %v4222_v27 = vadd.f32 %v1167_v41, %v4060_v42  ;;  %v1194_v51 = vsel %vm1193_vm8, %v3727_v0, %v1192_v10  ;;  %v1195_v62 = vsel %vm1193_vm8, %v1192_v10, %v3727_v0  ;;  %vm5537_vm8 = vmand %vm4076_vm3, %vm5534_vm5 }
 0x2ea   : > { %v1205_v37 = vmul.f32 %v1202_v45, %v1194_v51  ;;  %v1206_v42 = vmul.f32 %v1202_v45, %v1195_v62  ;;  %v1254_v61 = vadd.f32 %v1253_v43, %v1250_v39  ;;  %vm5536_vm14 = vnez %v5368_v63  ;;  %vm5538_vm12 = vmand %vm4085_vm13, %vm5535_vm15  ;;  %v1218_v36 = vpop.permute.xlu1 %1217  ;;  %v4291_v41 = vpop.permute.xlu0 %1431 }
 0x2eb   : > { %v1268_v56 = vadd.f32 1.0, %v5477_v49  ;;  %v1284_v8 = vmul.f32 %v2734_v60, %v1283_v21  ;;  %v1286_v0 = vstv %s4169_s21  ;;  %vm5539_vm9 = vnez %v5410_v54  ;;  %s4450_s21 = sld [smem:[#allocation8 + $0x25]] }
 0x2ec   : > { %v1211_v45 = vsel %vm5537_vm8, %v1205_v37, 0.0  ;;  %v1212_v1 = vsel %vm5538_vm12, %v1206_v42, 0.0  ;;  %v1309_v44 = vstv %s4184_s10  ;;  %v1312_v4 = vstv %s4186_s22  ;;  %s4452_s10 = sld [smem:[#allocation8 + $0x56]] }
 0x2ed   : > { %v4265_v17 = vadd.f32 %v1211_v45, %v4150_v16  ;;  %v4268_v28 = vadd.f32 %v1212_v1, %v4153_v30  ;;  %vm5540_vm8 = vnez %v5435_v35  ;;  %vm5541_vm12 = vcmp.lt.s32.totalorder %v2840_v7, 126  ;;  %s4456_s22 = sld [smem:[#allocation8 + $0x26]] }
 0x2ee   : > { %vm1230_vm15 = vmand %vm4085_vm13, %vm5540_vm8  ;;  %v1220_v29 = vsel %vm5541_vm12, %v3794_v2, %v1218_v36  ;;  %vm5543_vm5 = vnez %v5373_v19  ;;  %vm1271_vm1 = vcmp.le.f32.partialorder %v1267_v50, 15.0  ;;  %v1287_v16 = vmul.f32 %v1286_v0, %v2737_v11 }
 0x2ef   : > { %vm5542_vm7 = vmmov %vm5541_vm12  ;;  %v1231_v43 = vmul.f32 %v1228_v33, %v1220_v29  ;;  %v1180_v30 = vmul.f32 %v1176_v18, %v2748_v25  ;;  %vm1270_vm12 = vcmp.ge.f32.partialorder %v1268_v56, 0.0  ;;  %vm1272_vm4 = vcmp.le.f32.partialorder %v1268_v56, 15.0  ;;  %v1244_v25 = vpop.permute.xlu1 %1243 }
 0x2f0   : > { %v1221_v39 = vsel %vm5542_vm7, %v1218_v36, %v3794_v2  ;;  %v1179_v2 = vmul.f32 %v1176_v18, %v2742_v6  ;;  %vm5544_vm7 = vmand %vm4076_vm3, %vm5539_vm9  ;;  %v1310_v21 = vmul.f32 %v2734_v60, %v1309_v44  ;;  %v1313_v6 = vmul.f32 %v1312_v4, %v2737_v11 }
 0x2f1   : > { %v1232_v53 = vmul.f32 %v1228_v33, %v1221_v39  ;;  %v1237_v10 = vsel %vm5544_vm7, %v1231_v43, 0.0  ;;  %vm5545_vm7 = vcmp.lt.s32.totalorder %v2840_v7, 125  ;;  %vm5547_vm8 = vcmp.ge.f32.partialorder %v1267_v50, 0.0  ;;  %vm4320_vm9 = vmand %vm1270_vm12, %vm1272_vm4  ;;  %v4368_v39 = vpop.permute.xlu0 %1465 }
 0x2f2   : > { %v1239_v18 = vadd.f32 %v1237_v10, %v4189_v23  ;;  %v1246_v62 = vsel %vm5545_vm7, %v3867_v55, %v1244_v25  ;;  %vm4314_vm2 = vmand %vm5547_vm8, %vm1271_vm1  ;;  %v1338_v56 = vstv %s4246_s27  ;;  %v1314_v44 = vadd.f32 %v1313_v6, %v1310_v21  ;;  %s4462_s27 = sld [smem:[#allocation8 + $0x27]] }
 0x2f3   : > { %v1238_v33 = vsel %vm1230_vm15, %v1232_v53, 0.0  ;;  %vm5546_vm15 = vmmov %vm5545_vm7  ;;  %v1257_v0 = vmul.f32 %v1254_v61, %v1246_v62  ;;  %vm1279_vm7 = vcmp.lt.s32.totalorder %v2840_v7, 115  ;;  %v1278_v36 = vpop.permute.xlu1 %1277  ;;  %v1339_v53 = vmul.f32 %v1338_v56, %v2737_v11 }
 0x2f4   : > { %v1240_v51 = vadd.f32 %v1238_v33, %v4192_v20  ;;  %v1247_v37 = vsel %vm5546_vm15, %v1244_v25, %v3867_v55  ;;  %v1288_v20 = vadd.f32 %v1287_v16, %v1284_v8  ;;  %vm5552_vm15 = vmand %vm4085_vm13, %vm5543_vm5  ;;  %v1280_v57 = vsel %vm1279_vm7, %v3910_v32, %v1278_v36 }
 0x2f5   : > { %v1258_v45 = vmul.f32 %v1254_v61, %v1247_v37  ;;  %v1186_v55 = vsel %vm5552_vm15, %v1180_v30, 0.0  ;;  %vm5553_vm1 = vmand %vm4076_vm3, %vm5536_vm14  ;;  %v1335_v61 = vstv %s4244_s24  ;;  %vm1305_vm15 = vcmp.lt.s32.totalorder %v2840_v7, 114  ;;  %v4398_v37 = vpop.permute.xlu0 %1491  ;;  %s4458_s24 = sld [smem:[#allocation8 + $0x57]] }
 0x2f6   : > { %v1185_v50 = vsel %vm5553_vm1, %v1179_v2, 0.0  ;;  %vm5554_vm4 = vmand %vm4076_vm3, %vm5482_vm6  ;;  %v1281_v29 = vsel %vm1279_vm7, %v1278_v36, %v3910_v32  ;;  %v1188_v16 = vadd.f32 %v1186_v55, %v4116_v31  ;;  %vm5559_vm1 = vnez %v5418_v15 }
 0x2f7   : > { %v1263_v8 = vsel %vm5554_vm4, %v1257_v0, 0.0  ;;  %vm5555_vm8 = vmand %vm4085_vm13, %vm5485_vm10  ;;  %v1292_v43 = vmul.f32 %v1288_v20, %v1281_v29  ;;  %v1187_v30 = vadd.f32 %v1185_v50, %v4113_v58  ;;  %vm5556_vm13 = vnez %v5414_v14  ;;  %v1304_v32 = vpop.permute.xlu1 %1303 }
 0x2f8   : > { %v1264_v1 = vsel %vm5555_vm8, %v1258_v45, 0.0  ;;  %vm1289_vm12 = vmand %vm4314_vm2, %vm5499_vm0  ;;  %v4353_v13 = vadd.f32 %v1263_v8, %v4219_v34  ;;  %v1291_v34 = vmul.f32 %v1288_v20, %v1280_v57  ;;  %v1306_v58 = vsel %vm1305_vm15, %v3985_v9, %v1304_v32 }
 0x2f9   : > { %v4356_v4 = vadd.f32 %v1264_v1, %v4222_v27  ;;  %vm1290_vm3 = vmand %vm4320_vm9, %vm5500_vm11  ;;  %v1336_v27 = vmul.f32 %v2734_v60, %v1335_v61  ;;  %v1307_v31 = vsel %vm1305_vm15, %v1304_v32, %v3985_v9  ;;  %v1317_v21 = vmul.f32 %v1314_v44, %v1306_v58  ;;  %v4422_v57 = vpop.permute.xlu0 %1517 }
 0x2fa   : > { %v1297_v2 = vsel %vm1289_vm12, %v1291_v34, 0.0  ;;  %v1298_v10 = vsel %vm1290_vm3, %v1292_v43, 0.0  ;;  %vm1315_vm7 = vmand %vm4314_vm2, %vm5556_vm13  ;;  %v1318_v6 = vmul.f32 %v1314_v44, %v1307_v31  ;;  %vm1331_vm8 = vcmp.lt.s32.totalorder %v2840_v7, 113  ;;  %5566 = vst [vmem:[#allocation25_spill] sm:$0xff] %v4422_v57 }
 0x2fb   : > { %v4383_v33 = vadd.f32 %v1297_v2, %v1187_v30  ;;  %v4385_v25 = vadd.f32 %v1298_v10, %v1188_v16  ;;  %vm1316_vm4 = vmand %vm4320_vm9, %vm5559_vm1  ;;  %v1340_v62 = vadd.f32 %v1339_v53, %v1336_v27  ;;  %v1323_v0 = vsel %vm1315_vm7, %v1317_v21, 0.0  ;;  %v1330_v20 = vpop.permute.xlu1 %1329 }
 0x2fc   : > { %v1324_v45 = vsel %vm1316_vm4, %v1318_v6, 0.0  ;;  %vm5560_vm12 = vnez %v5377_v24  ;;  %v4405_v55 = vadd.f32 %v1323_v0, %v4265_v17  ;;  %vm5563_vm15 = vnez %v5382_v48 }
 0x2fd   : > { %5557 = vst [vmem:[#allocation17_spill] sm:$0xff] %v4383_v33  ;;  %5558 = vst [vmem:[#allocation18_spill] sm:$0xff] %v4385_v25  ;;  %v4408_v9 = vadd.f32 %v1324_v45, %v4268_v28  ;;  %v1332_v50 = vsel %vm1331_vm8, %v4039_v26, %v1330_v20  ;;  %v1333_v61 = vsel %vm1331_vm8, %v1330_v20, %v4039_v26  ;;  %v4438_v26 = vpop.permute.xlu0 %1543  ;;  %v1387_v16 = vstv %s4424_s9  ;;  %s4482_s9 = sld [smem:[#allocation8 + $0x5a]] }
 0x2fe   : > { %vm1341_vm3 = vmand %vm4314_vm2, %vm5560_vm12  ;;  %5561 = vst [vmem:[#allocation19_spill] sm:$0xff] %v4405_v55  ;;  %v1343_v56 = vmul.f32 %v1340_v62, %v1332_v50  ;;  %v1344_v8 = vmul.f32 %v1340_v62, %v1333_v61  ;;  %v1390_v30 = vstv %s4426_s29  ;;  %v1413_v2 = vstv %s4430_s15  ;;  %s4490_s29 = sld [smem:[#allocation8 + $0x2a]]  ;;  %s4492_s15 = sld [smem:[#allocation8 + $0x5b]] }
 0x2ff   : > { %5562 = vst [vmem:[#allocation20_spill] sm:$0xff] %v4408_v9  ;;  %vm1342_vm1 = vmand %vm4320_vm9, %vm5563_vm15  ;;  %v4416_v17 = vpop.permute.xlu1 %1355  ;;  %v1416_v10 = vstv %s4432_s12  ;;  %v1439_v58 = vstv %s4434_s7  ;;  %v1442_v31 = vstv %s4436_s28  ;;  %v1388_v6 = vmul.f32 %v2734_v60, %v1387_v16  ;;  %s4510_s12 = sld [smem:[#allocation8 + $0x2b]]  ;;  %s4512_s7 = sld [smem:[#allocation8 + $0x5c]] }
 0x300   : > { %v1349_v1 = vsel %vm1341_vm3, %v1343_v56, 0.0  ;;  %v1350_v36 = vsel %vm1342_vm1, %v1344_v8, 0.0  ;;  %5567 = vst [vmem:[#allocation26_spill] sm:$0xff] %v4438_v26  ;;  %v1391_v62 = vmul.f32 %v1390_v30, %v2737_v11  ;;  %v1414_v0 = vmul.f32 %v2734_v60, %v1413_v2  ;;  %s4522_s28 = sld [smem:[#allocation8 + $0x2c]] }
 0x301   : > { %v4418_v44 = vadd.f32 %v1349_v1, %v1239_v18  ;;  %v4420_v28 = vadd.f32 %v1350_v36, %v1240_v51  ;;  %v1361_v18 = vstv %s2079_s11  ;;  %v1364_v51 = vstv %s2080_s8  ;;  %s4464_s11 = sld [smem:[#allocation8 + $0x58]]  ;;  %v4474_v32 = vpop.permute.xlu0 %1569 }
 0x302   : > { %v1362_v43 = vmul.f32 %v2734_v60, %v1361_v18  ;;  %v1365_v27 = vmul.f32 %v1364_v51, %v2737_v11  ;;  %s4470_s8 = sld [smem:[#allocation8 + $0x28]]  ;;  %5568 = vst [vmem:[#allocation27_spill] sm:$0xff] %v4474_v32  ;;  %v1417_v45 = vmul.f32 %v1416_v10, %v2737_v11  ;;  %v1440_v50 = vmul.f32 %v2734_v60, %v1439_v58 }
 0x303   : > { %5564 = vst [vmem:[#allocation21_spill] sm:$0xff] %v4418_v44  ;;  %5565 = vst [vmem:[#allocation24_spill] sm:$0xff] %v4420_v28  ;;  %v4428_v29 = vpop.permute.xlu1 %1381  ;;  %v1443_v61 = vmul.f32 %v1442_v31, %v2737_v11  ;;  %v1473_v56 = vstv %s4442_s30  ;;  %v1476_v8 = vstv %s4444_s5  ;;  %v4499_v1 = vadd.f32 2.0, %v2872_v12  ;;  %s4524_s30 = sld [smem:[#allocation8 + $0x5d]] }
 0x304   : > { %v4478_v21 = vadd.f32 %v1365_v27, %v1362_v43  ;;  %v4502_v36 = vadd.f32 2.0, %v5477_v49  ;;  %v1499_v18 = vstv %s4446_s16  ;;  %v1502_v51 = vstv %s4448_s26  ;;  %s4530_s5 = sld [smem:[#allocation8 + $0x2d]]  ;;  %s4532_s16 = sld [smem:[#allocation8 + $0x5e]] }
 0x305   : > { %v1525_v43 = vstv %s4450_s21  ;;  %v1528_v27 = vstv %s4452_s10  ;;  %v1551_v16 = vstv %s4456_s22  ;;  %v1554_v30 = vstv %s4458_s24  ;;  %v4514_v2 = vpop.permute.xlu0 %1595  ;;  %s4545_s26 = sld [smem:[#allocation8 + $0x5f]]  ;;  %s4563_s21 = sld [smem:[#allocation8 + $0x60]] }
 0x306   : > { %5569 = vst [vmem:[#allocation28_spill] sm:$0xff] %v4514_v2  ;;  %v1474_v10 = vmul.f32 %v2734_v60, %v1473_v56  ;;  %v1477_v58 = vmul.f32 %v1476_v8, %v2737_v11  ;;  %v1577_v32 = vstv %s4462_s27  ;;  %v1500_v28 = vmul.f32 %v2734_v60, %v1499_v18  ;;  %s4576_s10 = sld [smem:[#allocation8 + $0x30]]  ;;  %s4578_s22 = sld [smem:[#allocation8 + $0x61]] }
 0x307   : > { %v4440_v34 = vpop.permute.xlu1 %1407  ;;  %v1580_v26 = vstv %s4464_s11  ;;  %v1503_v44 = vmul.f32 %v1502_v51, %v2737_v11  ;;  %v1606_v2 = vstv %s4472_s0  ;;  %vm1357_vm7 = vcmp.lt.s32.totalorder %v2840_v7, 112  ;;  %s4543_s0 = sld [smem:[#allocation8 + $0x2e]]  ;;  %s2123_s27 = sshll.u32 %s2497_s3, 8 }
 0x308   : > { %v1603_v57 = vstv %s4470_s8  ;;  %v1526_v56 = vmul.f32 %v2734_v60, %v1525_v43  ;;  %v1529_v8 = vmul.f32 %v1528_v27, %v2737_v11  ;;  %v1552_v48 = vmul.f32 %v2734_v60, %v1551_v16  ;;  %s1858_s24 = sld [smem:[#allocation2]]  ;;  %s5704_s11 = sshll.u32 %s2601_s25, 4 }
 0x309   : > { %v1555_v18 = vmul.f32 %v1554_v30, %v2737_v11  ;;  %v1578_v51 = vmul.f32 %v2734_v60, %v1577_v32  ;;  %v1581_v9 = vmul.f32 %v1580_v26, %v2737_v11  ;;  %v1629_v55 = vstv %s4480_s1  ;;  %s4561_s1 = sld [smem:[#allocation8 + $0x2f]]  ;;  %s241_s8 = scalar_lea.vmem [#allocation10], %s5704_s11 }
 0x30a   : > { %v1632_v25 = vstv %s4482_s9  ;;  %v1604_v43 = vmul.f32 %v2734_v60, %v1603_v57  ;;  %v1607_v27 = vmul.f32 %v1606_v2, %v2737_v11  ;;  %v1663_v16 = vstv %s4490_s29  ;;  %s1893_s9 = sshll.u32 %s241_s8, 4  ;;  %s1879_s3 = scalar_lea.sflag [#allocation5], %s2601_s25  ;;  %s5198_s9 = int_to_ptr.vmem [resolvable:$true] %s1893_s9 }
 0x30b   : > { %v4460_v53 = vpop.permute.xlu1 %1433  ;;  %v1666_v30 = vstv %s4492_s15  ;;  %v4554_v24 = vadd.f32 %v1391_v62, %v1388_v6  ;;  %v4557_v26 = vadd.f32 %v1417_v45, %v1414_v0  ;;  %v4559_v32 = vadd.f32 %v1443_v61, %v1440_v50 }
 0x30c   : > { %v4570_v57 = vadd.f32 %v1477_v58, %v1474_v10  ;;  %v4572_v6 = vadd.f32 %v1503_v44, %v1500_v28  ;;  %v1630_v62 = vmul.f32 %v2734_v60, %v1629_v55  ;;  %v1633_v0 = vmul.f32 %v1632_v25, %v2737_v11 }
 0x30d   : > { %v4582_v45 = vadd.f32 %v1529_v8, %v1526_v56  ;;  %v1664_v44 = vmul.f32 %v2734_v60, %v1663_v16  ;;  %v1667_v28 = vmul.f32 %v1666_v30, %v2737_v11  ;;  %v1689_v55 = vstv %s4510_s12  ;;  %s5196_s12 = scalar_lea.hbm %s5244_s4, %s2123_s27 }
 0x30e   : > { %v4587_v50 = vadd.f32 %v1555_v18, %v1552_v48  ;;  %v4591_v61 = vadd.f32 %v1581_v9, %v1578_v51  ;;  %v4593_v2 = vadd.f32 %v1607_v27, %v1604_v43  ;;  %v1692_v10 = vstv %s4512_s7  ;;  %s2318_s7 = scalar_lea.vmem %s5198_s9, 256 }
 0x30f   : > { %v4488_v20 = vpop.permute.xlu1 %1467  ;;  %v1715_v58 = vstv %s4522_s28  ;;  %v1741_v56 = vstv %s4530_s5  ;;  %v1744_v8 = vstv %s4532_s16  ;;  %v4605_v48 = vadd.f32 %v1633_v0, %v1630_v62  ;;  %p2319_p6 = scmp.ne.s32.totalorder %s5198_s9, %s2318_s7  ;;  %s2447_s28 = smov [#allocation10]  }
 0x310   : > { %5572 = vst [vmem:[#allocation31_spill] sm:$0xff] %v4587_v50  ;;  %5573 = vst [vmem:[#allocation32_spill] sm:$0xff] %v4591_v61  ;;  %v4608_v9 = vadd.f32 3.0, %v2872_v12  ;;  %v4611_v18 = vadd.f32 3.0, %v5477_v49  ;;  %v1690_v51 = vmul.f32 %v2734_v60, %v1689_v55  ;;  %v4618_v43 = vadd.f32 %v1667_v28, %v1664_v44 }
 0x311   : > { %5574 = vst [vmem:[#allocation33_spill] sm:$0xff] %v4593_v2  ;;  %5575 = vst [vmem:[#allocation34_spill] sm:$0xff] %v4605_v48  ;;  %v1693_v27 = vmul.f32 %v1692_v10, %v2737_v11  ;;  %v1767_v16 = vstv %s4543_s0  ;;  %v1770_v30 = vstv %s4545_s26  ;;  %vm5578_vm1 = vnez %v5386_v3  ;;  %p2320_p13 = pnand %p2319_p6, %p2555_p8 }
 0x312   : > { %5576 = vst [vmem:[#allocation35_spill] sm:$0xff] %v4618_v43  ;;  %v1716_v62 = vmul.f32 %v2734_v60, %v1715_v58  ;;  %v1742_v44 = vmul.f32 %v2734_v60, %v1741_v56  ;;  %v1745_v28 = vmul.f32 %v1744_v8, %v2737_v11  ;;  %v1358_v55 = vsel %vm1357_vm7, %v4128_v38, %v4416_v17 }
 0x313   : > { %v4518_v31 = vpop.permute.xlu1 %1493  ;;  %v1359_v10 = vsel %vm1357_vm7, %v4416_v17, %v4128_v38  ;;  %vm5579_vm4 = vnez %v5391_v22  ;;  %v1796_v58 = vstv %s4563_s21  ;;  %v1768_v56 = vmul.f32 %v2734_v60, %v1767_v16  ;;  %p2321_p3 = pneg %p2320_p13 }
 0x314   : > { %v1771_v8 = vmul.f32 %v1770_v30, %v2737_v11  ;;  %v1819_v43 = vstv %s4576_s10  ;;  %v1822_v48 = vstv %s4578_s22  ;;  %vm5581_vm7 = vcmp.lt.s32.totalorder %v2840_v7, 111 }
 0x315   : > { %v1384_v38 = vsel %vm5581_vm7, %v4171_v59, %v4428_v29  ;;  %vm5582_vm3 = vmmov %vm5581_vm7  ;;  %vm5583_vm12 = vnez %v5435_v35  ;;  %vm5584_vm13 = vcmp.lt.s32.totalorder %v2840_v7, 110  ;;  %v1797_v61 = vmul.f32 %v1796_v58, %v2737_v11 }
 0x316   : > { %v1385_v17 = vsel %vm5582_vm3, %v4428_v29, %v4171_v59  ;;  %v1410_v16 = vsel %vm5584_vm13, %v4234_v40, %v4440_v34  ;;  %vm5585_vm8 = vmmov %vm5584_vm13  ;;  %v1370_v59 = vmul.f32 %v4478_v21, %v1359_v10  ;;  %vm5586_vm13 = vcmp.lt.s32.totalorder %v2840_v7, 109 }
 0x317   : > { %v4548_v33 = vpop.permute.xlu1 %1519  ;;  %v1411_v30 = vsel %vm5585_vm8, %v4440_v34, %v4234_v40  ;;  %v1436_v40 = vsel %vm5586_vm13, %v4291_v41, %v4460_v53  ;;  %vm5587_vm8 = vmmov %vm5586_vm13  ;;  %vm5588_vm7 = vcmp.le.f32.partialorder %v4499_v1, 15.0  ;;  %vm5589_vm15 = vcmp.ge.f32.partialorder %v4499_v1, 0.0 }
 0x318   : > { %5570 = vst [vmem:[#allocation29_spill] sm:$0xff] %v4548_v33  ;;  %v4565_v33 = vpop.permute.xlu0 %1621  ;;  %v1437_v34 = vsel %vm5587_vm8, %v4460_v53, %v4291_v41  ;;  %vm4702_vm3 = vmand %vm5589_vm15, %vm5588_vm7  ;;  %v1823_v10 = vmul.f32 %v1822_v48, %v2737_v11  ;;  %v1395_v58 = vmul.f32 %v4554_v24, %v1384_v38  ;;  %v1396_v41 = vmul.f32 %v4554_v24, %v1385_v17  ;;  %v5612_v17 = vld [vmem:[#allocation22_spill] sm:$0xff] }
 0x319   : > { %5571 = vst [vmem:[#allocation30_spill] sm:$0xff] %v4565_v33  ;;  %v1718_v33 = vstv %s4524_s30  ;;  %v1421_v53 = vmul.f32 %v4557_v26, %v1410_v16  ;;  %v1422_v1 = vmul.f32 %v4557_v26, %v1411_v30  ;;  %vm5592_vm15 = vcmp.le.f32.partialorder %v4502_v36, 15.0  ;;  %vm5604_vm8 = vmand %vm4320_vm9, %vm5583_vm12  ;;  %v5614_v16 = vld [vmem:[#allocation17_spill] sm:$0xff]  ;;  %s2322_s30 = sshll.u32 %s2447_s28, 4  ;;  %s2323_s30 = int_to_ptr.vmem [resolvable:$false] %s2322_s30 }
 0x31a   : > { %v1719_v0 = vmul.f32 %v1718_v33, %v2737_v11  ;;  %v1793_v33 = vstv %s4561_s1  ;;  %vm5593_vm7 = vcmp.ge.f32.partialorder %v4502_v36, 0.0  ;;  %v4732_v24 = vadd.f32 %v1745_v28, %v1742_v44  ;;  %s2324_s5 = scalar_lea.vmem %s2323_s30, 512  ;;  %p2325_p7 = scmp.lt.s32.totalorder %s5198_s9, %s2323_s30 }
 0x31b   : > { %v4589_v25 = vpop.permute.xlu1 %1545  ;;  %v1794_v2 = vmul.f32 %v2734_v60, %v1793_v33  ;;  %vm4719_vm13 = vmand %vm5593_vm7, %vm5592_vm15  ;;  %v4734_v26 = vadd.f32 %v1771_v8, %v1768_v56  ;;  %vm5632_vm12 = vnez %v5386_v3  ;;  %p2326_p12 = scmp.lt.s32.totalorder %s2324_s5, %s2318_s7 }
 0x31c   : > { %v4623_v12 = vpop.permute.xlu0 %1655  ;;  %v4730_v11 = vadd.f32 %v1719_v0, %v1716_v62  ;;  %vm5596_vm15 = vmand %vm4314_vm2, %vm5536_vm14 }
 0x31d   : > { %5577 = vst [vmem:[#allocation36_spill] sm:$0xff] %v4623_v12  ;;  %v1369_v12 = vmul.f32 %v4478_v21, %v1358_v55  ;;  %v1820_v55 = vmul.f32 %v2734_v60, %v1819_v43  ;;  %v4728_v60 = vadd.f32 %v1693_v27, %v1690_v51  ;;  %vm5597_vm7 = vmand %vm4320_vm9, %vm5543_vm5  ;;  %v1447_v51 = vmul.f32 %v4559_v32, %v1436_v40  ;;  %p2327_p0 = por %p2326_p12, %p2325_p7 }
 0x31e   : > { %v1376_v48 = vsel %vm5597_vm7, %v1370_v59, 0.0  ;;  %v1448_v43 = vmul.f32 %v4559_v32, %v1437_v34  ;;  %vm5598_vm7 = vcmp.lt.s32.totalorder %v2840_v7, 99  ;;  %v4767_v62 = vadd.f32 %v1797_v61, %v1794_v2  ;;  %v5615_v59 = vld [vmem:[#allocation18_spill] sm:$0xff]  ;;  %v5616_v34 = vld [vmem:[#allocation19_spill] sm:$0xff] }
 0x31f   : > { %v4630_v49 = vpop.permute.xlu1 %1571  ;;  %v1375_v36 = vsel %vm5596_vm15, %v1369_v12, 0.0  ;;  %v1470_v12 = vsel %vm5598_vm7, %v4368_v39, %v4488_v20  ;;  %vm5599_vm6 = vmmov %vm5598_vm7  ;;  %v4769_v0 = vadd.f32 %v1823_v10, %v1820_v55  ;;  %v1378_v2 = vadd.f32 %v1376_v48, %v4356_v4  ;;  %v5617_v55 = vld [vmem:[#allocation20_spill] sm:$0xff]  ;;  %p2328_p2 = pnand %p2327_p0, %p2321_p3 }
 0x320   : > { %v4709_v33 = vpop.permute.xlu0 %1681  ;;  %v1471_v32 = vsel %vm5599_vm6, %v4488_v20, %v4368_v39  ;;  %vm5600_vm15 = vmand %vm4314_vm2, %vm5578_vm1  ;;  %vm5602_vm6 = vnez %v5410_v54  ;;  %v1428_v20 = vsel %vm5604_vm8, %v1422_v1, 0.0  ;;  %v1377_v61 = vadd.f32 %v1375_v36, %v4353_v13  ;;  %v5621_v1 = vld [vmem:[#allocation25_spill] sm:$0xff] }
 0x321   : > { %v1401_v44 = vsel %vm5600_vm15, %v1395_v58, 0.0  ;;  %vm5601_vm7 = vmand %vm4320_vm9, %vm5579_vm4  ;;  %vm5605_vm15 = vnez %v5414_v14  ;;  %vm5607_vm8 = vcmp.lt.s32.totalorder %v2840_v7, 98  ;;  %v1482_v38 = vmul.f32 %v4570_v57, %v1471_v32  ;;  %v5618_v58 = vld [vmem:[#allocation23_spill] sm:$0xff]  ;;  %v5627_v32 = vld [vmem:[#allocation26_spill] sm:$0xff] }
 0x322   : > { %v1402_v28 = vsel %vm5601_vm7, %v1396_v41, 0.0  ;;  %vm5603_vm5 = vmand %vm4314_vm2, %vm5602_vm6  ;;  %v1496_v56 = vsel %vm5607_vm8, %v4398_v37, %v4518_v31  ;;  %vm5609_vm6 = vnez %v5398_v47  ;;  %v1403_v30 = vadd.f32 %v1401_v44, %v5614_v16 }
 0x323   : > { %v4686_v29 = vpop.permute.xlu1 %1597  ;;  %v1427_v39 = vsel %vm5603_vm5, %v1421_v53, 0.0  ;;  %vm5608_vm4 = vmmov %vm5607_vm8  ;;  %v1404_v40 = vadd.f32 %v1402_v28, %v5615_v59  ;;  %v1430_v10 = vadd.f32 %v1428_v20, %v5617_v55  ;;  %v5620_v53 = vld [vmem:[#allocation29_spill] sm:$0xff]  ;;  %v5643_v55 = vld [vmem:[#allocation31_spill] sm:$0xff] }
 0x324   : > { %v1497_v8 = vsel %vm5608_vm4, %v4518_v31, %v4398_v37  ;;  %v4814_v13 = vpop.permute.xlu0 %1707  ;;  %vm5610_vm5 = vmand %vm4314_vm2, %vm5609_vm6  ;;  %v1481_v31 = vmul.f32 %v4570_v57, %v1470_v12  ;;  %vm5613_vm4 = vnez %v5612_v17  ;;  %v1429_v23 = vadd.f32 %v1427_v39, %v5616_v34 }
 0x325   : > { %v1453_v4 = vsel %vm5610_vm5, %v1447_v51, 0.0  ;;  %vm5611_vm8 = vmand %vm4320_vm9, %vm5485_vm10  ;;  %vm5619_vm2 = vnez %v5618_v58  ;;  %v1507_v57 = vmul.f32 %v4572_v6, %v1496_v56  ;;  %v1508_v41 = vmul.f32 %v4572_v6, %v1497_v8  ;;  %v5624_v51 = vld [vmem:[#allocation21_spill] sm:$0xff]  ;;  %v5625_v6 = vld [vmem:[#allocation24_spill] sm:$0xff] }
 0x326   : > { %v1454_v37 = vsel %vm5611_vm8, %v1448_v43, 0.0  ;;  %vm5622_vm5 = vcmp.lt.s32.totalorder %v2840_v7, 97  ;;  %v4856_v43 = vadd.f32 %v1453_v4, %v5624_v51  ;;  %vm5630_vm7 = vmand %vm4702_vm3, %vm5499_vm0  ;;  %v5633_v56 = vld [vmem:[#allocation27_spill] sm:$0xff]  ;;  %vm5653_vm6 = vcmp.le.f32.partialorder %v4608_v9, 15.0 }
 0x327   : > { %v4752_v27 = vpop.permute.xlu1 %1623  ;;  %v1522_v36 = vsel %vm5622_vm5, %v5621_v1, %v5620_v53  ;;  %vm5623_vm8 = vmmov %vm5622_vm5  ;;  %v4859_v12 = vadd.f32 %v1454_v37, %v5625_v6  ;;  %vm5626_vm5 = vnez %v5373_v19  ;;  %v1487_v39 = vsel %vm5630_vm7, %v1481_v31, 0.0 }
 0x328   : > { %v1523_v48 = vsel %vm5623_vm8, %v5620_v53, %v5621_v1  ;;  %vm5628_vm8 = vcmp.lt.s32.totalorder %v2840_v7, 96  ;;  %vm5631_vm9 = vmand %vm4719_vm13, %vm5500_vm11  ;;  %v1533_v37 = vmul.f32 %v4582_v45, %v1522_v36  ;;  %vm5638_vm11 = vcmp.lt.s32.totalorder %v2840_v7, 94  ;;  %v4910_v59 = vpop.permute.xlu0 %1733 }
 0x329   : > { %v1548_v44 = vsel %vm5628_vm8, %v5627_v32, %v4589_v25  ;;  %vm5629_vm1 = vmmov %vm5628_vm8  ;;  %v1488_v20 = vsel %vm5631_vm9, %v1482_v38, 0.0  ;;  %v1534_v31 = vmul.f32 %v4582_v45, %v1523_v48  ;;  %vm5636_vm9 = vnez %v5391_v22  ;;  %v5637_v38 = vld [vmem:[#allocation28_spill] sm:$0xff] }
 0x32a   : > { %v1549_v28 = vsel %vm5629_vm1, %v4589_v25, %v5627_v32  ;;  %vm5634_vm1 = vcmp.lt.s32.totalorder %v2840_v7, 95  ;;  %v1600_v16 = vsel %vm5638_vm11, %v5637_v38, %v4686_v29  ;;  %vm5640_vm0 = vmand %vm4702_vm3, %vm5605_vm15  ;;  %vm5641_vm8 = vnez %v5418_v15 }
 0x32b   : > { %v1658_v42 = vpop.permute.xlu1 %1657  ;;  %v1574_v25 = vsel %vm5634_vm1, %v5633_v56, %v4630_v49  ;;  %vm5635_vm7 = vmmov %vm5634_vm1  ;;  %v1513_v45 = vsel %vm5640_vm0, %v1507_v57, 0.0  ;;  %v1559_v53 = vmul.f32 %v5643_v55, %v1548_v44  ;;  %v1489_v1 = vadd.f32 %v1487_v39, %v1377_v61  ;;  %v5645_v57 = vld [vmem:[#allocation32_spill] sm:$0xff]  ;;  %v5648_v61 = vld [vmem:[#allocation30_spill] sm:$0xff] }
 0x32c   : > { %v1575_v8 = vsel %vm5635_vm7, %v4630_v49, %v5633_v56  ;;  %vm5639_vm1 = vmmov %vm5638_vm11  ;;  %v1490_v36 = vadd.f32 %v1488_v20, %v1378_v2  ;;  %v1585_v48 = vmul.f32 %v5645_v57, %v1574_v25  ;;  %vm5646_vm0 = vnez %v5435_v35 }
 0x32d   : > { %v1601_v49 = vsel %vm5639_vm1, %v4686_v29, %v5637_v38  ;;  %vm5642_vm11 = vmand %vm4719_vm13, %vm5641_vm8  ;;  %v1560_v29 = vmul.f32 %v5643_v55, %v1549_v28  ;;  %vm5644_vm1 = vnez %v5410_v54  ;;  %v1586_v51 = vmul.f32 %v5645_v57, %v1575_v8  ;;  %v5663_v8 = vld [vmem:[#allocation36_spill] sm:$0xff] }
 0x32e   : > { %v1514_v34 = vsel %vm5642_vm11, %v1508_v41, 0.0  ;;  %v5647_v41 = vld [vmem:[#allocation33_spill] sm:$0xff]  ;;  %vm5649_vm7 = vcmp.lt.s32.totalorder %v2840_v7, 93  ;;  %v1515_v39 = vadd.f32 %v1513_v45, %v1403_v30  ;;  %vm5651_vm10 = vmand %vm4702_vm3, %vm5613_vm4  ;;  %v1760_v45 = vpop.permute.xlu0 %1759 }
 0x32f   : > { %v1684_v4 = vpop.permute.xlu1 %1683  ;;  %v1611_v6 = vmul.f32 %v5647_v41, %v1600_v16  ;;  %v1612_v32 = vmul.f32 %v5647_v41, %v1601_v49  ;;  %v1626_v2 = vsel %vm5649_vm7, %v5648_v61, %v4752_v27  ;;  %vm5650_vm8 = vmmov %vm5649_vm7  ;;  %v1516_v20 = vadd.f32 %v1514_v34, %v1404_v40 }
 0x330   : > { %v1627_v44 = vsel %vm5650_vm8, %v4752_v27, %v5648_v61  ;;  %v1539_v56 = vsel %vm5651_vm10, %v1533_v37, 0.0  ;;  %vm5652_vm7 = vmand %vm4719_vm13, %vm5619_vm2  ;;  %vm5654_vm8 = vcmp.ge.f32.partialorder %v4608_v9, 0.0  ;;  %vm5660_vm2 = vcmp.ge.f32.partialorder %v4611_v18, 0.0 }
 0x331   : > { %v1540_v25 = vsel %vm5652_vm7, %v1534_v31, 0.0  ;;  %vm4964_vm15 = vmand %vm5654_vm8, %vm5653_vm6  ;;  %vm5659_vm7 = vcmp.le.f32.partialorder %v4611_v18, 15.0  ;;  %vm5664_vm8 = vcmp.lt.s32.totalorder %v2840_v7, 83  ;;  %v1541_v34 = vadd.f32 %v1539_v56, %v1429_v23  ;;  %v5674_v23 = vld [vmem:[#allocation35_spill] sm:$0xff] }
 0x332   : > { %vm5657_vm11 = vmand %vm4702_vm3, %vm5536_vm14  ;;  %v1660_v37 = vsel %vm5664_vm8, %v5663_v8, %v1658_v42  ;;  %v1542_v55 = vadd.f32 %v1540_v25, %v1430_v10  ;;  %vm5681_vm14 = vnez %v5418_v15 }
 0x333   : > { %v1710_v28 = vpop.permute.xlu1 %1709  ;;  %v1565_v30 = vsel %vm5657_vm11, %v1559_v53, 0.0  ;;  %vm5658_vm10 = vmand %vm4719_vm13, %vm5626_vm5  ;;  %v1671_v10 = vmul.f32 %v5674_v23, %v1660_v37  ;;  %vm5677_vm5 = vnez %v5414_v14 }
 0x334   : > { %v1566_v40 = vsel %vm5658_vm10, %v1560_v29, 0.0  ;;  %vm4982_vm6 = vmand %vm5660_vm2, %vm5659_vm7  ;;  %vm5668_vm7 = vnez %v5406_v5 }
 0x335   : > { %vm5665_vm11 = vmmov %vm5664_vm8  ;;  %vm5673_vm8 = vnez %v5364_v46 }
 0x336   : > { %v1661_v31 = vsel %vm5665_vm11, %v1658_v42, %v5663_v8  ;;  %vm5666_vm10 = vmand %vm4702_vm3, %vm5632_vm12  ;;  %v5669_v42 = vld [vmem:[#allocation34_spill] sm:$0xff] }
 0x337   : > { %v1591_v18 = vsel %vm5666_vm10, %v1585_v48, 0.0  ;;  %vm5667_vm2 = vmand %vm4719_vm13, %vm5636_vm9  ;;  %v1637_v16 = vmul.f32 %v5669_v42, %v1626_v2  ;;  %v1638_v49 = vmul.f32 %v5669_v42, %v1627_v44  ;;  %v1736_v57 = vpop.permute.xlu1 %1735  ;;  %v1672_v48 = vmul.f32 %v5674_v23, %v1661_v31 }
 0x338   : > { %v1592_v38 = vsel %vm5667_vm2, %v1586_v51, 0.0  ;;  %vm5670_vm11 = vmand %vm4702_vm3, %vm5644_vm1  ;;  %vm5672_vm2 = vnez %v5362_v52  ;;  %v1593_v61 = vadd.f32 %v1591_v18, %v1489_v1  ;;  %v1786_v52 = vpop.permute.xlu0 %1785 }
 0x339   : > { %v1617_v53 = vsel %vm5670_vm11, %v1611_v6, 0.0  ;;  %vm5671_vm10 = vmand %vm4719_vm13, %vm5646_vm0  ;;  %vm5675_vm11 = vcmp.lt.s32.totalorder %v2840_v7, 82  ;;  %v1567_v6 = vadd.f32 %v1565_v30, %v4856_v43  ;;  %v1594_v2 = vadd.f32 %v1592_v38, %v1490_v36 }
 0x33a   : > { %v1618_v29 = vsel %vm5671_vm10, %v1612_v32, 0.0  ;;  %v1686_v51 = vsel %vm5675_vm11, %v4709_v33, %v1684_v4  ;;  %vm5676_vm10 = vmmov %vm5675_vm11  ;;  %v1568_v32 = vadd.f32 %v1566_v40, %v4859_v12  ;;  %v5042_v44 = vadd.f32 %v1617_v53, %v1515_v39 }
 0x33b   : > { %v1687_v41 = vsel %vm5676_vm10, %v1684_v4, %v4709_v33  ;;  %v5044_v56 = vadd.f32 %v1618_v29, %v1516_v20  ;;  %vm5678_vm11 = vnez %v5398_v47  ;;  %vm5680_vm1 = vmand %vm4719_vm13, %vm5668_vm7  ;;  %v1697_v12 = vmul.f32 %v4728_v60, %v1686_v51  ;;  %v1762_v1 = vpop.permute.xlu1 %1761 }
 0x33c   : > { %vm5679_vm10 = vmand %vm4702_vm3, %vm5678_vm11  ;;  %v1644_v43 = vsel %vm5680_vm1, %v1638_v49, 0.0  ;;  %v1698_v4 = vmul.f32 %v4728_v60, %v1687_v41 }
 0x33d   : > { %v1643_v33 = vsel %vm5679_vm10, %v1637_v16, 0.0  ;;  %vm5682_vm10 = vcmp.lt.s32.totalorder %v2840_v7, 81  ;;  %vm5684_vm1 = vmand %vm4964_vm15, %vm5672_vm2  ;;  %v1646_v20 = vadd.f32 %v1644_v43, %v1542_v55  ;;  %vm5688_vm2 = vnez %v5618_v58 }
 0x33e   : > { %v1712_v50 = vsel %vm5682_vm10, %v4814_v13, %v1710_v28  ;;  %vm5683_vm13 = vmmov %vm5682_vm10  ;;  %v1677_v60 = vsel %vm5684_vm1, %v1671_v10, 0.0  ;;  %v1645_v39 = vadd.f32 %v1643_v33, %v1541_v34 }
 0x33f   : > { %v1713_v21 = vsel %vm5683_vm13, %v1710_v28, %v4814_v13  ;;  %vm5685_vm3 = vmand %vm4982_vm6, %vm5673_vm8  ;;  %vm5686_vm13 = vcmp.lt.s32.totalorder %v2840_v7, 79  ;;  %v1723_v30 = vmul.f32 %v4730_v11, %v1712_v50  ;;  %v1679_v37 = vadd.f32 %v1677_v60, %v1567_v6 }
 0x340   : > { %v1678_v36 = vsel %vm5685_vm3, %v1672_v48, 0.0  ;;  %vm1773_vm10 = vmand %vm4964_vm15, %vm5632_vm12  ;;  %v1764_v13 = vsel %vm5686_vm13, %v1760_v45, %v1762_v1  ;;  %v1724_v40 = vmul.f32 %v4730_v11, %v1713_v21 }
 0x341   : > { %vm5687_vm0 = vmmov %vm5686_vm13  ;;  %v1775_v46 = vmul.f32 %v4734_v26, %v1764_v13  ;;  %v1680_v31 = vadd.f32 %v1678_v36, %v1568_v32 }
 0x342   : > { %v1765_v28 = vsel %vm5687_vm0, %v1762_v1, %v1760_v45  ;;  %vm1774_vm8 = vmand %vm4982_vm6, %vm5636_vm9  ;;  %vm5689_vm0 = vcmp.lt.s32.totalorder %v2840_v7, 80 }
 0x343   : > { %v1776_v25 = vmul.f32 %v4734_v26, %v1765_v28  ;;  %v1738_v22 = vsel %vm5689_vm0, %v4910_v59, %v1736_v57  ;;  %vm5690_vm9 = vmmov %vm5689_vm0  ;;  %vm5693_vm0 = vnez %v5410_v54  ;;  %v1781_v14 = vsel %vm1773_vm10, %v1775_v46, 0.0 }
 0x344   : > { %v1739_v8 = vsel %vm5690_vm9, %v1736_v57, %v4910_v59  ;;  %vm5691_vm1 = vmand %vm4964_vm15, %vm5677_vm5  ;;  %v1788_v59 = vpop.permute.xlu1 %1787  ;;  %vm5694_vm5 = vnez %v5435_v35  ;;  %v1749_v3 = vmul.f32 %v4732_v24, %v1738_v22 }
 0x345   : > { %v1703_v26 = vsel %vm5691_vm1, %v1697_v12, 0.0  ;;  %vm5692_vm13 = vmand %vm4982_vm6, %vm5681_vm14  ;;  %v1782_v18 = vsel %vm1774_vm8, %v1776_v25, 0.0  ;;  %vm5695_vm14 = vcmp.lt.s32.totalorder %v2840_v7, 78  ;;  %v1750_v42 = vmul.f32 %v4732_v24, %v1739_v8  ;;  %v1812_v24 = vpop.permute.xlu0 %1811 }
 0x346   : > { %v1704_v11 = vsel %vm5692_vm13, %v1698_v4, 0.0  ;;  %vm1800_vm9 = vmand %vm4982_vm6, %vm5694_vm5  ;;  %v1790_v15 = vsel %vm5695_vm14, %v1786_v52, %v1788_v59  ;;  %vm5697_vm13 = vnez %v5368_v63  ;;  %v1705_v45 = vadd.f32 %v1703_v26, %v1593_v61 }
 0x347   : > { %vm5696_vm1 = vmmov %vm5695_vm14  ;;  %v1801_v16 = vmul.f32 %v4767_v62, %v1790_v15  ;;  %v1706_v34 = vadd.f32 %v1704_v11, %v1594_v2  ;;  %vm5700_vm8 = vnez %v5373_v19  ;;  %v1784_v29 = vadd.f32 %v1782_v18, %v1680_v31  ;;  %v5705_v18 = vld [vmem:[#allocation15_spill] sm:$0xff] }
 0x348   : > { %v1791_v38 = vsel %vm5696_vm1, %v1788_v59, %v1786_v52  ;;  %vm1747_vm3 = vmand %vm4964_vm15, %vm5697_vm13  ;;  %v1814_v19 = vpop.permute.xlu1 %1813  ;;  %vm5702_vm1 = vcmp.lt.s32.totalorder %v2840_v7, 77 }
 0x349   : > { %v1802_v49 = vmul.f32 %v4767_v62, %v1791_v38  ;;  %vm5698_vm12 = vmand %vm4964_vm15, %vm5613_vm4  ;;  %v1783_v62 = vadd.f32 %v1781_v14, %v1679_v37  ;;  %v1816_v54 = vsel %vm5702_vm1, %v1812_v24, %v1814_v19  ;;  %v1755_v47 = vsel %vm1747_vm3, %v1749_v3, 0.0  ;;  %v5706_v38 = vld [vmem:[#allocation16_spill] sm:$0xff] }
 0x34a   : > { %v1729_v55 = vsel %vm5698_vm12, %v1723_v30, 0.0  ;;  %vm5699_vm10 = vmand %vm4982_vm6, %vm5688_vm2  ;;  %v1827_v48 = vmul.f32 %v4769_v0, %v1816_v54  ;;  %v1757_v61 = vadd.f32 %v1755_v47, %v1645_v39 }
 0x34b   : > { %v1730_v53 = vsel %vm5699_vm10, %v1724_v40, 0.0  ;;  %vm1748_vm14 = vmand %vm4982_vm6, %vm5700_vm8  ;;  %v1808_v58 = vsel %vm1800_vm9, %v1802_v49, 0.0  ;;  %v1731_v9 = vadd.f32 %v1729_v55, %v5042_v44 }
 0x34c   : > { %vm5701_vm4 = vmand %vm4964_vm15, %vm5693_vm0  ;;  %v1810_v23 = vadd.f32 %v1808_v58, %v1706_v34  ;;  %v1756_v10 = vsel %vm1748_vm14, %v1750_v42, 0.0  ;;  %v1732_v51 = vadd.f32 %v1730_v53, %v5044_v56 }
 0x34d   : > { %v1807_v17 = vsel %vm5701_vm4, %v1801_v16, 0.0  ;;  %vm1825_vm2 = vmand %vm4964_vm15, %vm5678_vm11  ;;  %v1758_v2 = vadd.f32 %v1756_v10, %v1646_v20  ;;  %vm1843_vm15 = vcmask 1041408   ;;  %v1859_v20 = vstv %s1858_s24 }
 0x34e   : > { %v1809_v57 = vadd.f32 %v1807_v17, %v1705_v45  ;;  %vm1826_vm0 = vmand %vm4982_vm6, %vm5668_vm7  ;;  %v1840_v6 = vadd.f32 %v1810_v23, %v1784_v29  ;;  %v1833_v32 = vsel %vm1825_vm2, %v1827_v48, 0.0 }
 0x34f   : > { %vm5703_vm12 = vmmov %vm5702_vm1  ;;  %v1835_v27 = vadd.f32 %v1833_v32, %v1731_v9 }
 0x350   : > { %v1817_v35 = vsel %vm5703_vm12, %v1814_v19, %v1812_v24  ;;  %v1839_v41 = vadd.f32 %v1809_v57, %v1783_v62 }
 0x351   : > { %v1828_v5 = vmul.f32 %v4769_v0, %v1817_v35  ;;  %v1837_v63 = vadd.f32 %v1835_v27, %v1757_v61 }
 0x353   : > { %v1834_v7 = vsel %vm1826_vm0, %v1828_v5, 0.0  ;;  %v1841_v12 = vadd.f32 %v1839_v41, %v1837_v63 }
 0x354   : > { %v1836_v33 = vadd.f32 %v1834_v7, %v1732_v51 }
 0x355   : > { %v1844_v50 = vsel %vm1843_vm15, %v1841_v12, 0.0 }
 0x356   : > { %v1838_v43 = vadd.f32 %v1836_v33, %v1758_v2  ;;  %v1845_v0 = vrot.slane %v1844_v50, 4 }
 0x358   : > { %v1842_v4 = vadd.f32 %v1840_v6, %v1838_v43  ;;  %v1846_v44 = vadd.f32 %v1845_v0, %v1844_v50 }
 0x35a   : > { %v1851_v21 = vsel %vm1843_vm15, %v1842_v4, 0.0  ;;  %v1847_v60 = vrot.slane %v1846_v44, 2 }
 0x35b   : > { %v1852_v1 = vrot.slane %v1851_v21, 4 }
 0x35c   : > { %v1848_v13 = vadd.f32 %v1847_v60, %v1846_v44 }
 0x35d   : > { %v1853_v56 = vadd.f32 %v1852_v1, %v1851_v21 }
 0x35e   : > { %v1849_v52 = vrot.slane %v1848_v13, 1 }
 0x35f   : > { %v1854_v36 = vrot.slane %v1853_v56, 2 }
 0x360   : > { %v1850_v46 = vadd.f32 %v1849_v52, %v1848_v13 }
 0x361   : > { %v1855_v28 = vadd.f32 %v1854_v36, %v1853_v56 }
 0x362   : > { %v1860_v30 = vadd.f32 %v1859_v20, %v1850_v46 }
 0x363   : > { %v1856_v39 = vrot.slane %v1855_v28, 1 }
 0x364   : > { %v2115_v22 = vmul.f32 -1.442695, %v1860_v30 }
 0x365   : > { %v1857_v25 = vadd.f32 %v1856_v39, %v1855_v28 }
 0x366   : > { %2250 = vpow2.f32 %v2115_v22 }
 0x367   : > { %v1861_v40 = vadd.f32 %v1859_v20, %v1857_v25 }
 0x369   : > { %v2116_v8 = vmul.f32 -1.442695, %v1861_v40 }
 0x36b   : > { %2252 = vpow2.f32 %v2116_v8 }
 0x370   : > { %v2251_v37 = vpop.eup %2250 }
 0x371   : > { %v1868_v26 = vadd.f32 1.0, %v2251_v37 }
 0x373   : > { %2254 = vrcp.f32 %v1868_v26 }
 0x375   : > { %v2253_v31 = vpop.eup %2252 }
 0x376   : > { %v1869_v11 = vadd.f32 1.0, %v2253_v31 }
 0x378   : > { %2256 = vrcp.f32 %v1869_v11 }
 0x37d   : > { %v2255_v59 = vpop.eup %2254 }
 0x37e   : > { %v1874_v15 = vmul.f32 %v2255_v59, %v5705_v18 }
 0x380   : > { %1876 = vst [vmem:[%s241_s8] sm:$0xff] %v1874_v15 }
 0x382   : > { %v2257_v14 = vpop.eup %2256 }
 0x383   : > { %v1875_v3 = vmul.f32 %v2257_v14, %v5706_v38 }
 0x385   : > { %1877 = vst [vmem:[%s241_s8 + $0x8] sm:$0xff] %v1875_v3 }
 0x386   : > { %2331 = shalt.err (!%p2328_p2)
}
 0x387   : > { %s2332_s25 = scalar_lea.hbm %s5196_s12, 256  ;;  %s2336_s26 = scalar_lea.hbm %s5244_s4, 512 }
 0x388   : > { %p2333_p10 = scmp.ne.s32.totalorder %s5196_s12, %s2332_s25  ;;  %p2337_p1 = scmp.lt.u32.totalorder %s5196_s12, %s5244_s4 }
 0x389   : > { %p2338_p9 = scmp.lt.u32.totalorder %s2336_s26, %s2332_s25  ;;  %p2340_p6 = scmp.lt.u32.totalorder %s2332_s25, %s5196_s12 }
 0x38a   : > { %p2334_p5 = pnand %p2333_p10, %p2555_p8 }
 0x38b   : > { %p2339_p4 = por %p2338_p9, %p2337_p1 }
 0x38c   : > { %p2335_p11 = pneg %p2334_p5 }
 0x38d   : > { %p2341_p13 = por %p2340_p6, %p2339_p4 }
 0x38f   : > { %p2342_p3 = pnand %p2341_p13, %p2335_p11 }
 0x391   : > { %2345 = shalt.err (!%p2342_p3)
}
 0x392   : > { %2134 = dma.vmem_to_hbm [thread:$0]  (%p2555_p8), %s5198_s9, 256, %s5196_s12, %s1879_s3  }
 0x393 PF: > { %s1905_s10 = sand.u32 1, %s2380_s17   ;;  %p5707_p7 = scmp.ne.s32.totalorder %s5341_s23, 0 }
 0x394   : > { %p5708_p12 = scmp.ge.s32.totalorder %s2392_s20, 2  ;;  %s1906_s22 = scalar_lea.sflag [#allocation5], %s1905_s10 }
 0x396   : > { %p2148_p0 = pnand %p5708_p12, %p5707_p7 }
 0x398   : > { %2375 = dma.done.wait (!%p2148_p0), %s1906_s22, 256  }
 0x399   : > { %2377 = vsyncadd (!%p2148_p0), %s1906_s22, 4294967040  ;;  %p20_p2 = scmp.ge.s32.totalorder %s2536_s6, 4   ;;  %s5709_s17 = smov %s2384_s18 }
 0x39a   : > { %s5710_s18 = smov %s2388_s19  ;;  %s5711_s19 = smov %s2551_s13 }
 0x39b   : > { %s5712_s20 = smov %s2536_s6  ;;  %22 = sbr.rel (!%p20_p2) target bundleno = 11 (0xb), region = 90 }
 0x3a2   :  { %1911 = vsyncpa [#allocation4], 1 }
 0x3a3   :  { %1913 = vsyncpa [#allocation4 + $0x1], 1 }
 0x3a4   :  { %1914 = vsyncpa [#allocation5], 1 }
 0x3a5   :  { %1916 = vsyncpa [#allocation5 + $0x1], 1 }
 0x3a6   :  { %1917 = vsyncpa [#allocation6], 1 }
 0x3a7   :  { %1919 = vsyncpa [#allocation6 + $0x1], 1 }
 0x3a8   :  { %1920 = vsyncpa [#allocation9], 1 }

</bundles_post_ra>
